<compile_context>
chip_gen: v7x
topology: tpu7x:2x2x1
jax: 0.10.0
libtpu: 0.0.40
codegen_flags: <defaults>
</compile_context>

<pallas_src>
import functools

import jax
import jax.numpy as jnp
import numpy as np
from jax.experimental import pallas as pl
from jax.experimental.pallas import tpu as pltpu

LRELU_SLOPE = 0.01


# --------------------------------------------------------------------------- Pallas kernels
def _make_conv_tap_kernel(k_dim, h_out, w_out, c_in, c_out, negative_slope):
    """Conv expressed as k_dim*k_dim static-slice taps, each a single MXU matmul.

    x_ref : (h_out + k_dim - 1, w_out + k_dim - 1, c_in)  f32  (pre-padded / s2d slab)
    w_ref : (k_dim*k_dim, c_in, c_out)                    f32
    b_ref : (1, c_out)                                    f32
    o_ref : (h_out, w_out, c_out)                         f32
    """
    hw = h_out * w_out

    def kernel(x_ref, w_ref, b_ref, o_ref):
        acc = jnp.zeros((hw, c_out), jnp.float32)
        for kh in range(k_dim):
            for kw in range(k_dim):
                patch = x_ref[kh:kh + h_out, kw:kw + w_out, :]       # (h_out, w_out, c_in)
                lhs = patch.reshape(hw, c_in).astype(jnp.bfloat16)   # single-pass bf16 MXU
                rhs = w_ref[kh * k_dim + kw].astype(jnp.bfloat16)    # (c_in, c_out)
                acc = acc + jnp.dot(lhs, rhs, preferred_element_type=jnp.float32)
        acc = acc + b_ref[...]                                       # (1, c_out) broadcast
        if negative_slope is not None:
            acc = jnp.where(acc >= 0.0, acc, negative_slope * acc)   # LeakyReLU
        o_ref[...] = acc.reshape(h_out, w_out, c_out)

    return kernel


def _conv_taps_pallas(x_pre, w_taps, bias, h_out, w_out, negative_slope):
    n, hp, wp, c_in = x_pre.shape
    taps, _, c_out = w_taps.shape
    k_dim = 2 if taps == 4 else 4
    kernel = _make_conv_tap_kernel(k_dim, h_out, w_out, c_in, c_out, negative_slope)
    return pl.pallas_call(
        kernel,
        out_shape=jax.ShapeDtypeStruct((n, h_out, w_out, c_out), jnp.float32),
        grid_spec=pltpu.PrefetchScalarGridSpec(
            num_scalar_prefetch=0,
            grid=(n,),
            in_specs=[
                pl.BlockSpec((None, hp, wp, c_in), lambda i: (i, 0, 0, 0)),
                pl.BlockSpec((taps, c_in, c_out), lambda i: (0, 0, 0)),
                pl.BlockSpec((1, c_out), lambda i: (0, 0)),
            ],
            out_specs=pl.BlockSpec((None, h_out, w_out, c_out), lambda i: (i, 0, 0, 0)),
        ),
        compiler_params=pltpu.CompilerParams(dimension_semantics=("parallel",)),
    )(x_pre, w_taps, bias)


# --------------------------------------------------------------------------- layer wrappers
def _conv4x4_s2(x_nhwc, w_oihw, bias, negative_slope):
    """kernel=4, stride=2, pad=1 conv as space-to-depth(2) + stride-1 2x2 conv (Pallas)."""
    n, h, w, c = x_nhwc.shape
    assert h % 2 == 0 and w % 2 == 0
    c_out = w_oihw.shape[0]
    h_out, w_out = h // 2, w // 2
    xp = jnp.pad(x_nhwc, ((0, 0), (1, 1), (1, 1), (0, 0)))
    hp, wp = h + 2, w + 2
    x2 = xp.reshape(n, hp // 2, 2, wp // 2, 2, c)
    x2 = jnp.transpose(x2, (0, 1, 3, 2, 4, 5)).reshape(n, hp // 2, wp // 2, 4 * c)
    # weights (c_out, c_in, 4, 4) -> 4 taps [(qh,qw)] of shape (4*c_in, c_out), channels (a,b,c)
    wt = jnp.transpose(w_oihw, (2, 3, 1, 0))                  # (kh, kw, c_in, c_out)
    wt = wt.reshape(2, 2, 2, 2, c, c_out)                     # (qh, a, qw, b, c_in, c_out)
    w_taps = jnp.transpose(wt, (0, 2, 1, 3, 4, 5)).reshape(4, 4 * c, c_out)
    return _conv_taps_pallas(x2.astype(jnp.float32), w_taps.astype(jnp.float32),
                             bias.reshape(1, c_out).astype(jnp.float32),
                             h_out, w_out, negative_slope)


def _conv4x4_s1(x_nhwc, w_oihw, bias, negative_slope):
    """kernel=4, stride=1, pad=1 conv (Pallas, 16 static-slice taps)."""
    n, h, w, c = x_nhwc.shape
    c_out = w_oihw.shape[0]
    h_out, w_out = h - 1, w - 1
    xp = jnp.pad(x_nhwc, ((0, 0), (1, 1), (1, 1), (0, 0)))
    w_taps = jnp.transpose(w_oihw, (2, 3, 1, 0)).reshape(16, c, c_out)
    return _conv_taps_pallas(xp.astype(jnp.float32), w_taps.astype(jnp.float32),
                             bias.reshape(1, c_out).astype(jnp.float32),
                             h_out, w_out, negative_slope)


# --------------------------------------------------------------------------- spectral norm
def _l2normalize(v, eps=1e-12):
    return v / (jnp.linalg.norm(v) + eps)


def _spectral_norm(w, u, power_iterations=1):
    """Forward semantics of the repo's SpectralNorm wrapper: w / sigma (one power iteration)."""
    c_out = w.shape[0]
    w_mat = w.reshape(c_out, -1)
    hi = jax.lax.Precision.HIGHEST  # tiny matrices; keep sigma exact in both paths
    v = None
    for _ in range(power_iterations):
        v = _l2normalize(jnp.dot(w_mat.T, u, precision=hi))
        u = _l2normalize(jnp.dot(w_mat, v, precision=hi))
    sigma = jnp.dot(u, jnp.dot(w_mat, v, precision=hi), precision=hi)
    return w / sigma


# --------------------------------------------------------------------------- forward passes
@functools.partial(jax.jit, static_argnames=("strides",))
def discriminator_forward(x_nchw, params, strides):
    """Pallas forward: conv1(main(x)).squeeze(); x is NCHW like the PyTorch module."""
    h = jnp.transpose(x_nchw, (0, 2, 3, 1)).astype(jnp.float32)  # NCHW -> NHWC once (C=3)
    for w, b, u, s in zip(params["w"], params["b"], params["u"], strides):
        wn = _spectral_norm(w, u)
        if s == 2:
            h = _conv4x4_s2(h, wn, b, LRELU_SLOPE)
        else:
            h = _conv4x4_s1(h, wn, b, LRELU_SLOPE)
    wn = _spectral_norm(params["w_out"], params["u_out"])
    zero_b = jnp.zeros((1,), jnp.float32)            # conv1 has bias=False
    out = _conv4x4_s1(h, wn, zero_b, None)           # (N, Hf, Wf, 1), no activation
    return jnp.squeeze(out)                          # matches torch .squeeze()


def discriminator_reference(x_nchw, params, strides):
    """Plain-JAX reference (lax.conv) with matching bf16-on-MXU / f32-accumulate numerics."""
    def conv(x, wn, s):
        return jax.lax.conv_general_dilated(
            x.astype(jnp.bfloat16), wn.astype(jnp.bfloat16),
            window_strides=(s, s), padding=((1, 1), (1, 1)),
            dimension_numbers=("NCHW", "OIHW", "NCHW"),
            preferred_element_type=jnp.float32)

    h = x_nchw.astype(jnp.float32)
    for w, b, u, s in zip(params["w"], params["b"], params["u"], strides):
        wn = _spectral_norm(w, u)
        h = conv(h, wn, s) + b.reshape(1, -1, 1, 1)
        h = jnp.where(h >= 0.0, h, LRELU_SLOPE * h)
    wn = _spectral_norm(params["w_out"], params["u_out"])
    out = conv(h, wn, 1)
    return jnp.squeeze(out)


# --------------------------------------------------------------------------- demo / check
if __name__ == "__main__":
    # Small config consistent with the module: discriminator(image_size=32, conv_dim=8, repeat_num=3)
    N, image_size, conv_dim, repeat_num = 2, 32, 8, 3

    layer_dims = [(3, conv_dim, 2)]
    curr = conv_dim
    for _ in range(1, repeat_num):
        layer_dims.append((curr, curr * 2, 2))
        curr *= 2
    layer_dims.append((curr, curr * 2, 1))
    curr *= 2                                   # feature dim feeding conv1

    key = jax.random.PRNGKey(0)
    keys = jax.random.split(key, 3 * len(layer_dims) + 3)
    ws, bs, us, strides = [], [], [], []
    k = 0
    for (cin, cout, s) in layer_dims:
        ws.append(0.2 * jax.random.normal(keys[k], (cout, cin, 4, 4), jnp.float32)); k += 1
        bs.append(0.05 * jax.random.normal(keys[k], (cout,), jnp.float32)); k += 1
        us.append(_l2normalize(jax.random.normal(keys[k], (cout,), jnp.float32))); k += 1
        strides.append(s)
    w_out = 0.2 * jax.random.normal(keys[k], (1, curr, 4, 4), jnp.float32); k += 1
    u_out = _l2normalize(jax.random.normal(keys[k], (1,), jnp.float32)); k += 1
    x = jax.random.normal(keys[k], (N, 3, image_size, image_size), jnp.float32)

    params = {"w": ws, "b": bs, "u": us, "w_out": w_out, "u_out": u_out}
    strides = tuple(strides)

    out = jax.block_until_ready(discriminator_forward(x, params, strides))
    ref = jax.block_until_ready(discriminator_reference(x, params, strides))

    assert out.shape == ref.shape, (out.shape, ref.shape)
    np.testing.assert_allclose(np.asarray(out), np.asarray(ref), rtol=2e-3, atol=2e-3)
    print("KERNEL_OK")
</pallas_src>

<mosaic_0001>
module attributes {stable_mosaic.version = 11 : i64} {
  func.func @kernel(%arg0: i32, %arg1: memref<1x17x17x12xf32, #tpu.memory_space<vmem>>, %arg2: memref<4x12x8xf32, #tpu.memory_space<vmem>>, %arg3: memref<1x8xf32, #tpu.memory_space<vmem>>, %arg4: memref<1x16x16x8xf32, #tpu.memory_space<vmem>>) attributes {dimension_semantics = [#tpu.dimension_semantics<parallel>], iteration_bounds = array<i64: 2>, scalar_prefetch = 0 : i64, scratch_operands = 0 : i64, tpu.core_type = #tpu.core_type<tc>, window_params = [{transform_indices = @transform_0, window_bounds = array<i64: 1, 17, 17, 12>}, {pipeline_mode = #tpu.pipeline_mode<synchronous>, transform_indices = @transform_1, window_bounds = array<i64: 4, 12, 8>}, {pipeline_mode = #tpu.pipeline_mode<synchronous>, transform_indices = @transform_2, window_bounds = array<i64: 1, 8>}, {transform_indices = @transform_3, window_bounds = array<i64: 1, 16, 16, 8>}]} {
    %cst = arith.constant 0.000000e+00 : f32
    %0 = vector.broadcast %cst : f32 to vector<256x8xf32>
    %c0 = arith.constant 0 : index
    %c0_0 = arith.constant 0 : index
    %c0_1 = arith.constant 0 : index
    %c0_2 = arith.constant 0 : index
    %1 = vector.load %arg1[%c0, %c0_0, %c0_1, %c0_2] : memref<1x17x17x12xf32, #tpu.memory_space<vmem>>, vector<1x16x16x12xf32>
    %2 = vector.shape_cast %1 : vector<1x16x16x12xf32> to vector<16x16x12xf32>
    %3 = vector.shape_cast %2 : vector<16x16x12xf32> to vector<256x12xf32>
    %4 = arith.truncf %3 : vector<256x12xf32> to vector<256x12xbf16>
    %c0_3 = arith.constant 0 : index
    %c0_4 = arith.constant 0 : index
    %c0_5 = arith.constant 0 : index
    %5 = vector.load %arg2[%c0_3, %c0_4, %c0_5] : memref<4x12x8xf32, #tpu.memory_space<vmem>>, vector<1x12x8xf32>
    %6 = vector.shape_cast %5 : vector<1x12x8xf32> to vector<12x8xf32>
    %7 = arith.truncf %6 : vector<12x8xf32> to vector<12x8xbf16>
    %cst_6 = arith.constant dense<0.000000e+00> : vector<256x8xf32>
    %8 = tpu.matmul %4, %7, %cst_6 {dimension_numbers = #tpu.dot_dimension_numbers<[1], [0], [0], [1], [0, 0, 1, 1], [], []>} : vector<256x12xbf16>, vector<12x8xbf16>, vector<256x8xf32> -> vector<256x8xf32>
    %9 = arith.addf %0, %8 : vector<256x8xf32>
    %c0_7 = arith.constant 0 : index
    %c0_8 = arith.constant 0 : index
    %c1 = arith.constant 1 : index
    %c0_9 = arith.constant 0 : index
    %10 = vector.load %arg1[%c0_7, %c0_8, %c1, %c0_9] : memref<1x17x17x12xf32, #tpu.memory_space<vmem>>, vector<1x16x16x12xf32>
    %11 = vector.shape_cast %10 : vector<1x16x16x12xf32> to vector<16x16x12xf32>
    %12 = vector.shape_cast %11 : vector<16x16x12xf32> to vector<256x12xf32>
    %13 = arith.truncf %12 : vector<256x12xf32> to vector<256x12xbf16>
    %c1_10 = arith.constant 1 : index
    %c0_11 = arith.constant 0 : index
    %c0_12 = arith.constant 0 : index
    %14 = vector.load %arg2[%c1_10, %c0_11, %c0_12] : memref<4x12x8xf32, #tpu.memory_space<vmem>>, vector<1x12x8xf32>
    %15 = vector.shape_cast %14 : vector<1x12x8xf32> to vector<12x8xf32>
    %16 = arith.truncf %15 : vector<12x8xf32> to vector<12x8xbf16>
    %cst_13 = arith.constant dense<0.000000e+00> : vector<256x8xf32>
    %17 = tpu.matmul %13, %16, %cst_13 {dimension_numbers = #tpu.dot_dimension_numbers<[1], [0], [0], [1], [0, 0, 1, 1], [], []>} : vector<256x12xbf16>, vector<12x8xbf16>, vector<256x8xf32> -> vector<256x8xf32>
    %18 = arith.addf %9, %17 : vector<256x8xf32>
    %c0_14 = arith.constant 0 : index
    %c1_15 = arith.constant 1 : index
    %c0_16 = arith.constant 0 : index
    %c0_17 = arith.constant 0 : index
    %19 = vector.load %arg1[%c0_14, %c1_15, %c0_16, %c0_17] : memref<1x17x17x12xf32, #tpu.memory_space<vmem>>, vector<1x16x16x12xf32>
    %20 = vector.shape_cast %19 : vector<1x16x16x12xf32> to vector<16x16x12xf32>
    %21 = vector.shape_cast %20 : vector<16x16x12xf32> to vector<256x12xf32>
    %22 = arith.truncf %21 : vector<256x12xf32> to vector<256x12xbf16>
    %c2 = arith.constant 2 : index
    %c0_18 = arith.constant 0 : index
    %c0_19 = arith.constant 0 : index
    %23 = vector.load %arg2[%c2, %c0_18, %c0_19] : memref<4x12x8xf32, #tpu.memory_space<vmem>>, vector<1x12x8xf32>
    %24 = vector.shape_cast %23 : vector<1x12x8xf32> to vector<12x8xf32>
    %25 = arith.truncf %24 : vector<12x8xf32> to vector<12x8xbf16>
    %cst_20 = arith.constant dense<0.000000e+00> : vector<256x8xf32>
    %26 = tpu.matmul %22, %25, %cst_20 {dimension_numbers = #tpu.dot_dimension_numbers<[1], [0], [0], [1], [0, 0, 1, 1], [], []>} : vector<256x12xbf16>, vector<12x8xbf16>, vector<256x8xf32> -> vector<256x8xf32>
    %27 = arith.addf %18, %26 : vector<256x8xf32>
    %c0_21 = arith.constant 0 : index
    %c1_22 = arith.constant 1 : index
    %c1_23 = arith.constant 1 : index
    %c0_24 = arith.constant 0 : index
    %28 = vector.load %arg1[%c0_21, %c1_22, %c1_23, %c0_24] : memref<1x17x17x12xf32, #tpu.memory_space<vmem>>, vector<1x16x16x12xf32>
    %29 = vector.shape_cast %28 : vector<1x16x16x12xf32> to vector<16x16x12xf32>
    %30 = vector.shape_cast %29 : vector<16x16x12xf32> to vector<256x12xf32>
    %31 = arith.truncf %30 : vector<256x12xf32> to vector<256x12xbf16>
    %c3 = arith.constant 3 : index
    %c0_25 = arith.constant 0 : index
    %c0_26 = arith.constant 0 : index
    %32 = vector.load %arg2[%c3, %c0_25, %c0_26] : memref<4x12x8xf32, #tpu.memory_space<vmem>>, vector<1x12x8xf32>
    %33 = vector.shape_cast %32 : vector<1x12x8xf32> to vector<12x8xf32>
    %34 = arith.truncf %33 : vector<12x8xf32> to vector<12x8xbf16>
    %cst_27 = arith.constant dense<0.000000e+00> : vector<256x8xf32>
    %35 = tpu.matmul %31, %34, %cst_27 {dimension_numbers = #tpu.dot_dimension_numbers<[1], [0], [0], [1], [0, 0, 1, 1], [], []>} : vector<256x12xbf16>, vector<12x8xbf16>, vector<256x8xf32> -> vector<256x8xf32>
    %36 = arith.addf %27, %35 : vector<256x8xf32>
    %c0_28 = arith.constant 0 : index
    %c0_29 = arith.constant 0 : index
    %37 = vector.load %arg3[%c0_28, %c0_29] : memref<1x8xf32, #tpu.memory_space<vmem>>, vector<1x8xf32>
    %38 = vector.broadcast %37 : vector<1x8xf32> to vector<256x8xf32>
    %39 = arith.addf %36, %38 : vector<256x8xf32>
    %cst_30 = arith.constant 0.000000e+00 : f32
    %40 = vector.broadcast %cst_30 : f32 to vector<256x8xf32>
    %41 = arith.cmpf oge, %39, %40 : vector<256x8xf32>
    %cst_31 = arith.constant 0.00999999977 : f32
    %42 = vector.broadcast %cst_31 : f32 to vector<256x8xf32>
    %43 = arith.mulf %42, %39 : vector<256x8xf32>
    %44 = arith.select %41, %39, %43 : vector<256x8xi1>, vector<256x8xf32>
    %45 = vector.shape_cast %44 : vector<256x8xf32> to vector<16x16x8xf32>
    %c0_32 = arith.constant 0 : index
    %c0_33 = arith.constant 0 : index
    %c0_34 = arith.constant 0 : index
    %c0_35 = arith.constant 0 : index
    %46 = vector.load %arg4[%c0_32, %c0_33, %c0_34, %c0_35] : memref<1x16x16x8xf32, #tpu.memory_space<vmem>>, vector<1x16x16x8xf32>
    %47 = vector.shape_cast %46 : vector<1x16x16x8xf32> to vector<16x16x8xf32>
    %48 = vector.shape_cast %45 : vector<16x16x8xf32> to vector<1x16x16x8xf32>
    tpu.vector_store %arg4[%c0_32, %c0_33, %c0_34, %c0_35], %48 {strides = array<i32>} : memref<1x16x16x8xf32, #tpu.memory_space<vmem>>, vector<1x16x16x8xf32>,
    return
  }
  func.func @transform_0(%arg0: i32) -> (i32, i32, i32, i32) {
    %c0_i32 = arith.constant 0 : i32
    %c0_i32_0 = arith.constant 0 : i32
    %c0_i32_1 = arith.constant 0 : i32
    %c0_i32_2 = arith.constant 0 : i32
    return %arg0, %c0_i32, %c0_i32_0, %c0_i32_1 : i32, i32, i32, i32
  }
  func.func @transform_1(%arg0: i32) -> (i32, i32, i32) {
    %c0_i32 = arith.constant 0 : i32
    %c0_i32_0 = arith.constant 0 : i32
    %c0_i32_1 = arith.constant 0 : i32
    %c0_i32_2 = arith.constant 0 : i32
    return %c0_i32, %c0_i32_0, %c0_i32_1 : i32, i32, i32
  }
  func.func @transform_2(%arg0: i32) -> (i32, i32) {
    %c0_i32 = arith.constant 0 : i32
    %c0_i32_0 = arith.constant 0 : i32
    %c0_i32_1 = arith.constant 0 : i32
    return %c0_i32, %c0_i32_0 : i32, i32
  }
  func.func @transform_3(%arg0: i32) -> (i32, i32, i32, i32) {
    %c0_i32 = arith.constant 0 : i32
    %c0_i32_0 = arith.constant 0 : i32
    %c0_i32_1 = arith.constant 0 : i32
    %c0_i32_2 = arith.constant 0 : i32
    return %arg0, %c0_i32, %c0_i32_0, %c0_i32_1 : i32, i32, i32, i32
  }
}

module attributes {stable_mosaic.version = 11 : i64} {
  func.func @kernel(%arg0: i32, %arg1: memref<1x9x9x32xf32, #tpu.memory_space<vmem>>, %arg2: memref<4x32x16xf32, #tpu.memory_space<vmem>>, %arg3: memref<1x16xf32, #tpu.memory_space<vmem>>, %arg4: memref<1x8x8x16xf32, #tpu.memory_space<vmem>>) attributes {dimension_semantics = [#tpu.dimension_semantics<parallel>], iteration_bounds = array<i64: 2>, scalar_prefetch = 0 : i64, scratch_operands = 0 : i64, tpu.core_type = #tpu.core_type<tc>, window_params = [{transform_indices = @transform_0, window_bounds = array<i64: 1, 9, 9, 32>}, {pipeline_mode = #tpu.pipeline_mode<synchronous>, transform_indices = @transform_1, window_bounds = array<i64: 4, 32, 16>}, {pipeline_mode = #tpu.pipeline_mode<synchronous>, transform_indices = @transform_2, window_bounds = array<i64: 1, 16>}, {transform_indices = @transform_3, window_bounds = array<i64: 1, 8, 8, 16>}]} {
    %cst = arith.constant 0.000000e+00 : f32
    %0 = vector.broadcast %cst : f32 to vector<64x16xf32>
    %c0 = arith.constant 0 : index
    %c0_0 = arith.constant 0 : index
    %c0_1 = arith.constant 0 : index
    %c0_2 = arith.constant 0 : index
    %1 = vector.load %arg1[%c0, %c0_0, %c0_1, %c0_2] : memref<1x9x9x32xf32, #tpu.memory_space<vmem>>, vector<1x8x8x32xf32>
    %2 = vector.shape_cast %1 : vector<1x8x8x32xf32> to vector<8x8x32xf32>
    %3 = vector.shape_cast %2 : vector<8x8x32xf32> to vector<64x32xf32>
    %4 = arith.truncf %3 : vector<64x32xf32> to vector<64x32xbf16>
    %c0_3 = arith.constant 0 : index
    %c0_4 = arith.constant 0 : index
    %c0_5 = arith.constant 0 : index
    %5 = vector.load %arg2[%c0_3, %c0_4, %c0_5] : memref<4x32x16xf32, #tpu.memory_space<vmem>>, vector<1x32x16xf32>
    %6 = vector.shape_cast %5 : vector<1x32x16xf32> to vector<32x16xf32>
    %7 = arith.truncf %6 : vector<32x16xf32> to vector<32x16xbf16>
    %cst_6 = arith.constant dense<0.000000e+00> : vector<64x16xf32>
    %8 = tpu.matmul %4, %7, %cst_6 {dimension_numbers = #tpu.dot_dimension_numbers<[1], [0], [0], [1], [0, 0, 1, 1], [], []>} : vector<64x32xbf16>, vector<32x16xbf16>, vector<64x16xf32> -> vector<64x16xf32>
    %9 = arith.addf %0, %8 : vector<64x16xf32>
    %c0_7 = arith.constant 0 : index
    %c0_8 = arith.constant 0 : index
    %c1 = arith.constant 1 : index
    %c0_9 = arith.constant 0 : index
    %10 = vector.load %arg1[%c0_7, %c0_8, %c1, %c0_9] : memref<1x9x9x32xf32, #tpu.memory_space<vmem>>, vector<1x8x8x32xf32>
    %11 = vector.shape_cast %10 : vector<1x8x8x32xf32> to vector<8x8x32xf32>
    %12 = vector.shape_cast %11 : vector<8x8x32xf32> to vector<64x32xf32>
    %13 = arith.truncf %12 : vector<64x32xf32> to vector<64x32xbf16>
    %c1_10 = arith.constant 1 : index
    %c0_11 = arith.constant 0 : index
    %c0_12 = arith.constant 0 : index
    %14 = vector.load %arg2[%c1_10, %c0_11, %c0_12] : memref<4x32x16xf32, #tpu.memory_space<vmem>>, vector<1x32x16xf32>
    %15 = vector.shape_cast %14 : vector<1x32x16xf32> to vector<32x16xf32>
    %16 = arith.truncf %15 : vector<32x16xf32> to vector<32x16xbf16>
    %cst_13 = arith.constant dense<0.000000e+00> : vector<64x16xf32>
    %17 = tpu.matmul %13, %16, %cst_13 {dimension_numbers = #tpu.dot_dimension_numbers<[1], [0], [0], [1], [0, 0, 1, 1], [], []>} : vector<64x32xbf16>, vector<32x16xbf16>, vector<64x16xf32> -> vector<64x16xf32>
    %18 = arith.addf %9, %17 : vector<64x16xf32>
    %c0_14 = arith.constant 0 : index
    %c1_15 = arith.constant 1 : index
    %c0_16 = arith.constant 0 : index
    %c0_17 = arith.constant 0 : index
    %19 = vector.load %arg1[%c0_14, %c1_15, %c0_16, %c0_17] : memref<1x9x9x32xf32, #tpu.memory_space<vmem>>, vector<1x8x8x32xf32>
    %20 = vector.shape_cast %19 : vector<1x8x8x32xf32> to vector<8x8x32xf32>
    %21 = vector.shape_cast %20 : vector<8x8x32xf32> to vector<64x32xf32>
    %22 = arith.truncf %21 : vector<64x32xf32> to vector<64x32xbf16>
    %c2 = arith.constant 2 : index
    %c0_18 = arith.constant 0 : index
    %c0_19 = arith.constant 0 : index
    %23 = vector.load %arg2[%c2, %c0_18, %c0_19] : memref<4x32x16xf32, #tpu.memory_space<vmem>>, vector<1x32x16xf32>
    %24 = vector.shape_cast %23 : vector<1x32x16xf32> to vector<32x16xf32>
    %25 = arith.truncf %24 : vector<32x16xf32> to vector<32x16xbf16>
    %cst_20 = arith.constant dense<0.000000e+00> : vector<64x16xf32>
    %26 = tpu.matmul %22, %25, %cst_20 {dimension_numbers = #tpu.dot_dimension_numbers<[1], [0], [0], [1], [0, 0, 1, 1], [], []>} : vector<64x32xbf16>, vector<32x16xbf16>, vector<64x16xf32> -> vector<64x16xf32>
    %27 = arith.addf %18, %26 : vector<64x16xf32>
    %c0_21 = arith.constant 0 : index
    %c1_22 = arith.constant 1 : index
    %c1_23 = arith.constant 1 : index
    %c0_24 = arith.constant 0 : index
    %28 = vector.load %arg1[%c0_21, %c1_22, %c1_23, %c0_24] : memref<1x9x9x32xf32, #tpu.memory_space<vmem>>, vector<1x8x8x32xf32>
    %29 = vector.shape_cast %28 : vector<1x8x8x32xf32> to vector<8x8x32xf32>
    %30 = vector.shape_cast %29 : vector<8x8x32xf32> to vector<64x32xf32>
    %31 = arith.truncf %30 : vector<64x32xf32> to vector<64x32xbf16>
    %c3 = arith.constant 3 : index
    %c0_25 = arith.constant 0 : index
    %c0_26 = arith.constant 0 : index
    %32 = vector.load %arg2[%c3, %c0_25, %c0_26] : memref<4x32x16xf32, #tpu.memory_space<vmem>>, vector<1x32x16xf32>
    %33 = vector.shape_cast %32 : vector<1x32x16xf32> to vector<32x16xf32>
    %34 = arith.truncf %33 : vector<32x16xf32> to vector<32x16xbf16>
    %cst_27 = arith.constant dense<0.000000e+00> : vector<64x16xf32>
    %35 = tpu.matmul %31, %34, %cst_27 {dimension_numbers = #tpu.dot_dimension_numbers<[1], [0], [0], [1], [0, 0, 1, 1], [], []>} : vector<64x32xbf16>, vector<32x16xbf16>, vector<64x16xf32> -> vector<64x16xf32>
    %36 = arith.addf %27, %35 : vector<64x16xf32>
    %c0_28 = arith.constant 0 : index
    %c0_29 = arith.constant 0 : index
    %37 = vector.load %arg3[%c0_28, %c0_29] : memref<1x16xf32, #tpu.memory_space<vmem>>, vector<1x16xf32>
    %38 = vector.broadcast %37 : vector<1x16xf32> to vector<64x16xf32>
    %39 = arith.addf %36, %38 : vector<64x16xf32>
    %cst_30 = arith.constant 0.000000e+00 : f32
    %40 = vector.broadcast %cst_30 : f32 to vector<64x16xf32>
    %41 = arith.cmpf oge, %39, %40 : vector<64x16xf32>
    %cst_31 = arith.constant 0.00999999977 : f32
    %42 = vector.broadcast %cst_31 : f32 to vector<64x16xf32>
    %43 = arith.mulf %42, %39 : vector<64x16xf32>
    %44 = arith.select %41, %39, %43 : vector<64x16xi1>, vector<64x16xf32>
    %45 = vector.shape_cast %44 : vector<64x16xf32> to vector<8x8x16xf32>
    %c0_32 = arith.constant 0 : index
    %c0_33 = arith.constant 0 : index
    %c0_34 = arith.constant 0 : index
    %c0_35 = arith.constant 0 : index
    %46 = vector.load %arg4[%c0_32, %c0_33, %c0_34, %c0_35] : memref<1x8x8x16xf32, #tpu.memory_space<vmem>>, vector<1x8x8x16xf32>
    %47 = vector.shape_cast %46 : vector<1x8x8x16xf32> to vector<8x8x16xf32>
    %48 = vector.shape_cast %45 : vector<8x8x16xf32> to vector<1x8x8x16xf32>
    tpu.vector_store %arg4[%c0_32, %c0_33, %c0_34, %c0_35], %48 {strides = array<i32>} : memref<1x8x8x16xf32, #tpu.memory_space<vmem>>, vector<1x8x8x16xf32>,
    return
  }
  func.func @transform_0(%arg0: i32) -> (i32, i32, i32, i32) {
    %c0_i32 = arith.constant 0 : i32
    %c0_i32_0 = arith.constant 0 : i32
    %c0_i32_1 = arith.constant 0 : i32
    %c0_i32_2 = arith.constant 0 : i32
    return %arg0, %c0_i32, %c0_i32_0, %c0_i32_1 : i32, i32, i32, i32
  }
  func.func @transform_1(%arg0: i32) -> (i32, i32, i32) {
    %c0_i32 = arith.constant 0 : i32
    %c0_i32_0 = arith.constant 0 : i32
    %c0_i32_1 = arith.constant 0 : i32
    %c0_i32_2 = arith.constant 0 : i32
    return %c0_i32, %c0_i32_0, %c0_i32_1 : i32, i32, i32
  }
  func.func @transform_2(%arg0: i32) -> (i32, i32) {
    %c0_i32 = arith.constant 0 : i32
    %c0_i32_0 = arith.constant 0 : i32
    %c0_i32_1 = arith.constant 0 : i32
    return %c0_i32, %c0_i32_0 : i32, i32
  }
  func.func @transform_3(%arg0: i32) -> (i32, i32, i32, i32) {
    %c0_i32 = arith.constant 0 : i32
    %c0_i32_0 = arith.constant 0 : i32
    %c0_i32_1 = arith.constant 0 : i32
    %c0_i32_2 = arith.constant 0 : i32
    return %arg0, %c0_i32, %c0_i32_0, %c0_i32_1 : i32, i32, i32, i32
  }
}

module attributes {stable_mosaic.version = 11 : i64} {
  func.func @kernel(%arg0: i32, %arg1: memref<1x5x5x64xf32, #tpu.memory_space<vmem>>, %arg2: memref<4x64x32xf32, #tpu.memory_space<vmem>>, %arg3: memref<1x32xf32, #tpu.memory_space<vmem>>, %arg4: memref<1x4x4x32xf32, #tpu.memory_space<vmem>>) attributes {dimension_semantics = [#tpu.dimension_semantics<parallel>], iteration_bounds = array<i64: 2>, scalar_prefetch = 0 : i64, scratch_operands = 0 : i64, tpu.core_type = #tpu.core_type<tc>, window_params = [{transform_indices = @transform_0, window_bounds = array<i64: 1, 5, 5, 64>}, {pipeline_mode = #tpu.pipeline_mode<synchronous>, transform_indices = @transform_1, window_bounds = array<i64: 4, 64, 32>}, {pipeline_mode = #tpu.pipeline_mode<synchronous>, transform_indices = @transform_2, window_bounds = array<i64: 1, 32>}, {transform_indices = @transform_3, window_bounds = array<i64: 1, 4, 4, 32>}]} {
    %cst = arith.constant 0.000000e+00 : f32
    %0 = vector.broadcast %cst : f32 to vector<16x32xf32>
    %c0 = arith.constant 0 : index
    %c0_0 = arith.constant 0 : index
    %c0_1 = arith.constant 0 : index
    %c0_2 = arith.constant 0 : index
    %1 = vector.load %arg1[%c0, %c0_0, %c0_1, %c0_2] : memref<1x5x5x64xf32, #tpu.memory_space<vmem>>, vector<1x4x4x64xf32>
    %2 = vector.shape_cast %1 : vector<1x4x4x64xf32> to vector<4x4x64xf32>
    %3 = vector.shape_cast %2 : vector<4x4x64xf32> to vector<16x64xf32>
    %4 = arith.truncf %3 : vector<16x64xf32> to vector<16x64xbf16>
    %c0_3 = arith.constant 0 : index
    %c0_4 = arith.constant 0 : index
    %c0_5 = arith.constant 0 : index
    %5 = vector.load %arg2[%c0_3, %c0_4, %c0_5] : memref<4x64x32xf32, #tpu.memory_space<vmem>>, vector<1x64x32xf32>
    %6 = vector.shape_cast %5 : vector<1x64x32xf32> to vector<64x32xf32>
    %7 = arith.truncf %6 : vector<64x32xf32> to vector<64x32xbf16>
    %cst_6 = arith.constant dense<0.000000e+00> : vector<16x32xf32>
    %8 = tpu.matmul %4, %7, %cst_6 {dimension_numbers = #tpu.dot_dimension_numbers<[1], [0], [0], [1], [0, 0, 1, 1], [], []>} : vector<16x64xbf16>, vector<64x32xbf16>, vector<16x32xf32> -> vector<16x32xf32>
    %9 = arith.addf %0, %8 : vector<16x32xf32>
    %c0_7 = arith.constant 0 : index
    %c0_8 = arith.constant 0 : index
    %c1 = arith.constant 1 : index
    %c0_9 = arith.constant 0 : index
    %10 = vector.load %arg1[%c0_7, %c0_8, %c1, %c0_9] : memref<1x5x5x64xf32, #tpu.memory_space<vmem>>, vector<1x4x4x64xf32>
    %11 = vector.shape_cast %10 : vector<1x4x4x64xf32> to vector<4x4x64xf32>
    %12 = vector.shape_cast %11 : vector<4x4x64xf32> to vector<16x64xf32>
    %13 = arith.truncf %12 : vector<16x64xf32> to vector<16x64xbf16>
    %c1_10 = arith.constant 1 : index
    %c0_11 = arith.constant 0 : index
    %c0_12 = arith.constant 0 : index
    %14 = vector.load %arg2[%c1_10, %c0_11, %c0_12] : memref<4x64x32xf32, #tpu.memory_space<vmem>>, vector<1x64x32xf32>
    %15 = vector.shape_cast %14 : vector<1x64x32xf32> to vector<64x32xf32>
    %16 = arith.truncf %15 : vector<64x32xf32> to vector<64x32xbf16>
    %cst_13 = arith.constant dense<0.000000e+00> : vector<16x32xf32>
    %17 = tpu.matmul %13, %16, %cst_13 {dimension_numbers = #tpu.dot_dimension_numbers<[1], [0], [0], [1], [0, 0, 1, 1], [], []>} : vector<16x64xbf16>, vector<64x32xbf16>, vector<16x32xf32> -> vector<16x32xf32>
    %18 = arith.addf %9, %17 : vector<16x32xf32>
    %c0_14 = arith.constant 0 : index
    %c1_15 = arith.constant 1 : index
    %c0_16 = arith.constant 0 : index
    %c0_17 = arith.constant 0 : index
    %19 = vector.load %arg1[%c0_14, %c1_15, %c0_16, %c0_17] : memref<1x5x5x64xf32, #tpu.memory_space<vmem>>, vector<1x4x4x64xf32>
    %20 = vector.shape_cast %19 : vector<1x4x4x64xf32> to vector<4x4x64xf32>
    %21 = vector.shape_cast %20 : vector<4x4x64xf32> to vector<16x64xf32>
    %22 = arith.truncf %21 : vector<16x64xf32> to vector<16x64xbf16>
    %c2 = arith.constant 2 : index
    %c0_18 = arith.constant 0 : index
    %c0_19 = arith.constant 0 : index
    %23 = vector.load %arg2[%c2, %c0_18, %c0_19] : memref<4x64x32xf32, #tpu.memory_space<vmem>>, vector<1x64x32xf32>
    %24 = vector.shape_cast %23 : vector<1x64x32xf32> to vector<64x32xf32>
    %25 = arith.truncf %24 : vector<64x32xf32> to vector<64x32xbf16>
    %cst_20 = arith.constant dense<0.000000e+00> : vector<16x32xf32>
    %26 = tpu.matmul %22, %25, %cst_20 {dimension_numbers = #tpu.dot_dimension_numbers<[1], [0], [0], [1], [0, 0, 1, 1], [], []>} : vector<16x64xbf16>, vector<64x32xbf16>, vector<16x32xf32> -> vector<16x32xf32>
    %27 = arith.addf %18, %26 : vector<16x32xf32>
    %c0_21 = arith.constant 0 : index
    %c1_22 = arith.constant 1 : index
    %c1_23 = arith.constant 1 : index
    %c0_24 = arith.constant 0 : index
    %28 = vector.load %arg1[%c0_21, %c1_22, %c1_23, %c0_24] : memref<1x5x5x64xf32, #tpu.memory_space<vmem>>, vector<1x4x4x64xf32>
    %29 = vector.shape_cast %28 : vector<1x4x4x64xf32> to vector<4x4x64xf32>
    %30 = vector.shape_cast %29 : vector<4x4x64xf32> to vector<16x64xf32>
    %31 = arith.truncf %30 : vector<16x64xf32> to vector<16x64xbf16>
    %c3 = arith.constant 3 : index
    %c0_25 = arith.constant 0 : index
    %c0_26 = arith.constant 0 : index
    %32 = vector.load %arg2[%c3, %c0_25, %c0_26] : memref<4x64x32xf32, #tpu.memory_space<vmem>>, vector<1x64x32xf32>
    %33 = vector.shape_cast %32 : vector<1x64x32xf32> to vector<64x32xf32>
    %34 = arith.truncf %33 : vector<64x32xf32> to vector<64x32xbf16>
    %cst_27 = arith.constant dense<0.000000e+00> : vector<16x32xf32>
    %35 = tpu.matmul %31, %34, %cst_27 {dimension_numbers = #tpu.dot_dimension_numbers<[1], [0], [0], [1], [0, 0, 1, 1], [], []>} : vector<16x64xbf16>, vector<64x32xbf16>, vector<16x32xf32> -> vector<16x32xf32>
    %36 = arith.addf %27, %35 : vector<16x32xf32>
    %c0_28 = arith.constant 0 : index
    %c0_29 = arith.constant 0 : index
    %37 = vector.load %arg3[%c0_28, %c0_29] : memref<1x32xf32, #tpu.memory_space<vmem>>, vector<1x32xf32>
    %38 = vector.broadcast %37 : vector<1x32xf32> to vector<16x32xf32>
    %39 = arith.addf %36, %38 : vector<16x32xf32>
    %cst_30 = arith.constant 0.000000e+00 : f32
    %40 = vector.broadcast %cst_30 : f32 to vector<16x32xf32>
    %41 = arith.cmpf oge, %39, %40 : vector<16x32xf32>
    %cst_31 = arith.constant 0.00999999977 : f32
    %42 = vector.broadcast %cst_31 : f32 to vector<16x32xf32>
    %43 = arith.mulf %42, %39 : vector<16x32xf32>
    %44 = arith.select %41, %39, %43 : vector<16x32xi1>, vector<16x32xf32>
    %45 = vector.shape_cast %44 : vector<16x32xf32> to vector<4x4x32xf32>
    %c0_32 = arith.constant 0 : index
    %c0_33 = arith.constant 0 : index
    %c0_34 = arith.constant 0 : index
    %c0_35 = arith.constant 0 : index
    %46 = vector.load %arg4[%c0_32, %c0_33, %c0_34, %c0_35] : memref<1x4x4x32xf32, #tpu.memory_space<vmem>>, vector<1x4x4x32xf32>
    %47 = vector.shape_cast %46 : vector<1x4x4x32xf32> to vector<4x4x32xf32>
    %48 = vector.shape_cast %45 : vector<4x4x32xf32> to vector<1x4x4x32xf32>
    tpu.vector_store %arg4[%c0_32, %c0_33, %c0_34, %c0_35], %48 {strides = array<i32>} : memref<1x4x4x32xf32, #tpu.memory_space<vmem>>, vector<1x4x4x32xf32>,
    return
  }
  func.func @transform_0(%arg0: i32) -> (i32, i32, i32, i32) {
    %c0_i32 = arith.constant 0 : i32
    %c0_i32_0 = arith.constant 0 : i32
    %c0_i32_1 = arith.constant 0 : i32
    %c0_i32_2 = arith.constant 0 : i32
    return %arg0, %c0_i32, %c0_i32_0, %c0_i32_1 : i32, i32, i32, i32
  }
  func.func @transform_1(%arg0: i32) -> (i32, i32, i32) {
    %c0_i32 = arith.constant 0 : i32
    %c0_i32_0 = arith.constant 0 : i32
    %c0_i32_1 = arith.constant 0 : i32
    %c0_i32_2 = arith.constant 0 : i32
    return %c0_i32, %c0_i32_0, %c0_i32_1 : i32, i32, i32
  }
  func.func @transform_2(%arg0: i32) -> (i32, i32) {
    %c0_i32 = arith.constant 0 : i32
    %c0_i32_0 = arith.constant 0 : i32
    %c0_i32_1 = arith.constant 0 : i32
    return %c0_i32, %c0_i32_0 : i32, i32
  }
  func.func @transform_3(%arg0: i32) -> (i32, i32, i32, i32) {
    %c0_i32 = arith.constant 0 : i32
    %c0_i32_0 = arith.constant 0 : i32
    %c0_i32_1 = arith.constant 0 : i32
    %c0_i32_2 = arith.constant 0 : i32
    return %arg0, %c0_i32, %c0_i32_0, %c0_i32_1 : i32, i32, i32, i32
  }
}

module attributes {stable_mosaic.version = 11 : i64} {
  func.func @kernel(%arg0: i32, %arg1: memref<1x6x6x32xf32, #tpu.memory_space<vmem>>, %arg2: memref<16x32x64xf32, #tpu.memory_space<vmem>>, %arg3: memref<1x64xf32, #tpu.memory_space<vmem>>, %arg4: memref<1x3x3x64xf32, #tpu.memory_space<vmem>>) attributes {dimension_semantics = [#tpu.dimension_semantics<parallel>], iteration_bounds = array<i64: 2>, scalar_prefetch = 0 : i64, scratch_operands = 0 : i64, tpu.core_type = #tpu.core_type<tc>, window_params = [{transform_indices = @transform_0, window_bounds = array<i64: 1, 6, 6, 32>}, {pipeline_mode = #tpu.pipeline_mode<synchronous>, transform_indices = @transform_1, window_bounds = array<i64: 16, 32, 64>}, {pipeline_mode = #tpu.pipeline_mode<synchronous>, transform_indices = @transform_2, window_bounds = array<i64: 1, 64>}, {transform_indices = @transform_3, window_bounds = array<i64: 1, 3, 3, 64>}]} {
    %cst = arith.constant 0.000000e+00 : f32
    %0 = vector.broadcast %cst : f32 to vector<9x64xf32>
    %c0 = arith.constant 0 : index
    %c0_0 = arith.constant 0 : index
    %c0_1 = arith.constant 0 : index
    %c0_2 = arith.constant 0 : index
    %1 = vector.load %arg1[%c0, %c0_0, %c0_1, %c0_2] : memref<1x6x6x32xf32, #tpu.memory_space<vmem>>, vector<1x3x3x32xf32>
    %2 = vector.shape_cast %1 : vector<1x3x3x32xf32> to vector<3x3x32xf32>
    %3 = vector.shape_cast %2 : vector<3x3x32xf32> to vector<9x32xf32>
    %4 = arith.truncf %3 : vector<9x32xf32> to vector<9x32xbf16>
    %c0_3 = arith.constant 0 : index
    %c0_4 = arith.constant 0 : index
    %c0_5 = arith.constant 0 : index
    %5 = vector.load %arg2[%c0_3, %c0_4, %c0_5] : memref<16x32x64xf32, #tpu.memory_space<vmem>>, vector<1x32x64xf32>
    %6 = vector.shape_cast %5 : vector<1x32x64xf32> to vector<32x64xf32>
    %7 = arith.truncf %6 : vector<32x64xf32> to vector<32x64xbf16>
    %cst_6 = arith.constant dense<0.000000e+00> : vector<9x64xf32>
    %8 = tpu.matmul %4, %7, %cst_6 {dimension_numbers = #tpu.dot_dimension_numbers<[1], [0], [0], [1], [0, 0, 1, 1], [], []>} : vector<9x32xbf16>, vector<32x64xbf16>, vector<9x64xf32> -> vector<9x64xf32>
    %9 = arith.addf %0, %8 : vector<9x64xf32>
    %c0_7 = arith.constant 0 : index
    %c0_8 = arith.constant 0 : index
    %c1 = arith.constant 1 : index
    %c0_9 = arith.constant 0 : index
    %10 = vector.load %arg1[%c0_7, %c0_8, %c1, %c0_9] : memref<1x6x6x32xf32, #tpu.memory_space<vmem>>, vector<1x3x3x32xf32>
    %11 = vector.shape_cast %10 : vector<1x3x3x32xf32> to vector<3x3x32xf32>
    %12 = vector.shape_cast %11 : vector<3x3x32xf32> to vector<9x32xf32>
    %13 = arith.truncf %12 : vector<9x32xf32> to vector<9x32xbf16>
    %c1_10 = arith.constant 1 : index
    %c0_11 = arith.constant 0 : index
    %c0_12 = arith.constant 0 : index
    %14 = vector.load %arg2[%c1_10, %c0_11, %c0_12] : memref<16x32x64xf32, #tpu.memory_space<vmem>>, vector<1x32x64xf32>
    %15 = vector.shape_cast %14 : vector<1x32x64xf32> to vector<32x64xf32>
    %16 = arith.truncf %15 : vector<32x64xf32> to vector<32x64xbf16>
    %cst_13 = arith.constant dense<0.000000e+00> : vector<9x64xf32>
    %17 = tpu.matmul %13, %16, %cst_13 {dimension_numbers = #tpu.dot_dimension_numbers<[1], [0], [0], [1], [0, 0, 1, 1], [], []>} : vector<9x32xbf16>, vector<32x64xbf16>, vector<9x64xf32> -> vector<9x64xf32>
    %18 = arith.addf %9, %17 : vector<9x64xf32>
    %c0_14 = arith.constant 0 : index
    %c0_15 = arith.constant 0 : index
    %c2 = arith.constant 2 : index
    %c0_16 = arith.constant 0 : index
    %19 = vector.load %arg1[%c0_14, %c0_15, %c2, %c0_16] : memref<1x6x6x32xf32, #tpu.memory_space<vmem>>, vector<1x3x3x32xf32>
    %20 = vector.shape_cast %19 : vector<1x3x3x32xf32> to vector<3x3x32xf32>
    %21 = vector.shape_cast %20 : vector<3x3x32xf32> to vector<9x32xf32>
    %22 = arith.truncf %21 : vector<9x32xf32> to vector<9x32xbf16>
    %c2_17 = arith.constant 2 : index
    %c0_18 = arith.constant 0 : index
    %c0_19 = arith.constant 0 : index
    %23 = vector.load %arg2[%c2_17, %c0_18, %c0_19] : memref<16x32x64xf32, #tpu.memory_space<vmem>>, vector<1x32x64xf32>
    %24 = vector.shape_cast %23 : vector<1x32x64xf32> to vector<32x64xf32>
    %25 = arith.truncf %24 : vector<32x64xf32> to vector<32x64xbf16>
    %cst_20 = arith.constant dense<0.000000e+00> : vector<9x64xf32>
    %26 = tpu.matmul %22, %25, %cst_20 {dimension_numbers = #tpu.dot_dimension_numbers<[1], [0], [0], [1], [0, 0, 1, 1], [], []>} : vector<9x32xbf16>, vector<32x64xbf16>, vector<9x64xf32> -> vector<9x64xf32>
    %27 = arith.addf %18, %26 : vector<9x64xf32>
    %c0_21 = arith.constant 0 : index
    %c0_22 = arith.constant 0 : index
    %c3 = arith.constant 3 : index
    %c0_23 = arith.constant 0 : index
    %28 = vector.load %arg1[%c0_21, %c0_22, %c3, %c0_23] : memref<1x6x6x32xf32, #tpu.memory_space<vmem>>, vector<1x3x3x32xf32>
    %29 = vector.shape_cast %28 : vector<1x3x3x32xf32> to vector<3x3x32xf32>
    %30 = vector.shape_cast %29 : vector<3x3x32xf32> to vector<9x32xf32>
    %31 = arith.truncf %30 : vector<9x32xf32> to vector<9x32xbf16>
    %c3_24 = arith.constant 3 : index
    %c0_25 = arith.constant 0 : index
    %c0_26 = arith.constant 0 : index
    %32 = vector.load %arg2[%c3_24, %c0_25, %c0_26] : memref<16x32x64xf32, #tpu.memory_space<vmem>>, vector<1x32x64xf32>
    %33 = vector.shape_cast %32 : vector<1x32x64xf32> to vector<32x64xf32>
    %34 = arith.truncf %33 : vector<32x64xf32> to vector<32x64xbf16>
    %cst_27 = arith.constant dense<0.000000e+00> : vector<9x64xf32>
    %35 = tpu.matmul %31, %34, %cst_27 {dimension_numbers = #tpu.dot_dimension_numbers<[1], [0], [0], [1], [0, 0, 1, 1], [], []>} : vector<9x32xbf16>, vector<32x64xbf16>, vector<9x64xf32> -> vector<9x64xf32>
    %36 = arith.addf %27, %35 : vector<9x64xf32>
    %c0_28 = arith.constant 0 : index
    %c1_29 = arith.constant 1 : index
    %c0_30 = arith.constant 0 : index
    %c0_31 = arith.constant 0 : index
    %37 = vector.load %arg1[%c0_28, %c1_29, %c0_30, %c0_31] : memref<1x6x6x32xf32, #tpu.memory_space<vmem>>, vector<1x3x3x32xf32>
    %38 = vector.shape_cast %37 : vector<1x3x3x32xf32> to vector<3x3x32xf32>
    %39 = vector.shape_cast %38 : vector<3x3x32xf32> to vector<9x32xf32>
    %40 = arith.truncf %39 : vector<9x32xf32> to vector<9x32xbf16>
    %c4 = arith.constant 4 : index
    %c0_32 = arith.constant 0 : index
    %c0_33 = arith.constant 0 : index
    %41 = vector.load %arg2[%c4, %c0_32, %c0_33] : memref<16x32x64xf32, #tpu.memory_space<vmem>>, vector<1x32x64xf32>
    %42 = vector.shape_cast %41 : vector<1x32x64xf32> to vector<32x64xf32>
    %43 = arith.truncf %42 : vector<32x64xf32> to vector<32x64xbf16>
    %cst_34 = arith.constant dense<0.000000e+00> : vector<9x64xf32>
    %44 = tpu.matmul %40, %43, %cst_34 {dimension_numbers = #tpu.dot_dimension_numbers<[1], [0], [0], [1], [0, 0, 1, 1], [], []>} : vector<9x32xbf16>, vector<32x64xbf16>, vector<9x64xf32> -> vector<9x64xf32>
    %45 = arith.addf %36, %44 : vector<9x64xf32>
    %c0_35 = arith.constant 0 : index
    %c1_36 = arith.constant 1 : index
    %c1_37 = arith.constant 1 : index
    %c0_38 = arith.constant 0 : index
    %46 = vector.load %arg1[%c0_35, %c1_36, %c1_37, %c0_38] : memref<1x6x6x32xf32, #tpu.memory_space<vmem>>, vector<1x3x3x32xf32>
    %47 = vector.shape_cast %46 : vector<1x3x3x32xf32> to vector<3x3x32xf32>
    %48 = vector.shape_cast %47 : vector<3x3x32xf32> to vector<9x32xf32>
    %49 = arith.truncf %48 : vector<9x32xf32> to vector<9x32xbf16>
    %c5 = arith.constant 5 : index
    %c0_39 = arith.constant 0 : index
    %c0_40 = arith.constant 0 : index
    %50 = vector.load %arg2[%c5, %c0_39, %c0_40] : memref<16x32x64xf32, #tpu.memory_space<vmem>>, vector<1x32x64xf32>
    %51 = vector.shape_cast %50 : vector<1x32x64xf32> to vector<32x64xf32>
    %52 = arith.truncf %51 : vector<32x64xf32> to vector<32x64xbf16>
    %cst_41 = arith.constant dense<0.000000e+00> : vector<9x64xf32>
    %53 = tpu.matmul %49, %52, %cst_41 {dimension_numbers = #tpu.dot_dimension_numbers<[1], [0], [0], [1], [0, 0, 1, 1], [], []>} : vector<9x32xbf16>, vector<32x64xbf16>, vector<9x64xf32> -> vector<9x64xf32>
    %54 = arith.addf %45, %53 : vector<9x64xf32>
    %c0_42 = arith.constant 0 : index
    %c1_43 = arith.constant 1 : index
    %c2_44 = arith.constant 2 : index
    %c0_45 = arith.constant 0 : index
    %55 = vector.load %arg1[%c0_42, %c1_43, %c2_44, %c0_45] : memref<1x6x6x32xf32, #tpu.memory_space<vmem>>, vector<1x3x3x32xf32>
    %56 = vector.shape_cast %55 : vector<1x3x3x32xf32> to vector<3x3x32xf32>
    %57 = vector.shape_cast %56 : vector<3x3x32xf32> to vector<9x32xf32>
    %58 = arith.truncf %57 : vector<9x32xf32> to vector<9x32xbf16>
    %c6 = arith.constant 6 : index
    %c0_46 = arith.constant 0 : index
    %c0_47 = arith.constant 0 : index
    %59 = vector.load %arg2[%c6, %c0_46, %c0_47] : memref<16x32x64xf32, #tpu.memory_space<vmem>>, vector<1x32x64xf32>
    %60 = vector.shape_cast %59 : vector<1x32x64xf32> to vector<32x64xf32>
    %61 = arith.truncf %60 : vector<32x64xf32> to vector<32x64xbf16>
    %cst_48 = arith.constant dense<0.000000e+00> : vector<9x64xf32>
    %62 = tpu.matmul %58, %61, %cst_48 {dimension_numbers = #tpu.dot_dimension_numbers<[1], [0], [0], [1], [0, 0, 1, 1], [], []>} : vector<9x32xbf16>, vector<32x64xbf16>, vector<9x64xf32> -> vector<9x64xf32>
    %63 = arith.addf %54, %62 : vector<9x64xf32>
    %c0_49 = arith.constant 0 : index
    %c1_50 = arith.constant 1 : index
    %c3_51 = arith.constant 3 : index
    %c0_52 = arith.constant 0 : index
    %64 = vector.load %arg1[%c0_49, %c1_50, %c3_51, %c0_52] : memref<1x6x6x32xf32, #tpu.memory_space<vmem>>, vector<1x3x3x32xf32>
    %65 = vector.shape_cast %64 : vector<1x3x3x32xf32> to vector<3x3x32xf32>
    %66 = vector.shape_cast %65 : vector<3x3x32xf32> to vector<9x32xf32>
    %67 = arith.truncf %66 : vector<9x32xf32> to vector<9x32xbf16>
    %c7 = arith.constant 7 : index
    %c0_53 = arith.constant 0 : index
    %c0_54 = arith.constant 0 : index
    %68 = vector.load %arg2[%c7, %c0_53, %c0_54] : memref<16x32x64xf32, #tpu.memory_space<vmem>>, vector<1x32x64xf32>
    %69 = vector.shape_cast %68 : vector<1x32x64xf32> to vector<32x64xf32>
    %70 = arith.truncf %69 : vector<32x64xf32> to vector<32x64xbf16>
    %cst_55 = arith.constant dense<0.000000e+00> : vector<9x64xf32>
    %71 = tpu.matmul %67, %70, %cst_55 {dimension_numbers = #tpu.dot_dimension_numbers<[1], [0], [0], [1], [0, 0, 1, 1], [], []>} : vector<9x32xbf16>, vector<32x64xbf16>, vector<9x64xf32> -> vector<9x64xf32>
    %72 = arith.addf %63, %71 : vector<9x64xf32>
    %c0_56 = arith.constant 0 : index
    %c2_57 = arith.constant 2 : index
    %c0_58 = arith.constant 0 : index
    %c0_59 = arith.constant 0 : index
    %73 = vector.load %arg1[%c0_56, %c2_57, %c0_58, %c0_59] : memref<1x6x6x32xf32, #tpu.memory_space<vmem>>, vector<1x3x3x32xf32>
    %74 = vector.shape_cast %73 : vector<1x3x3x32xf32> to vector<3x3x32xf32>
    %75 = vector.shape_cast %74 : vector<3x3x32xf32> to vector<9x32xf32>
    %76 = arith.truncf %75 : vector<9x32xf32> to vector<9x32xbf16>
    %c8 = arith.constant 8 : index
    %c0_60 = arith.constant 0 : index
    %c0_61 = arith.constant 0 : index
    %77 = vector.load %arg2[%c8, %c0_60, %c0_61] : memref<16x32x64xf32, #tpu.memory_space<vmem>>, vector<1x32x64xf32>
    %78 = vector.shape_cast %77 : vector<1x32x64xf32> to vector<32x64xf32>
    %79 = arith.truncf %78 : vector<32x64xf32> to vector<32x64xbf16>
    %cst_62 = arith.constant dense<0.000000e+00> : vector<9x64xf32>
    %80 = tpu.matmul %76, %79, %cst_62 {dimension_numbers = #tpu.dot_dimension_numbers<[1], [0], [0], [1], [0, 0, 1, 1], [], []>} : vector<9x32xbf16>, vector<32x64xbf16>, vector<9x64xf32> -> vector<9x64xf32>
    %81 = arith.addf %72, %80 : vector<9x64xf32>
    %c0_63 = arith.constant 0 : index
    %c2_64 = arith.constant 2 : index
    %c1_65 = arith.constant 1 : index
    %c0_66 = arith.constant 0 : index
    %82 = vector.load %arg1[%c0_63, %c2_64, %c1_65, %c0_66] : memref<1x6x6x32xf32, #tpu.memory_space<vmem>>, vector<1x3x3x32xf32>
    %83 = vector.shape_cast %82 : vector<1x3x3x32xf32> to vector<3x3x32xf32>
    %84 = vector.shape_cast %83 : vector<3x3x32xf32> to vector<9x32xf32>
    %85 = arith.truncf %84 : vector<9x32xf32> to vector<9x32xbf16>
    %c9 = arith.constant 9 : index
    %c0_67 = arith.constant 0 : index
    %c0_68 = arith.constant 0 : index
    %86 = vector.load %arg2[%c9, %c0_67, %c0_68] : memref<16x32x64xf32, #tpu.memory_space<vmem>>, vector<1x32x64xf32>
    %87 = vector.shape_cast %86 : vector<1x32x64xf32> to vector<32x64xf32>
    %88 = arith.truncf %87 : vector<32x64xf32> to vector<32x64xbf16>
    %cst_69 = arith.constant dense<0.000000e+00> : vector<9x64xf32>
    %89 = tpu.matmul %85, %88, %cst_69 {dimension_numbers = #tpu.dot_dimension_numbers<[1], [0], [0], [1], [0, 0, 1, 1], [], []>} : vector<9x32xbf16>, vector<32x64xbf16>, vector<9x64xf32> -> vector<9x64xf32>
    %90 = arith.addf %81, %89 : vector<9x64xf32>
    %c0_70 = arith.constant 0 : index
    %c2_71 = arith.constant 2 : index
    %c2_72 = arith.constant 2 : index
    %c0_73 = arith.constant 0 : index
    %91 = vector.load %arg1[%c0_70, %c2_71, %c2_72, %c0_73] : memref<1x6x6x32xf32, #tpu.memory_space<vmem>>, vector<1x3x3x32xf32>
    %92 = vector.shape_cast %91 : vector<1x3x3x32xf32> to vector<3x3x32xf32>
    %93 = vector.shape_cast %92 : vector<3x3x32xf32> to vector<9x32xf32>
    %94 = arith.truncf %93 : vector<9x32xf32> to vector<9x32xbf16>
    %c10 = arith.constant 10 : index
    %c0_74 = arith.constant 0 : index
    %c0_75 = arith.constant 0 : index
    %95 = vector.load %arg2[%c10, %c0_74, %c0_75] : memref<16x32x64xf32, #tpu.memory_space<vmem>>, vector<1x32x64xf32>
    %96 = vector.shape_cast %95 : vector<1x32x64xf32> to vector<32x64xf32>
    %97 = arith.truncf %96 : vector<32x64xf32> to vector<32x64xbf16>
    %cst_76 = arith.constant dense<0.000000e+00> : vector<9x64xf32>
    %98 = tpu.matmul %94, %97, %cst_76 {dimension_numbers = #tpu.dot_dimension_numbers<[1], [0], [0], [1], [0, 0, 1, 1], [], []>} : vector<9x32xbf16>, vector<32x64xbf16>, vector<9x64xf32> -> vector<9x64xf32>
    %99 = arith.addf %90, %98 : vector<9x64xf32>
    %c0_77 = arith.constant 0 : index
    %c2_78 = arith.constant 2 : index
    %c3_79 = arith.constant 3 : index
    %c0_80 = arith.constant 0 : index
    %100 = vector.load %arg1[%c0_77, %c2_78, %c3_79, %c0_80] : memref<1x6x6x32xf32, #tpu.memory_space<vmem>>, vector<1x3x3x32xf32>
    %101 = vector.shape_cast %100 : vector<1x3x3x32xf32> to vector<3x3x32xf32>
    %102 = vector.shape_cast %101 : vector<3x3x32xf32> to vector<9x32xf32>
    %103 = arith.truncf %102 : vector<9x32xf32> to vector<9x32xbf16>
    %c11 = arith.constant 11 : index
    %c0_81 = arith.constant 0 : index
    %c0_82 = arith.constant 0 : index
    %104 = vector.load %arg2[%c11, %c0_81, %c0_82] : memref<16x32x64xf32, #tpu.memory_space<vmem>>, vector<1x32x64xf32>
    %105 = vector.shape_cast %104 : vector<1x32x64xf32> to vector<32x64xf32>
    %106 = arith.truncf %105 : vector<32x64xf32> to vector<32x64xbf16>
    %cst_83 = arith.constant dense<0.000000e+00> : vector<9x64xf32>
    %107 = tpu.matmul %103, %106, %cst_83 {dimension_numbers = #tpu.dot_dimension_numbers<[1], [0], [0], [1], [0, 0, 1, 1], [], []>} : vector<9x32xbf16>, vector<32x64xbf16>, vector<9x64xf32> -> vector<9x64xf32>
    %108 = arith.addf %99, %107 : vector<9x64xf32>
    %c0_84 = arith.constant 0 : index
    %c3_85 = arith.constant 3 : index
    %c0_86 = arith.constant 0 : index
    %c0_87 = arith.constant 0 : index
    %109 = vector.load %arg1[%c0_84, %c3_85, %c0_86, %c0_87] : memref<1x6x6x32xf32, #tpu.memory_space<vmem>>, vector<1x3x3x32xf32>
    %110 = vector.shape_cast %109 : vector<1x3x3x32xf32> to vector<3x3x32xf32>
    %111 = vector.shape_cast %110 : vector<3x3x32xf32> to vector<9x32xf32>
    %112 = arith.truncf %111 : vector<9x32xf32> to vector<9x32xbf16>
    %c12 = arith.constant 12 : index
    %c0_88 = arith.constant 0 : index
    %c0_89 = arith.constant 0 : index
    %113 = vector.load %arg2[%c12, %c0_88, %c0_89] : memref<16x32x64xf32, #tpu.memory_space<vmem>>, vector<1x32x64xf32>
    %114 = vector.shape_cast %113 : vector<1x32x64xf32> to vector<32x64xf32>
    %115 = arith.truncf %114 : vector<32x64xf32> to vector<32x64xbf16>
    %cst_90 = arith.constant dense<0.000000e+00> : vector<9x64xf32>
    %116 = tpu.matmul %112, %115, %cst_90 {dimension_numbers = #tpu.dot_dimension_numbers<[1], [0], [0], [1], [0, 0, 1, 1], [], []>} : vector<9x32xbf16>, vector<32x64xbf16>, vector<9x64xf32> -> vector<9x64xf32>
    %117 = arith.addf %108, %116 : vector<9x64xf32>
    %c0_91 = arith.constant 0 : index
    %c3_92 = arith.constant 3 : index
    %c1_93 = arith.constant 1 : index
    %c0_94 = arith.constant 0 : index
    %118 = vector.load %arg1[%c0_91, %c3_92, %c1_93, %c0_94] : memref<1x6x6x32xf32, #tpu.memory_space<vmem>>, vector<1x3x3x32xf32>
    %119 = vector.shape_cast %118 : vector<1x3x3x32xf32> to vector<3x3x32xf32>
    %120 = vector.shape_cast %119 : vector<3x3x32xf32> to vector<9x32xf32>
    %121 = arith.truncf %120 : vector<9x32xf32> to vector<9x32xbf16>
    %c13 = arith.constant 13 : index
    %c0_95 = arith.constant 0 : index
    %c0_96 = arith.constant 0 : index
    %122 = vector.load %arg2[%c13, %c0_95, %c0_96] : memref<16x32x64xf32, #tpu.memory_space<vmem>>, vector<1x32x64xf32>
    %123 = vector.shape_cast %122 : vector<1x32x64xf32> to vector<32x64xf32>
    %124 = arith.truncf %123 : vector<32x64xf32> to vector<32x64xbf16>
    %cst_97 = arith.constant dense<0.000000e+00> : vector<9x64xf32>
    %125 = tpu.matmul %121, %124, %cst_97 {dimension_numbers = #tpu.dot_dimension_numbers<[1], [0], [0], [1], [0, 0, 1, 1], [], []>} : vector<9x32xbf16>, vector<32x64xbf16>, vector<9x64xf32> -> vector<9x64xf32>
    %126 = arith.addf %117, %125 : vector<9x64xf32>
    %c0_98 = arith.constant 0 : index
    %c3_99 = arith.constant 3 : index
    %c2_100 = arith.constant 2 : index
    %c0_101 = arith.constant 0 : index
    %127 = vector.load %arg1[%c0_98, %c3_99, %c2_100, %c0_101] : memref<1x6x6x32xf32, #tpu.memory_space<vmem>>, vector<1x3x3x32xf32>
    %128 = vector.shape_cast %127 : vector<1x3x3x32xf32> to vector<3x3x32xf32>
    %129 = vector.shape_cast %128 : vector<3x3x32xf32> to vector<9x32xf32>
    %130 = arith.truncf %129 : vector<9x32xf32> to vector<9x32xbf16>
    %c14 = arith.constant 14 : index
    %c0_102 = arith.constant 0 : index
    %c0_103 = arith.constant 0 : index
    %131 = vector.load %arg2[%c14, %c0_102, %c0_103] : memref<16x32x64xf32, #tpu.memory_space<vmem>>, vector<1x32x64xf32>
    %132 = vector.shape_cast %131 : vector<1x32x64xf32> to vector<32x64xf32>
    %133 = arith.truncf %132 : vector<32x64xf32> to vector<32x64xbf16>
    %cst_104 = arith.constant dense<0.000000e+00> : vector<9x64xf32>
    %134 = tpu.matmul %130, %133, %cst_104 {dimension_numbers = #tpu.dot_dimension_numbers<[1], [0], [0], [1], [0, 0, 1, 1], [], []>} : vector<9x32xbf16>, vector<32x64xbf16>, vector<9x64xf32> -> vector<9x64xf32>
    %135 = arith.addf %126, %134 : vector<9x64xf32>
    %c0_105 = arith.constant 0 : index
    %c3_106 = arith.constant 3 : index
    %c3_107 = arith.constant 3 : index
    %c0_108 = arith.constant 0 : index
    %136 = vector.load %arg1[%c0_105, %c3_106, %c3_107, %c0_108] : memref<1x6x6x32xf32, #tpu.memory_space<vmem>>, vector<1x3x3x32xf32>
    %137 = vector.shape_cast %136 : vector<1x3x3x32xf32> to vector<3x3x32xf32>
    %138 = vector.shape_cast %137 : vector<3x3x32xf32> to vector<9x32xf32>
    %139 = arith.truncf %138 : vector<9x32xf32> to vector<9x32xbf16>
    %c15 = arith.constant 15 : index
    %c0_109 = arith.constant 0 : index
    %c0_110 = arith.constant 0 : index
    %140 = vector.load %arg2[%c15, %c0_109, %c0_110] : memref<16x32x64xf32, #tpu.memory_space<vmem>>, vector<1x32x64xf32>
    %141 = vector.shape_cast %140 : vector<1x32x64xf32> to vector<32x64xf32>
    %142 = arith.truncf %141 : vector<32x64xf32> to vector<32x64xbf16>
    %cst_111 = arith.constant dense<0.000000e+00> : vector<9x64xf32>
    %143 = tpu.matmul %139, %142, %cst_111 {dimension_numbers = #tpu.dot_dimension_numbers<[1], [0], [0], [1], [0, 0, 1, 1], [], []>} : vector<9x32xbf16>, vector<32x64xbf16>, vector<9x64xf32> -> vector<9x64xf32>
    %144 = arith.addf %135, %143 : vector<9x64xf32>
    %c0_112 = arith.constant 0 : index
    %c0_113 = arith.constant 0 : index
    %145 = vector.load %arg3[%c0_112, %c0_113] : memref<1x64xf32, #tpu.memory_space<vmem>>, vector<1x64xf32>
    %146 = vector.broadcast %145 : vector<1x64xf32> to vector<9x64xf32>
    %147 = arith.addf %144, %146 : vector<9x64xf32>
    %cst_114 = arith.constant 0.000000e+00 : f32
    %148 = vector.broadcast %cst_114 : f32 to vector<9x64xf32>
    %149 = arith.cmpf oge, %147, %148 : vector<9x64xf32>
    %cst_115 = arith.constant 0.00999999977 : f32
    %150 = vector.broadcast %cst_115 : f32 to vector<9x64xf32>
    %151 = arith.mulf %150, %147 : vector<9x64xf32>
    %152 = arith.select %149, %147, %151 : vector<9x64xi1>, vector<9x64xf32>
    %153 = vector.shape_cast %152 : vector<9x64xf32> to vector<3x3x64xf32>
    %c0_116 = arith.constant 0 : index
    %c0_117 = arith.constant 0 : index
    %c0_118 = arith.constant 0 : index
    %c0_119 = arith.constant 0 : index
    %154 = vector.load %arg4[%c0_116, %c0_117, %c0_118, %c0_119] : memref<1x3x3x64xf32, #tpu.memory_space<vmem>>, vector<1x3x3x64xf32>
    %155 = vector.shape_cast %154 : vector<1x3x3x64xf32> to vector<3x3x64xf32>
    %156 = vector.shape_cast %153 : vector<3x3x64xf32> to vector<1x3x3x64xf32>
    tpu.vector_store %arg4[%c0_116, %c0_117, %c0_118, %c0_119], %156 {strides = array<i32>} : memref<1x3x3x64xf32, #tpu.memory_space<vmem>>, vector<1x3x3x64xf32>,
    return
  }
  func.func @transform_0(%arg0: i32) -> (i32, i32, i32, i32) {
    %c0_i32 = arith.constant 0 : i32
    %c0_i32_0 = arith.constant 0 : i32
    %c0_i32_1 = arith.constant 0 : i32
    %c0_i32_2 = arith.constant 0 : i32
    return %arg0, %c0_i32, %c0_i32_0, %c0_i32_1 : i32, i32, i32, i32
  }
  func.func @transform_1(%arg0: i32) -> (i32, i32, i32) {
    %c0_i32 = arith.constant 0 : i32
    %c0_i32_0 = arith.constant 0 : i32
    %c0_i32_1 = arith.constant 0 : i32
    %c0_i32_2 = arith.constant 0 : i32
    return %c0_i32, %c0_i32_0, %c0_i32_1 : i32, i32, i32
  }
  func.func @transform_2(%arg0: i32) -> (i32, i32) {
    %c0_i32 = arith.constant 0 : i32
    %c0_i32_0 = arith.constant 0 : i32
    %c0_i32_1 = arith.constant 0 : i32
    return %c0_i32, %c0_i32_0 : i32, i32
  }
  func.func @transform_3(%arg0: i32) -> (i32, i32, i32, i32) {
    %c0_i32 = arith.constant 0 : i32
    %c0_i32_0 = arith.constant 0 : i32
    %c0_i32_1 = arith.constant 0 : i32
    %c0_i32_2 = arith.constant 0 : i32
    return %arg0, %c0_i32, %c0_i32_0, %c0_i32_1 : i32, i32, i32, i32
  }
}

module attributes {stable_mosaic.version = 11 : i64} {
  func.func @kernel(%arg0: i32, %arg1: memref<1x5x5x64xf32, #tpu.memory_space<vmem>>, %arg2: memref<16x64x1xf32, #tpu.memory_space<vmem>>, %arg3: memref<1x1xf32, #tpu.memory_space<vmem>>, %arg4: memref<1x2x2x1xf32, #tpu.memory_space<vmem>>) attributes {dimension_semantics = [#tpu.dimension_semantics<parallel>], iteration_bounds = array<i64: 2>, scalar_prefetch = 0 : i64, scratch_operands = 0 : i64, tpu.core_type = #tpu.core_type<tc>, window_params = [{transform_indices = @transform_0, window_bounds = array<i64: 1, 5, 5, 64>}, {pipeline_mode = #tpu.pipeline_mode<synchronous>, transform_indices = @transform_1, window_bounds = array<i64: 16, 64, 1>}, {pipeline_mode = #tpu.pipeline_mode<synchronous>, transform_indices = @transform_2, window_bounds = array<i64: 1, 1>}, {transform_indices = @transform_3, window_bounds = array<i64: 1, 2, 2, 1>}]} {
    %cst = arith.constant 0.000000e+00 : f32
    %0 = vector.broadcast %cst : f32 to vector<4x1xf32>
    %c0 = arith.constant 0 : index
    %c0_0 = arith.constant 0 : index
    %c0_1 = arith.constant 0 : index
    %c0_2 = arith.constant 0 : index
    %1 = vector.load %arg1[%c0, %c0_0, %c0_1, %c0_2] : memref<1x5x5x64xf32, #tpu.memory_space<vmem>>, vector<1x2x2x64xf32>
    %2 = vector.shape_cast %1 : vector<1x2x2x64xf32> to vector<2x2x64xf32>
    %3 = vector.shape_cast %2 : vector<2x2x64xf32> to vector<4x64xf32>
    %4 = arith.truncf %3 : vector<4x64xf32> to vector<4x64xbf16>
    %c0_3 = arith.constant 0 : index
    %c0_4 = arith.constant 0 : index
    %c0_5 = arith.constant 0 : index
    %5 = vector.load %arg2[%c0_3, %c0_4, %c0_5] : memref<16x64x1xf32, #tpu.memory_space<vmem>>, vector<1x64x1xf32>
    %6 = vector.shape_cast %5 : vector<1x64x1xf32> to vector<64x1xf32>
    %7 = arith.truncf %6 : vector<64x1xf32> to vector<64x1xbf16>
    %cst_6 = arith.constant dense<0.000000e+00> : vector<4x1xf32>
    %8 = tpu.matmul %4, %7, %cst_6 {dimension_numbers = #tpu.dot_dimension_numbers<[1], [0], [0], [1], [0, 0, 1, 1], [], []>} : vector<4x64xbf16>, vector<64x1xbf16>, vector<4x1xf32> -> vector<4x1xf32>
    %9 = arith.addf %0, %8 : vector<4x1xf32>
    %c0_7 = arith.constant 0 : index
    %c0_8 = arith.constant 0 : index
    %c1 = arith.constant 1 : index
    %c0_9 = arith.constant 0 : index
    %10 = vector.load %arg1[%c0_7, %c0_8, %c1, %c0_9] : memref<1x5x5x64xf32, #tpu.memory_space<vmem>>, vector<1x2x2x64xf32>
    %11 = vector.shape_cast %10 : vector<1x2x2x64xf32> to vector<2x2x64xf32>
    %12 = vector.shape_cast %11 : vector<2x2x64xf32> to vector<4x64xf32>
    %13 = arith.truncf %12 : vector<4x64xf32> to vector<4x64xbf16>
    %c1_10 = arith.constant 1 : index
    %c0_11 = arith.constant 0 : index
    %c0_12 = arith.constant 0 : index
    %14 = vector.load %arg2[%c1_10, %c0_11, %c0_12] : memref<16x64x1xf32, #tpu.memory_space<vmem>>, vector<1x64x1xf32>
    %15 = vector.shape_cast %14 : vector<1x64x1xf32> to vector<64x1xf32>
    %16 = arith.truncf %15 : vector<64x1xf32> to vector<64x1xbf16>
    %cst_13 = arith.constant dense<0.000000e+00> : vector<4x1xf32>
    %17 = tpu.matmul %13, %16, %cst_13 {dimension_numbers = #tpu.dot_dimension_numbers<[1], [0], [0], [1], [0, 0, 1, 1], [], []>} : vector<4x64xbf16>, vector<64x1xbf16>, vector<4x1xf32> -> vector<4x1xf32>
    %18 = arith.addf %9, %17 : vector<4x1xf32>
    %c0_14 = arith.constant 0 : index
    %c0_15 = arith.constant 0 : index
    %c2 = arith.constant 2 : index
    %c0_16 = arith.constant 0 : index
    %19 = vector.load %arg1[%c0_14, %c0_15, %c2, %c0_16] : memref<1x5x5x64xf32, #tpu.memory_space<vmem>>, vector<1x2x2x64xf32>
    %20 = vector.shape_cast %19 : vector<1x2x2x64xf32> to vector<2x2x64xf32>
    %21 = vector.shape_cast %20 : vector<2x2x64xf32> to vector<4x64xf32>
    %22 = arith.truncf %21 : vector<4x64xf32> to vector<4x64xbf16>
    %c2_17 = arith.constant 2 : index
    %c0_18 = arith.constant 0 : index
    %c0_19 = arith.constant 0 : index
    %23 = vector.load %arg2[%c2_17, %c0_18, %c0_19] : memref<16x64x1xf32, #tpu.memory_space<vmem>>, vector<1x64x1xf32>
    %24 = vector.shape_cast %23 : vector<1x64x1xf32> to vector<64x1xf32>
    %25 = arith.truncf %24 : vector<64x1xf32> to vector<64x1xbf16>
    %cst_20 = arith.constant dense<0.000000e+00> : vector<4x1xf32>
    %26 = tpu.matmul %22, %25, %cst_20 {dimension_numbers = #tpu.dot_dimension_numbers<[1], [0], [0], [1], [0, 0, 1, 1], [], []>} : vector<4x64xbf16>, vector<64x1xbf16>, vector<4x1xf32> -> vector<4x1xf32>
    %27 = arith.addf %18, %26 : vector<4x1xf32>
    %c0_21 = arith.constant 0 : index
    %c0_22 = arith.constant 0 : index
    %c3 = arith.constant 3 : index
    %c0_23 = arith.constant 0 : index
    %28 = vector.load %arg1[%c0_21, %c0_22, %c3, %c0_23] : memref<1x5x5x64xf32, #tpu.memory_space<vmem>>, vector<1x2x2x64xf32>
    %29 = vector.shape_cast %28 : vector<1x2x2x64xf32> to vector<2x2x64xf32>
    %30 = vector.shape_cast %29 : vector<2x2x64xf32> to vector<4x64xf32>
    %31 = arith.truncf %30 : vector<4x64xf32> to vector<4x64xbf16>
    %c3_24 = arith.constant 3 : index
    %c0_25 = arith.constant 0 : index
    %c0_26 = arith.constant 0 : index
    %32 = vector.load %arg2[%c3_24, %c0_25, %c0_26] : memref<16x64x1xf32, #tpu.memory_space<vmem>>, vector<1x64x1xf32>
    %33 = vector.shape_cast %32 : vector<1x64x1xf32> to vector<64x1xf32>
    %34 = arith.truncf %33 : vector<64x1xf32> to vector<64x1xbf16>
    %cst_27 = arith.constant dense<0.000000e+00> : vector<4x1xf32>
    %35 = tpu.matmul %31, %34, %cst_27 {dimension_numbers = #tpu.dot_dimension_numbers<[1], [0], [0], [1], [0, 0, 1, 1], [], []>} : vector<4x64xbf16>, vector<64x1xbf16>, vector<4x1xf32> -> vector<4x1xf32>
    %36 = arith.addf %27, %35 : vector<4x1xf32>
    %c0_28 = arith.constant 0 : index
    %c1_29 = arith.constant 1 : index
    %c0_30 = arith.constant 0 : index
    %c0_31 = arith.constant 0 : index
    %37 = vector.load %arg1[%c0_28, %c1_29, %c0_30, %c0_31] : memref<1x5x5x64xf32, #tpu.memory_space<vmem>>, vector<1x2x2x64xf32>
    %38 = vector.shape_cast %37 : vector<1x2x2x64xf32> to vector<2x2x64xf32>
    %39 = vector.shape_cast %38 : vector<2x2x64xf32> to vector<4x64xf32>
    %40 = arith.truncf %39 : vector<4x64xf32> to vector<4x64xbf16>
    %c4 = arith.constant 4 : index
    %c0_32 = arith.constant 0 : index
    %c0_33 = arith.constant 0 : index
    %41 = vector.load %arg2[%c4, %c0_32, %c0_33] : memref<16x64x1xf32, #tpu.memory_space<vmem>>, vector<1x64x1xf32>
    %42 = vector.shape_cast %41 : vector<1x64x1xf32> to vector<64x1xf32>
    %43 = arith.truncf %42 : vector<64x1xf32> to vector<64x1xbf16>
    %cst_34 = arith.constant dense<0.000000e+00> : vector<4x1xf32>
    %44 = tpu.matmul %40, %43, %cst_34 {dimension_numbers = #tpu.dot_dimension_numbers<[1], [0], [0], [1], [0, 0, 1, 1], [], []>} : vector<4x64xbf16>, vector<64x1xbf16>, vector<4x1xf32> -> vector<4x1xf32>
    %45 = arith.addf %36, %44 : vector<4x1xf32>
    %c0_35 = arith.constant 0 : index
    %c1_36 = arith.constant 1 : index
    %c1_37 = arith.constant 1 : index
    %c0_38 = arith.constant 0 : index
    %46 = vector.load %arg1[%c0_35, %c1_36, %c1_37, %c0_38] : memref<1x5x5x64xf32, #tpu.memory_space<vmem>>, vector<1x2x2x64xf32>
    %47 = vector.shape_cast %46 : vector<1x2x2x64xf32> to vector<2x2x64xf32>
    %48 = vector.shape_cast %47 : vector<2x2x64xf32> to vector<4x64xf32>
    %49 = arith.truncf %48 : vector<4x64xf32> to vector<4x64xbf16>
    %c5 = arith.constant 5 : index
    %c0_39 = arith.constant 0 : index
    %c0_40 = arith.constant 0 : index
    %50 = vector.load %arg2[%c5, %c0_39, %c0_40] : memref<16x64x1xf32, #tpu.memory_space<vmem>>, vector<1x64x1xf32>
    %51 = vector.shape_cast %50 : vector<1x64x1xf32> to vector<64x1xf32>
    %52 = arith.truncf %51 : vector<64x1xf32> to vector<64x1xbf16>
    %cst_41 = arith.constant dense<0.000000e+00> : vector<4x1xf32>
    %53 = tpu.matmul %49, %52, %cst_41 {dimension_numbers = #tpu.dot_dimension_numbers<[1], [0], [0], [1], [0, 0, 1, 1], [], []>} : vector<4x64xbf16>, vector<64x1xbf16>, vector<4x1xf32> -> vector<4x1xf32>
    %54 = arith.addf %45, %53 : vector<4x1xf32>
    %c0_42 = arith.constant 0 : index
    %c1_43 = arith.constant 1 : index
    %c2_44 = arith.constant 2 : index
    %c0_45 = arith.constant 0 : index
    %55 = vector.load %arg1[%c0_42, %c1_43, %c2_44, %c0_45] : memref<1x5x5x64xf32, #tpu.memory_space<vmem>>, vector<1x2x2x64xf32>
    %56 = vector.shape_cast %55 : vector<1x2x2x64xf32> to vector<2x2x64xf32>
    %57 = vector.shape_cast %56 : vector<2x2x64xf32> to vector<4x64xf32>
    %58 = arith.truncf %57 : vector<4x64xf32> to vector<4x64xbf16>
    %c6 = arith.constant 6 : index
    %c0_46 = arith.constant 0 : index
    %c0_47 = arith.constant 0 : index
    %59 = vector.load %arg2[%c6, %c0_46, %c0_47] : memref<16x64x1xf32, #tpu.memory_space<vmem>>, vector<1x64x1xf32>
    %60 = vector.shape_cast %59 : vector<1x64x1xf32> to vector<64x1xf32>
    %61 = arith.truncf %60 : vector<64x1xf32> to vector<64x1xbf16>
    %cst_48 = arith.constant dense<0.000000e+00> : vector<4x1xf32>
    %62 = tpu.matmul %58, %61, %cst_48 {dimension_numbers = #tpu.dot_dimension_numbers<[1], [0], [0], [1], [0, 0, 1, 1], [], []>} : vector<4x64xbf16>, vector<64x1xbf16>, vector<4x1xf32> -> vector<4x1xf32>
    %63 = arith.addf %54, %62 : vector<4x1xf32>
    %c0_49 = arith.constant 0 : index
    %c1_50 = arith.constant 1 : index
    %c3_51 = arith.constant 3 : index
    %c0_52 = arith.constant 0 : index
    %64 = vector.load %arg1[%c0_49, %c1_50, %c3_51, %c0_52] : memref<1x5x5x64xf32, #tpu.memory_space<vmem>>, vector<1x2x2x64xf32>
    %65 = vector.shape_cast %64 : vector<1x2x2x64xf32> to vector<2x2x64xf32>
    %66 = vector.shape_cast %65 : vector<2x2x64xf32> to vector<4x64xf32>
    %67 = arith.truncf %66 : vector<4x64xf32> to vector<4x64xbf16>
    %c7 = arith.constant 7 : index
    %c0_53 = arith.constant 0 : index
    %c0_54 = arith.constant 0 : index
    %68 = vector.load %arg2[%c7, %c0_53, %c0_54] : memref<16x64x1xf32, #tpu.memory_space<vmem>>, vector<1x64x1xf32>
    %69 = vector.shape_cast %68 : vector<1x64x1xf32> to vector<64x1xf32>
    %70 = arith.truncf %69 : vector<64x1xf32> to vector<64x1xbf16>
    %cst_55 = arith.constant dense<0.000000e+00> : vector<4x1xf32>
    %71 = tpu.matmul %67, %70, %cst_55 {dimension_numbers = #tpu.dot_dimension_numbers<[1], [0], [0], [1], [0, 0, 1, 1], [], []>} : vector<4x64xbf16>, vector<64x1xbf16>, vector<4x1xf32> -> vector<4x1xf32>
    %72 = arith.addf %63, %71 : vector<4x1xf32>
    %c0_56 = arith.constant 0 : index
    %c2_57 = arith.constant 2 : index
    %c0_58 = arith.constant 0 : index
    %c0_59 = arith.constant 0 : index
    %73 = vector.load %arg1[%c0_56, %c2_57, %c0_58, %c0_59] : memref<1x5x5x64xf32, #tpu.memory_space<vmem>>, vector<1x2x2x64xf32>
    %74 = vector.shape_cast %73 : vector<1x2x2x64xf32> to vector<2x2x64xf32>
    %75 = vector.shape_cast %74 : vector<2x2x64xf32> to vector<4x64xf32>
    %76 = arith.truncf %75 : vector<4x64xf32> to vector<4x64xbf16>
    %c8 = arith.constant 8 : index
    %c0_60 = arith.constant 0 : index
    %c0_61 = arith.constant 0 : index
    %77 = vector.load %arg2[%c8, %c0_60, %c0_61] : memref<16x64x1xf32, #tpu.memory_space<vmem>>, vector<1x64x1xf32>
    %78 = vector.shape_cast %77 : vector<1x64x1xf32> to vector<64x1xf32>
    %79 = arith.truncf %78 : vector<64x1xf32> to vector<64x1xbf16>
    %cst_62 = arith.constant dense<0.000000e+00> : vector<4x1xf32>
    %80 = tpu.matmul %76, %79, %cst_62 {dimension_numbers = #tpu.dot_dimension_numbers<[1], [0], [0], [1], [0, 0, 1, 1], [], []>} : vector<4x64xbf16>, vector<64x1xbf16>, vector<4x1xf32> -> vector<4x1xf32>
    %81 = arith.addf %72, %80 : vector<4x1xf32>
    %c0_63 = arith.constant 0 : index
    %c2_64 = arith.constant 2 : index
    %c1_65 = arith.constant 1 : index
    %c0_66 = arith.constant 0 : index
    %82 = vector.load %arg1[%c0_63, %c2_64, %c1_65, %c0_66] : memref<1x5x5x64xf32, #tpu.memory_space<vmem>>, vector<1x2x2x64xf32>
    %83 = vector.shape_cast %82 : vector<1x2x2x64xf32> to vector<2x2x64xf32>
    %84 = vector.shape_cast %83 : vector<2x2x64xf32> to vector<4x64xf32>
    %85 = arith.truncf %84 : vector<4x64xf32> to vector<4x64xbf16>
    %c9 = arith.constant 9 : index
    %c0_67 = arith.constant 0 : index
    %c0_68 = arith.constant 0 : index
    %86 = vector.load %arg2[%c9, %c0_67, %c0_68] : memref<16x64x1xf32, #tpu.memory_space<vmem>>, vector<1x64x1xf32>
    %87 = vector.shape_cast %86 : vector<1x64x1xf32> to vector<64x1xf32>
    %88 = arith.truncf %87 : vector<64x1xf32> to vector<64x1xbf16>
    %cst_69 = arith.constant dense<0.000000e+00> : vector<4x1xf32>
    %89 = tpu.matmul %85, %88, %cst_69 {dimension_numbers = #tpu.dot_dimension_numbers<[1], [0], [0], [1], [0, 0, 1, 1], [], []>} : vector<4x64xbf16>, vector<64x1xbf16>, vector<4x1xf32> -> vector<4x1xf32>
    %90 = arith.addf %81, %89 : vector<4x1xf32>
    %c0_70 = arith.constant 0 : index
    %c2_71 = arith.constant 2 : index
    %c2_72 = arith.constant 2 : index
    %c0_73 = arith.constant 0 : index
    %91 = vector.load %arg1[%c0_70, %c2_71, %c2_72, %c0_73] : memref<1x5x5x64xf32, #tpu.memory_space<vmem>>, vector<1x2x2x64xf32>
    %92 = vector.shape_cast %91 : vector<1x2x2x64xf32> to vector<2x2x64xf32>
    %93 = vector.shape_cast %92 : vector<2x2x64xf32> to vector<4x64xf32>
    %94 = arith.truncf %93 : vector<4x64xf32> to vector<4x64xbf16>
    %c10 = arith.constant 10 : index
    %c0_74 = arith.constant 0 : index
    %c0_75 = arith.constant 0 : index
    %95 = vector.load %arg2[%c10, %c0_74, %c0_75] : memref<16x64x1xf32, #tpu.memory_space<vmem>>, vector<1x64x1xf32>
    %96 = vector.shape_cast %95 : vector<1x64x1xf32> to vector<64x1xf32>
    %97 = arith.truncf %96 : vector<64x1xf32> to vector<64x1xbf16>
    %cst_76 = arith.constant dense<0.000000e+00> : vector<4x1xf32>
    %98 = tpu.matmul %94, %97, %cst_76 {dimension_numbers = #tpu.dot_dimension_numbers<[1], [0], [0], [1], [0, 0, 1, 1], [], []>} : vector<4x64xbf16>, vector<64x1xbf16>, vector<4x1xf32> -> vector<4x1xf32>
    %99 = arith.addf %90, %98 : vector<4x1xf32>
    %c0_77 = arith.constant 0 : index
    %c2_78 = arith.constant 2 : index
    %c3_79 = arith.constant 3 : index
    %c0_80 = arith.constant 0 : index
    %100 = vector.load %arg1[%c0_77, %c2_78, %c3_79, %c0_80] : memref<1x5x5x64xf32, #tpu.memory_space<vmem>>, vector<1x2x2x64xf32>
    %101 = vector.shape_cast %100 : vector<1x2x2x64xf32> to vector<2x2x64xf32>
    %102 = vector.shape_cast %101 : vector<2x2x64xf32> to vector<4x64xf32>
    %103 = arith.truncf %102 : vector<4x64xf32> to vector<4x64xbf16>
    %c11 = arith.constant 11 : index
    %c0_81 = arith.constant 0 : index
    %c0_82 = arith.constant 0 : index
    %104 = vector.load %arg2[%c11, %c0_81, %c0_82] : memref<16x64x1xf32, #tpu.memory_space<vmem>>, vector<1x64x1xf32>
    %105 = vector.shape_cast %104 : vector<1x64x1xf32> to vector<64x1xf32>
    %106 = arith.truncf %105 : vector<64x1xf32> to vector<64x1xbf16>
    %cst_83 = arith.constant dense<0.000000e+00> : vector<4x1xf32>
    %107 = tpu.matmul %103, %106, %cst_83 {dimension_numbers = #tpu.dot_dimension_numbers<[1], [0], [0], [1], [0, 0, 1, 1], [], []>} : vector<4x64xbf16>, vector<64x1xbf16>, vector<4x1xf32> -> vector<4x1xf32>
    %108 = arith.addf %99, %107 : vector<4x1xf32>
    %c0_84 = arith.constant 0 : index
    %c3_85 = arith.constant 3 : index
    %c0_86 = arith.constant 0 : index
    %c0_87 = arith.constant 0 : index
    %109 = vector.load %arg1[%c0_84, %c3_85, %c0_86, %c0_87] : memref<1x5x5x64xf32, #tpu.memory_space<vmem>>, vector<1x2x2x64xf32>
    %110 = vector.shape_cast %109 : vector<1x2x2x64xf32> to vector<2x2x64xf32>
    %111 = vector.shape_cast %110 : vector<2x2x64xf32> to vector<4x64xf32>
    %112 = arith.truncf %111 : vector<4x64xf32> to vector<4x64xbf16>
    %c12 = arith.constant 12 : index
    %c0_88 = arith.constant 0 : index
    %c0_89 = arith.constant 0 : index
    %113 = vector.load %arg2[%c12, %c0_88, %c0_89] : memref<16x64x1xf32, #tpu.memory_space<vmem>>, vector<1x64x1xf32>
    %114 = vector.shape_cast %113 : vector<1x64x1xf32> to vector<64x1xf32>
    %115 = arith.truncf %114 : vector<64x1xf32> to vector<64x1xbf16>
    %cst_90 = arith.constant dense<0.000000e+00> : vector<4x1xf32>
    %116 = tpu.matmul %112, %115, %cst_90 {dimension_numbers = #tpu.dot_dimension_numbers<[1], [0], [0], [1], [0, 0, 1, 1], [], []>} : vector<4x64xbf16>, vector<64x1xbf16>, vector<4x1xf32> -> vector<4x1xf32>
    %117 = arith.addf %108, %116 : vector<4x1xf32>
    %c0_91 = arith.constant 0 : index
    %c3_92 = arith.constant 3 : index
    %c1_93 = arith.constant 1 : index
    %c0_94 = arith.constant 0 : index
    %118 = vector.load %arg1[%c0_91, %c3_92, %c1_93, %c0_94] : memref<1x5x5x64xf32, #tpu.memory_space<vmem>>, vector<1x2x2x64xf32>
    %119 = vector.shape_cast %118 : vector<1x2x2x64xf32> to vector<2x2x64xf32>
    %120 = vector.shape_cast %119 : vector<2x2x64xf32> to vector<4x64xf32>
    %121 = arith.truncf %120 : vector<4x64xf32> to vector<4x64xbf16>
    %c13 = arith.constant 13 : index
    %c0_95 = arith.constant 0 : index
    %c0_96 = arith.constant 0 : index
    %122 = vector.load %arg2[%c13, %c0_95, %c0_96] : memref<16x64x1xf32, #tpu.memory_space<vmem>>, vector<1x64x1xf32>
    %123 = vector.shape_cast %122 : vector<1x64x1xf32> to vector<64x1xf32>
    %124 = arith.truncf %123 : vector<64x1xf32> to vector<64x1xbf16>
    %cst_97 = arith.constant dense<0.000000e+00> : vector<4x1xf32>
    %125 = tpu.matmul %121, %124, %cst_97 {dimension_numbers = #tpu.dot_dimension_numbers<[1], [0], [0], [1], [0, 0, 1, 1], [], []>} : vector<4x64xbf16>, vector<64x1xbf16>, vector<4x1xf32> -> vector<4x1xf32>
    %126 = arith.addf %117, %125 : vector<4x1xf32>
    %c0_98 = arith.constant 0 : index
    %c3_99 = arith.constant 3 : index
    %c2_100 = arith.constant 2 : index
    %c0_101 = arith.constant 0 : index
    %127 = vector.load %arg1[%c0_98, %c3_99, %c2_100, %c0_101] : memref<1x5x5x64xf32, #tpu.memory_space<vmem>>, vector<1x2x2x64xf32>
    %128 = vector.shape_cast %127 : vector<1x2x2x64xf32> to vector<2x2x64xf32>
    %129 = vector.shape_cast %128 : vector<2x2x64xf32> to vector<4x64xf32>
    %130 = arith.truncf %129 : vector<4x64xf32> to vector<4x64xbf16>
    %c14 = arith.constant 14 : index
    %c0_102 = arith.constant 0 : index
    %c0_103 = arith.constant 0 : index
    %131 = vector.load %arg2[%c14, %c0_102, %c0_103] : memref<16x64x1xf32, #tpu.memory_space<vmem>>, vector<1x64x1xf32>
    %132 = vector.shape_cast %131 : vector<1x64x1xf32> to vector<64x1xf32>
    %133 = arith.truncf %132 : vector<64x1xf32> to vector<64x1xbf16>
    %cst_104 = arith.constant dense<0.000000e+00> : vector<4x1xf32>
    %134 = tpu.matmul %130, %133, %cst_104 {dimension_numbers = #tpu.dot_dimension_numbers<[1], [0], [0], [1], [0, 0, 1, 1], [], []>} : vector<4x64xbf16>, vector<64x1xbf16>, vector<4x1xf32> -> vector<4x1xf32>
    %135 = arith.addf %126, %134 : vector<4x1xf32>
    %c0_105 = arith.constant 0 : index
    %c3_106 = arith.constant 3 : index
    %c3_107 = arith.constant 3 : index
    %c0_108 = arith.constant 0 : index
    %136 = vector.load %arg1[%c0_105, %c3_106, %c3_107, %c0_108] : memref<1x5x5x64xf32, #tpu.memory_space<vmem>>, vector<1x2x2x64xf32>
    %137 = vector.shape_cast %136 : vector<1x2x2x64xf32> to vector<2x2x64xf32>
    %138 = vector.shape_cast %137 : vector<2x2x64xf32> to vector<4x64xf32>
    %139 = arith.truncf %138 : vector<4x64xf32> to vector<4x64xbf16>
    %c15 = arith.constant 15 : index
    %c0_109 = arith.constant 0 : index
    %c0_110 = arith.constant 0 : index
    %140 = vector.load %arg2[%c15, %c0_109, %c0_110] : memref<16x64x1xf32, #tpu.memory_space<vmem>>, vector<1x64x1xf32>
    %141 = vector.shape_cast %140 : vector<1x64x1xf32> to vector<64x1xf32>
    %142 = arith.truncf %141 : vector<64x1xf32> to vector<64x1xbf16>
    %cst_111 = arith.constant dense<0.000000e+00> : vector<4x1xf32>
    %143 = tpu.matmul %139, %142, %cst_111 {dimension_numbers = #tpu.dot_dimension_numbers<[1], [0], [0], [1], [0, 0, 1, 1], [], []>} : vector<4x64xbf16>, vector<64x1xbf16>, vector<4x1xf32> -> vector<4x1xf32>
    %144 = arith.addf %135, %143 : vector<4x1xf32>
    %c0_112 = arith.constant 0 : index
    %c0_113 = arith.constant 0 : index
    %145 = vector.load %arg3[%c0_112, %c0_113] : memref<1x1xf32, #tpu.memory_space<vmem>>, vector<1x1xf32>
    %146 = vector.broadcast %145 : vector<1x1xf32> to vector<4x1xf32>
    %147 = arith.addf %144, %146 : vector<4x1xf32>
    %148 = vector.shape_cast %147 : vector<4x1xf32> to vector<2x2x1xf32>
    %c0_114 = arith.constant 0 : index
    %c0_115 = arith.constant 0 : index
    %c0_116 = arith.constant 0 : index
    %c0_117 = arith.constant 0 : index
    %149 = vector.load %arg4[%c0_114, %c0_115, %c0_116, %c0_117] : memref<1x2x2x1xf32, #tpu.memory_space<vmem>>, vector<1x2x2x1xf32>
    %150 = vector.shape_cast %149 : vector<1x2x2x1xf32> to vector<2x2x1xf32>
    %151 = vector.shape_cast %148 : vector<2x2x1xf32> to vector<1x2x2x1xf32>
    tpu.vector_store %arg4[%c0_114, %c0_115, %c0_116, %c0_117], %151 {strides = array<i32>} : memref<1x2x2x1xf32, #tpu.memory_space<vmem>>, vector<1x2x2x1xf32>,
    return
  }
  func.func @transform_0(%arg0: i32) -> (i32, i32, i32, i32) {
    %c0_i32 = arith.constant 0 : i32
    %c0_i32_0 = arith.constant 0 : i32
    %c0_i32_1 = arith.constant 0 : i32
    %c0_i32_2 = arith.constant 0 : i32
    return %arg0, %c0_i32, %c0_i32_0, %c0_i32_1 : i32, i32, i32, i32
  }
  func.func @transform_1(%arg0: i32) -> (i32, i32, i32) {
    %c0_i32 = arith.constant 0 : i32
    %c0_i32_0 = arith.constant 0 : i32
    %c0_i32_1 = arith.constant 0 : i32
    %c0_i32_2 = arith.constant 0 : i32
    return %c0_i32, %c0_i32_0, %c0_i32_1 : i32, i32, i32
  }
  func.func @transform_2(%arg0: i32) -> (i32, i32) {
    %c0_i32 = arith.constant 0 : i32
    %c0_i32_0 = arith.constant 0 : i32
    %c0_i32_1 = arith.constant 0 : i32
    return %c0_i32, %c0_i32_0 : i32, i32
  }
  func.func @transform_3(%arg0: i32) -> (i32, i32, i32, i32) {
    %c0_i32 = arith.constant 0 : i32
    %c0_i32_0 = arith.constant 0 : i32
    %c0_i32_1 = arith.constant 0 : i32
    %c0_i32_2 = arith.constant 0 : i32
    return %arg0, %c0_i32, %c0_i32_0, %c0_i32_1 : i32, i32, i32, i32
  }
}

</mosaic_0001>

<bundles_post_ra>
// kernel: discriminator_forward.5
= control target key start
LH: loop header
LB: loop body
LE: loop exit
PB: predicated region body
PF: predicated region fallthrough
CT: control target
= control target key end

     0   :  { %s2004_s12 = smov 0   ;;  %s2378_s0 = inlined_call_operand.vmem [shape: f32[2,17,17,12], index: 0, kind: input, shape index: {}]   ;;  %s2379_s1 = inlined_call_operand.vmem [shape: f32[4,12,8], index: 1, kind: input, shape index: {}]   ;;  %s2380_s2 = inlined_call_operand.vmem [shape: f32[1,8], index: 2, kind: input, shape index: {}]   ;;  %s2381_s3 = inlined_call_operand.vmem [shape: f32[2,16,16,8], index: 3, kind: output, shape index: {}]  }
   0x1 LB: > { %s1517_s13 = sadd.s32 4294967295, %s1982_s12   ;;  %p1521_p0 = scmp.ge.s32.totalorder %s1982_s12, 1  ;;  %s1982_s12 = sphi %s2004_s12, %s13_s12  }
   0x2   : > { %p137_p1 = scmp.lt.s32.totalorder %s1982_s12, 3 }
   0x4   : > { %p138_p2 = pnand %p1521_p0, %p137_p1 }
   0x5   : > { %v1525_v0 = vld [vmem:[%s2379_s1 + $0x10] sm:$0xff] (!%p138_p2)  ;;  %v1526_v1 = vld [vmem:[%s2379_s1 + $0x18] sm:$0xf] (!%p138_p2)  ;;  %vm324_vm0 = vcmask (!%p138_p2), 1045504   ;;  %v1591_v2 = vld [vmem:[%s2379_s1 + $0x20] sm:$0xff] (!%p138_p2)  ;;  %p161_p3 = scmp.lt.s32.totalorder (!%p138_p2), %s1517_s13, 1 }
   0x6   : > { %141 = sbr.rel (%p138_p2) target bundleno = 365 (0x16d), region = 32  ;;  %v274_v3 = vpack.c.bf16 (!%p138_p2), %v1526_v1, %v1525_v0  ;;  %v1592_v4 = vld [vmem:[%s2379_s1 + $0x28] sm:$0xf] (!%p138_p2)  ;;  %v220_v5 = vld [vmem:[%s2379_s1] sm:$0xff] (!%p138_p2)  ;;  %v1641_v9 = vld [vmem:[%s2379_s1 + $0x30] sm:$0xff] (!%p138_p2)  ;;  %vm275_vm1 = vcmask (!%p138_p2), 97280  }
   0x7   : > { %v221_v6 = vld [vmem:[%s2379_s1 + $0x8] sm:$0xf] (!%p138_p2)  ;;  %v753_v7 = vpack.c.bf16 (!%p138_p2), %v1592_v4, %v1591_v2  ;;  %v1642_v10 = vld [vmem:[%s2379_s1 + $0x38] sm:$0xf] (!%p138_p2)  ;;  %vm1429_vm3 = vcmask (!%p138_p2), 64512  }
   0x8   : > { %v222_v8 = vpack.c.bf16 (!%p138_p2), %v221_v6, %v220_v5  ;;  %1963 = vmatprep.subr.msk.bf16.mxu1 (!%p138_p2), %vm324_vm0, %v274_v3  ;;  %v326_v11 = vsel (!%p138_p2), %vm324_vm0, %v274_v3, 0  ;;  %v1049_v12 = vpack.c.bf16 (!%p138_p2), %v1642_v10, %v1641_v9 }
   0x9   : > { %1965 = vmatprep.subr.msk.bf16.mxu0 (!%p138_p2), %vm324_vm0, %v753_v7  ;;  %1732 = vmatpush3.bf16.msra.mxu1 (!%p138_p2), %v326_v11  ;;  %v803_v13 = vsel (!%p138_p2), %vm324_vm0, %v753_v7, 0 }
   0xa   : > { %1800 = vmatpush3.bf16.msra.mxu0 (!%p138_p2), %v803_v13  ;;  %1964 = vmatprep.subr.msk.bf16.mxu1 (!%p138_p2), %vm324_vm0, %v222_v8  ;;  %v538_v23 = vsel (!%p138_p2), %vm324_vm0, %v222_v8, 0  ;;  %v1099_v28 = vsel (!%p138_p2), %vm324_vm0, %v1049_v12, 0 }
   0xb   : > { %1966 = vmatprep.subr.msk.bf16.mxu0 (!%p138_p2), %vm324_vm0, %v1049_v12 }
   0xd   : > { %s2383_s13 = smov (!%p161_p3, %s1517_s13), 1 }
   0xe   : > { %s1967_s30 = smul.u32 408, %s2383_s13  ;;  %s1662_s9 = sshll.u32 %s2383_s13, 8 }
   0xf   : > { %s2279_s14 = scalar_lea.vmem %s2381_s3, %s1662_s9 }
  0x10   : > { %s2047_s6 = scalar_lea.vmem %s2378_s0, %s1967_s30 }
  0x11   : > { %v223_v14 = vld [vmem:[%s2047_s6 + $0x1] sm:$0xff]  ;;  %v224_v15 = vld [vmem:[%s2047_s6 + $0x9] sm:$0xff]  ;;  %v1559_v16 = vld [vmem:[%s2047_s6 + $0x18] sm:$0xff] }
  0x12   : > { %v255_v17 = vpack.c.bf16 %v224_v15, %v223_v14  ;;  %v1560_v18 = vld [vmem:[%s2047_s6 + $0x20] sm:$0xff]  ;;  %v1561_v24 = vld [vmem:[%s2047_s6 + $0x30] sm:$0xff]  ;;  %v1562_v25 = vld [vmem:[%s2047_s6 + $0x38] sm:$0xff] }
  0x13   : > { %v225_v19 = vld [vmem:[%s2047_s6 + $0x19] sm:$0xff]  ;;  %v226_v20 = vld [vmem:[%s2047_s6 + $0x21] sm:$0xff]  ;;  %v2056_v21 = vpack.c.bf16 %v1560_v18, %v1559_v16  ;;  %v227_v26 = vld [vmem:[%s2047_s6 + $0x31] sm:$0xff]  ;;  %v2065_v27 = vpack.c.bf16 %v1562_v25, %v1561_v24 }
  0x14   : > { %v2058_v22 = vpack.c.bf16 %v226_v20, %v225_v19  ;;  %1733 = vmatprep.mubr.msk.bf16.mxu1 %vm275_vm1, %v255_v17  ;;  %v228_v29 = vld [vmem:[%s2047_s6 + $0x39] sm:$0xff]  ;;  %v1563_v30 = vld [vmem:[%s2047_s6 + $0x48] sm:$0xff]  ;;  %v1564_v31 = vld [vmem:[%s2047_s6 + $0x50] sm:$0xff] }
  0x15   : > { %1801 = vmatprep.mubr.msk.bf16.mxu0 %vm275_vm1, %v2056_v21  ;;  %v2075_v32 = vpack.c.bf16 %v228_v29, %v227_v26  ;;  %v2077_v33 = vpack.c.bf16 %v1564_v31, %v1563_v30  ;;  %v229_v34 = vld [vmem:[%s2047_s6 + $0x49] sm:$0xff]  ;;  %v230_v35 = vld [vmem:[%s2047_s6 + $0x51] sm:$0xff]  ;;  %v1565_v36 = vld [vmem:[%s2047_s6 + $0x60] sm:$0xff] }
  0x16   : > { %1734 = vmatmul.mubr.msk.bf16.vlgmr.msra.gmra.mrb[0].mxu1 %vm275_vm1, %v2058_v22  ;;  %1802 = vmatmul.mubr.msk.bf16.vlgmr.msra.gmra.mrb[0].mxu0 %vm275_vm1, %v2065_v27  ;;  %v1566_v37 = vld [vmem:[%s2047_s6 + $0x68] sm:$0xff]  ;;  %v1567_v40 = vld [vmem:[%s2047_s6 + $0x78] sm:$0xff]  ;;  %v1568_v41 = vld [vmem:[%s2047_s6 + $0x80] sm:$0xff]  ;;  %v2093_v42 = vpack.c.bf16 %v230_v35, %v229_v34 }
  0x17   : > { %1766 = vmatpush3.bf16.msra.mxu1 %v538_v23  ;;  %1834 = vmatpush3.bf16.msra.mxu0 %v1099_v28  ;;  %v231_v38 = vld [vmem:[%s2047_s6 + $0x61] sm:$0xff]  ;;  %v232_v39 = vld [vmem:[%s2047_s6 + $0x69] sm:$0xff]  ;;  %v2095_v43 = vpack.c.bf16 %v1566_v37, %v1565_v36  ;;  %v2099_v45 = vpack.c.bf16 %v1568_v41, %v1567_v40  ;;  %v233_v46 = vld [vmem:[%s2047_s6 + $0x79] sm:$0xff] }
  0x18   : > { %1737 = vmatprep.mubr.msk.bf16.mxu1 %vm275_vm1, %v2075_v32  ;;  %1805 = vmatprep.mubr.msk.bf16.mxu0 %vm275_vm1, %v2077_v33  ;;  %v2097_v44 = vpack.c.bf16 %v232_v39, %v231_v38  ;;  %v234_v47 = vld [vmem:[%s2047_s6 + $0x81] sm:$0xff]  ;;  %v1569_v48 = vld [vmem:[%s2047_s6 + $0x90] sm:$0xff]  ;;  %v1570_v49 = vld [vmem:[%s2047_s6 + $0x98] sm:$0xff] }
  0x19   : > { %v235_v50 = vld [vmem:[%s2047_s6 + $0x91] sm:$0xff]  ;;  %v236_v51 = vld [vmem:[%s2047_s6 + $0x99] sm:$0xff]  ;;  %v1571_v52 = vld [vmem:[%s2047_s6 + $0xa8] sm:$0xff]  ;;  %v2117_v54 = vpack.c.bf16 %v234_v47, %v233_v46  ;;  %v2119_v55 = vpack.c.bf16 %v1570_v49, %v1569_v48 }
  0x1a   : > { %v1572_v53 = vld [vmem:[%s2047_s6 + $0xb0] sm:$0xff]  ;;  %v2121_v56 = vpack.c.bf16 %v236_v51, %v235_v50  ;;  %v1573_v60 = vld [vmem:[%s2047_s6 + $0xc0] sm:$0xff]  ;;  %v1574_v61 = vld [vmem:[%s2047_s6 + $0xc8] sm:$0xff] }
  0x1b   : > { %v2123_v57 = vpack.c.bf16 %v1572_v53, %v1571_v52  ;;  %v237_v58 = vld [vmem:[%s2047_s6 + $0xa9] sm:$0xff]  ;;  %v238_v59 = vld [vmem:[%s2047_s6 + $0xb1] sm:$0xff]  ;;  %v239_v62 = vld [vmem:[%s2047_s6 + $0xc1] sm:$0xff]  ;;  %v2143_v3 = vpack.c.bf16 %v1574_v61, %v1573_v60 }
  0x1c   : > { %v240_v63 = vld [vmem:[%s2047_s6 + $0xc9] sm:$0xff]  ;;  %v1575_v0 = vld [vmem:[%s2047_s6 + $0xd8] sm:$0xff]  ;;  %v1576_v1 = vld [vmem:[%s2047_s6 + $0xe0] sm:$0xff]  ;;  %v2141_v2 = vpack.c.bf16 %v238_v59, %v237_v58 }
  0x1d   : > { %v2145_v4 = vpack.c.bf16 %v240_v63, %v239_v62  ;;  %v2147_v5 = vpack.c.bf16 %v1576_v1, %v1575_v0  ;;  %v241_v6 = vld [vmem:[%s2047_s6 + $0xd9] sm:$0xff]  ;;  %v242_v7 = vld [vmem:[%s2047_s6 + $0xe1] sm:$0xff]  ;;  %v1577_v8 = vld [vmem:[%s2047_s6 + $0xf0] sm:$0xff] }
  0x1e   : > { %1738 = vmatmul.mubr.msk.bf16.gmra.mrb[4].mxu1 %vm275_vm1, %v2093_v42  ;;  %1806 = vmatmul.mubr.msk.bf16.gmra.mrb[4].mxu0 %vm275_vm1, %v2095_v43  ;;  %v1578_v9 = vld [vmem:[%s2047_s6 + $0xf8] sm:$0xff]  ;;  %v1579_v12 = vld [vmem:[%s2047_s6 + $0x108] sm:$0xff]  ;;  %v1580_v13 = vld [vmem:[%s2047_s6 + $0x110] sm:$0xff]  ;;  %v2165_v14 = vpack.c.bf16 %v242_v7, %v241_v6 }
  0x1f   : > { %1741 = vmatprep.mubr.msk.bf16.mxu1 %vm275_vm1, %v2097_v44  ;;  %1809 = vmatprep.mubr.msk.bf16.mxu0 %vm275_vm1, %v2099_v45  ;;  %v243_v10 = vld [vmem:[%s2047_s6 + $0xf1] sm:$0xff]  ;;  %v244_v11 = vld [vmem:[%s2047_s6 + $0xf9] sm:$0xff]  ;;  %v2167_v15 = vpack.c.bf16 %v1578_v9, %v1577_v8  ;;  %v2171_v17 = vpack.c.bf16 %v1580_v13, %v1579_v12  ;;  %v245_v18 = vld [vmem:[%s2047_s6 + $0x109] sm:$0xff] }
  0x20   : > { %v2169_v16 = vpack.c.bf16 %v244_v11, %v243_v10  ;;  %v246_v19 = vld [vmem:[%s2047_s6 + $0x111] sm:$0xff]  ;;  %v1581_v20 = vld [vmem:[%s2047_s6 + $0x120] sm:$0xff]  ;;  %v1582_v23 = vld [vmem:[%s2047_s6 + $0x128] sm:$0xff] }
  0x21   : > { %v247_v24 = vld [vmem:[%s2047_s6 + $0x121] sm:$0xff]  ;;  %v248_v25 = vld [vmem:[%s2047_s6 + $0x129] sm:$0xff]  ;;  %v1583_v26 = vld [vmem:[%s2047_s6 + $0x138] sm:$0xff]  ;;  %v266_v29 = vpack.c.bf16 %v246_v19, %v245_v18  ;;  %v745_v30 = vpack.c.bf16 %v1582_v23, %v1581_v20 }
  0x22   : > { %v1584_v28 = vld [vmem:[%s2047_s6 + $0x140] sm:$0xff]  ;;  %v267_v31 = vpack.c.bf16 %v248_v25, %v247_v24  ;;  %v1585_v37 = vld [vmem:[%s2047_s6 + $0x150] sm:$0xff]  ;;  %v1586_v38 = vld [vmem:[%s2047_s6 + $0x158] sm:$0xff] }
  0x23   : > { %v746_v34 = vpack.c.bf16 %v1584_v28, %v1583_v26  ;;  %v249_v35 = vld [vmem:[%s2047_s6 + $0x139] sm:$0xff]  ;;  %v250_v36 = vld [vmem:[%s2047_s6 + $0x141] sm:$0xff]  ;;  %v251_v39 = vld [vmem:[%s2047_s6 + $0x151] sm:$0xff]  ;;  %v747_v48 = vpack.c.bf16 %v1586_v38, %v1585_v37 }
  0x24   : > { %v252_v40 = vld [vmem:[%s2047_s6 + $0x159] sm:$0xff]  ;;  %v1587_v41 = vld [vmem:[%s2047_s6 + $0x168] sm:$0xff]  ;;  %v1588_v46 = vld [vmem:[%s2047_s6 + $0x170] sm:$0xff]  ;;  %v268_v47 = vpack.c.bf16 %v250_v36, %v249_v35 }
  0x25   : > { %v269_v49 = vpack.c.bf16 %v252_v40, %v251_v39  ;;  %v748_v50 = vpack.c.bf16 %v1588_v46, %v1587_v41  ;;  %v253_v51 = vld [vmem:[%s2047_s6 + $0x169] sm:$0xff]  ;;  %v254_v52 = vld [vmem:[%s2047_s6 + $0x171] sm:$0xff]  ;;  %v1589_v53 = vld [vmem:[%s2047_s6 + $0x180] sm:$0xff] }
  0x26   : > { %1742 = vmatmul.mubr.msk.bf16.gmra.mrb[8].mxu1 %vm275_vm1, %v2117_v54  ;;  %1810 = vmatmul.mubr.msk.bf16.gmra.mrb[8].mxu0 %vm275_vm1, %v2119_v55  ;;  %v1590_v58 = vld [vmem:[%s2047_s6 + $0x188] sm:$0xff]  ;;  %v172_v59 = vld [vmem:[%s2047_s6] sm:$0xff]  ;;  %v270_v61 = vpack.c.bf16 %v254_v52, %v253_v51 }
  0x27   : > { %1745 = vmatprep.mubr.msk.bf16.mxu1 %vm275_vm1, %v2121_v56  ;;  %1813 = vmatprep.mubr.msk.bf16.mxu0 %vm275_vm1, %v2123_v57  ;;  %v173_v60 = vld [vmem:[%s2047_s6 + $0x8] sm:$0xff]  ;;  %v749_v62 = vpack.c.bf16 %v1590_v58, %v1589_v53 }
  0x28   : > { %v204_v63 = vpack.c.bf16 %v173_v60, %v172_v59 }
  0x2e   : > { %1746 = vmatmul.mubr.msk.bf16.gmra.mrb[12].mxu1 %vm275_vm1, %v2141_v2  ;;  %1814 = vmatmul.mubr.msk.bf16.gmra.mrb[12].mxu0 %vm275_vm1, %v2143_v3 }
  0x2f   : > { %1749 = vmatprep.mubr.msk.bf16.mxu1 %vm275_vm1, %v2145_v4  ;;  %1817 = vmatprep.mubr.msk.bf16.mxu0 %vm275_vm1, %v2147_v5 }
  0x36   : > { %1750 = vmatmul.mubr.msk.bf16.gmra.mrb[16].mxu1 %vm275_vm1, %v2165_v14  ;;  %1818 = vmatmul.mubr.msk.bf16.gmra.mrb[16].mxu0 %vm275_vm1, %v2167_v15 }
  0x37   : > { %1753 = vmatprep.mubr.msk.bf16.mxu1 %vm275_vm1, %v2169_v16  ;;  %1821 = vmatprep.mubr.msk.bf16.mxu0 %vm275_vm1, %v2171_v17 }
  0x3e   : > { %1754 = vmatmul.mubr.msk.bf16.gmra.mrb[20].mxu1 %vm275_vm1, %v266_v29  ;;  %1822 = vmatmul.mubr.msk.bf16.gmra.mrb[20].mxu0 %vm275_vm1, %v745_v30 }
  0x3f   : > { %1757 = vmatprep.mubr.msk.bf16.mxu1 %vm275_vm1, %v267_v31  ;;  %1825 = vmatprep.mubr.msk.bf16.mxu0 %vm275_vm1, %v746_v34 }
  0x46   : > { %1758 = vmatmul.mubr.msk.bf16.gmra.mrb[24].mxu1 %vm275_vm1, %v268_v47  ;;  %1826 = vmatmul.mubr.msk.bf16.gmra.mrb[24].mxu0 %vm275_vm1, %v747_v48 }
  0x47   : > { %1761 = vmatprep.mubr.msk.bf16.mxu1 %vm275_vm1, %v269_v49  ;;  %1829 = vmatprep.mubr.msk.bf16.mxu0 %vm275_vm1, %v748_v50 }
  0x4e   : > { %1762 = vmatmul.mubr.msk.bf16.gmra.mrb[28].mxu1 %vm275_vm1, %v270_v61  ;;  %1830 = vmatmul.mubr.msk.bf16.gmra.mrb[28].mxu0 %vm275_vm1, %v749_v62 }
  0x4f   : > { %1767 = vmatprep.mubr.msk.bf16.mxu1 %vm275_vm1, %v204_v63  ;;  %1835 = vmatprep.mubr.msk.bf16.mxu0 %vm275_vm1, %v2058_v22  ;;  %v1640_v22 = vld [vmem:[%s2047_s6 + $0x189] sm:$0xff] }
  0x56   : > { %1768 = vmatmul.mubr.msk.bf16.vlgmr.msra.gmra.mrb[0].mxu1 %vm275_vm1, %v2056_v21  ;;  %1836 = vmatmul.mubr.msk.bf16.vlgmr.msra.gmra.mrb[0].mxu0 %vm275_vm1, %v2075_v32  ;;  %v1639_v21 = vld [vmem:[%s2047_s6 + $0x181] sm:$0xff] }
  0x57   : > { %1771 = vmatprep.mubr.msk.bf16.mxu1 %vm275_vm1, %v2065_v27  ;;  %1839 = vmatprep.mubr.msk.bf16.mxu0 %vm275_vm1, %v2093_v42  ;;  %v1045_v27 = vpack.c.bf16 %v1640_v22, %v1639_v21  ;;  %v2271_v42 = vld [vmem:[%s2380_s2] ss:$0 sm:$0xff] }
  0x5e   : > { %1772 = vmatmul.mubr.msk.bf16.gmra.mrb[4].mxu1 %vm275_vm1, %v2077_v33  ;;  %1840 = vmatmul.mubr.msk.bf16.gmra.mrb[4].mxu0 %vm275_vm1, %v2097_v44 }
  0x5f   : > { %1775 = vmatprep.mubr.msk.bf16.mxu1 %vm275_vm1, %v2095_v43  ;;  %1843 = vmatprep.mubr.msk.bf16.mxu0 %vm275_vm1, %v2117_v54 }
  0x66   : > { %1776 = vmatmul.mubr.msk.bf16.gmra.mrb[8].mxu1 %vm275_vm1, %v2099_v45  ;;  %1844 = vmatmul.mubr.msk.bf16.gmra.mrb[8].mxu0 %vm275_vm1, %v2121_v56 }
  0x67   : > { %1779 = vmatprep.mubr.msk.bf16.mxu1 %vm275_vm1, %v2119_v55  ;;  %1847 = vmatprep.mubr.msk.bf16.mxu0 %vm275_vm1, %v2141_v2 }
  0x6e   : > { %1780 = vmatmul.mubr.msk.bf16.gmra.mrb[12].mxu1 %vm275_vm1, %v2123_v57  ;;  %1848 = vmatmul.mubr.msk.bf16.gmra.mrb[12].mxu0 %vm275_vm1, %v2145_v4 }
  0x6f   : > { %1783 = vmatprep.mubr.msk.bf16.mxu1 %vm275_vm1, %v2143_v3  ;;  %1851 = vmatprep.mubr.msk.bf16.mxu0 %vm275_vm1, %v2165_v14 }
  0x76   : > { %1784 = vmatmul.mubr.msk.bf16.gmra.mrb[16].mxu1 %vm275_vm1, %v2147_v5  ;;  %1852 = vmatmul.mubr.msk.bf16.gmra.mrb[16].mxu0 %vm275_vm1, %v2169_v16 }
  0x77   : > { %1787 = vmatprep.mubr.msk.bf16.mxu1 %vm275_vm1, %v2167_v15  ;;  %1855 = vmatprep.mubr.msk.bf16.mxu0 %vm275_vm1, %v266_v29 }
  0x7e   : > { %1788 = vmatmul.mubr.msk.bf16.gmra.mrb[20].mxu1 %vm275_vm1, %v2171_v17  ;;  %1856 = vmatmul.mubr.msk.bf16.gmra.mrb[20].mxu0 %vm275_vm1, %v267_v31 }
  0x7f   : > { %1791 = vmatprep.mubr.msk.bf16.mxu1 %vm275_vm1, %v745_v30  ;;  %1859 = vmatprep.mubr.msk.bf16.mxu0 %vm275_vm1, %v268_v47 }
  0x86   : > { %1792 = vmatmul.mubr.msk.bf16.gmra.mrb[24].mxu1 %vm275_vm1, %v746_v34  ;;  %1860 = vmatmul.mubr.msk.bf16.gmra.mrb[24].mxu0 %vm275_vm1, %v269_v49 }
  0x87   : > { %1795 = vmatprep.mubr.msk.bf16.mxu1 %vm275_vm1, %v747_v48  ;;  %1863 = vmatprep.mubr.msk.bf16.mxu0 %vm275_vm1, %v270_v61 }
  0x8e   : > { %1796 = vmatmul.mubr.msk.bf16.gmra.mrb[28].mxu1 %vm275_vm1, %v748_v50  ;;  %1864 = vmatmul.mubr.msk.bf16.gmra.mrb[28].mxu0 %vm275_vm1, %v1045_v27 }
 0x129   : > { %v1769_v32 = vpop.f32.mrb[0].mxu1  ;;  %v1837_v33 = vpop.f32.mrb[0].mxu0 }
 0x12a   : > { %v574_v43 = vpop.f32.mrb[1].mxu1  ;;  %v1867_v44 = vadd.f32 %v1837_v33, %v1769_v32  ;;  %v1135_v45 = vpop.f32.mrb[1].mxu0 }
 0x12b   : > { %v1770_v54 = vpop.f32.mrb[2].mxu1  ;;  %v1868_v55 = vadd.f32 %v1135_v45, %v574_v43  ;;  %v1838_v56 = vpop.f32.mrb[2].mxu0 }
 0x12c   : > { %v577_v57 = vpop.f32.mrb[3].mxu1  ;;  %v1303_v0 = vadd.f32 %v1867_v44, %v2271_v42  ;;  %v1869_v1 = vadd.f32 %v1838_v56, %v1770_v54  ;;  %v1138_v2 = vpop.f32.mrb[3].mxu0 }
 0x12d   : > { %v1301_v3 = vadd.f32 %v1868_v55, %v2271_v42  ;;  %v1870_v4 = vadd.f32 %v1138_v2, %v577_v57 }
 0x12e   : > { %vm1335_vm2 = vcmp.ge.f32.partialorder %v1303_v0, 0.0  ;;  %v1367_v5 = vmul.f32 0.01, %v1303_v0  ;;  %v1304_v6 = vadd.f32 %v1869_v1, %v2271_v42 }
 0x12f   : > { %vm1333_vm4 = vcmp.ge.f32.partialorder %v1301_v3, 0.0  ;;  %v1365_v7 = vmul.f32 0.01, %v1301_v3  ;;  %v1302_v8 = vadd.f32 %v1870_v4, %v2271_v42 }
 0x130   : > { %v1399_v9 = vsel %vm1335_vm2, %v1303_v0, %v1367_v5  ;;  %vm1336_vm5 = vcmp.ge.f32.partialorder %v1304_v6, 0.0  ;;  %v1368_v10 = vmul.f32 0.01, %v1304_v6 }
 0x131   : > { %v1773_v11 = vpop.f32.mrb[4].mxu1  ;;  %1432 = vst.msk [vmem:[%s2279_s14 + $0x10] sm:$0xff] %vm1429_vm3, %v1399_v9  ;;  %v1397_v12 = vsel %vm1333_vm4, %v1301_v3, %v1365_v7  ;;  %vm1334_vm6 = vcmp.ge.f32.partialorder %v1302_v8, 0.0  ;;  %v1366_v13 = vmul.f32 0.01, %v1302_v8  ;;  %v1841_v14 = vpop.f32.mrb[4].mxu0 }
 0x132   : > { %v590_v15 = vpop.f32.mrb[5].mxu1  ;;  %1430 = vst.msk [vmem:[%s2279_s14] sm:$0xff] %vm1429_vm3, %v1397_v12  ;;  %v1400_v16 = vsel %vm1336_vm5, %v1304_v6, %v1368_v10  ;;  %v1871_v17 = vadd.f32 %v1841_v14, %v1773_v11  ;;  %v1151_v18 = vpop.f32.mrb[5].mxu0 }
 0x133   : > { %v1774_v19 = vpop.f32.mrb[6].mxu1  ;;  %1433 = vst.msk [vmem:[%s2279_s14 + $0x18] sm:$0xff] %vm1429_vm3, %v1400_v16  ;;  %v1398_v20 = vsel %vm1334_vm6, %v1302_v8, %v1366_v13  ;;  %v1872_v23 = vadd.f32 %v1151_v18, %v590_v15  ;;  %v1842_v24 = vpop.f32.mrb[6].mxu0 }
 0x134   : > { %v593_v25 = vpop.f32.mrb[7].mxu1  ;;  %1431 = vst.msk [vmem:[%s2279_s14 + $0x8] sm:$0xff] %vm1429_vm3, %v1398_v20  ;;  %v1307_v26 = vadd.f32 %v1871_v17, %v2271_v42  ;;  %v1873_v28 = vadd.f32 %v1842_v24, %v1774_v19  ;;  %v1154_v29 = vpop.f32.mrb[7].mxu0 }
 0x135   : > { %v1305_v30 = vadd.f32 %v1872_v23, %v2271_v42  ;;  %v1874_v31 = vadd.f32 %v1154_v29, %v593_v25 }
 0x136   : > { %vm1339_vm7 = vcmp.ge.f32.partialorder %v1307_v26, 0.0  ;;  %v1371_v34 = vmul.f32 0.01, %v1307_v26  ;;  %v1308_v35 = vadd.f32 %v1873_v28, %v2271_v42 }
 0x137   : > { %vm1337_vm8 = vcmp.ge.f32.partialorder %v1305_v30, 0.0  ;;  %v1369_v36 = vmul.f32 0.01, %v1305_v30  ;;  %v1306_v37 = vadd.f32 %v1874_v31, %v2271_v42 }
 0x138   : > { %v1403_v38 = vsel %vm1339_vm7, %v1307_v26, %v1371_v34  ;;  %vm1340_vm9 = vcmp.ge.f32.partialorder %v1308_v35, 0.0  ;;  %v1372_v39 = vmul.f32 0.01, %v1308_v35 }
 0x139   : > { %v1777_v40 = vpop.f32.mrb[8].mxu1  ;;  %1436 = vst.msk [vmem:[%s2279_s14 + $0x30] sm:$0xff] %vm1429_vm3, %v1403_v38  ;;  %v1401_v41 = vsel %vm1337_vm8, %v1305_v30, %v1369_v36  ;;  %vm1338_vm10 = vcmp.ge.f32.partialorder %v1306_v37, 0.0  ;;  %v1370_v46 = vmul.f32 0.01, %v1306_v37  ;;  %v1845_v47 = vpop.f32.mrb[8].mxu0 }
 0x13a   : > { %v606_v48 = vpop.f32.mrb[9].mxu1  ;;  %1434 = vst.msk [vmem:[%s2279_s14 + $0x20] sm:$0xff] %vm1429_vm3, %v1401_v41  ;;  %v1404_v49 = vsel %vm1340_vm9, %v1308_v35, %v1372_v39  ;;  %v1875_v50 = vadd.f32 %v1845_v47, %v1777_v40  ;;  %v1167_v51 = vpop.f32.mrb[9].mxu0 }
 0x13b   : > { %v1778_v52 = vpop.f32.mrb[10].mxu1  ;;  %1437 = vst.msk [vmem:[%s2279_s14 + $0x38] sm:$0xff] %vm1429_vm3, %v1404_v49  ;;  %v1402_v53 = vsel %vm1338_vm10, %v1306_v37, %v1370_v46  ;;  %v1876_v58 = vadd.f32 %v1167_v51, %v606_v48  ;;  %v1846_v59 = vpop.f32.mrb[10].mxu0 }
 0x13c   : > { %v609_v60 = vpop.f32.mrb[11].mxu1  ;;  %1435 = vst.msk [vmem:[%s2279_s14 + $0x28] sm:$0xff] %vm1429_vm3, %v1402_v53  ;;  %v1311_v61 = vadd.f32 %v1875_v50, %v2271_v42  ;;  %v1877_v62 = vadd.f32 %v1846_v59, %v1778_v52  ;;  %v1170_v63 = vpop.f32.mrb[11].mxu0 }
 0x13d   : > { %v1309_v21 = vadd.f32 %v1876_v58, %v2271_v42  ;;  %v1878_v22 = vadd.f32 %v1170_v63, %v609_v60 }
 0x13e   : > { %vm1343_vm11 = vcmp.ge.f32.partialorder %v1311_v61, 0.0  ;;  %v1375_v27 = vmul.f32 0.01, %v1311_v61  ;;  %v1312_v32 = vadd.f32 %v1877_v62, %v2271_v42 }
 0x13f   : > { %vm1341_vm12 = vcmp.ge.f32.partialorder %v1309_v21, 0.0  ;;  %v1373_v33 = vmul.f32 0.01, %v1309_v21  ;;  %v1310_v43 = vadd.f32 %v1878_v22, %v2271_v42 }
 0x140   : > { %v1407_v44 = vsel %vm1343_vm11, %v1311_v61, %v1375_v27  ;;  %vm1344_vm13 = vcmp.ge.f32.partialorder %v1312_v32, 0.0  ;;  %v1376_v45 = vmul.f32 0.01, %v1312_v32 }
 0x141   : > { %v1781_v54 = vpop.f32.mrb[12].mxu1  ;;  %1440 = vst.msk [vmem:[%s2279_s14 + $0x50] sm:$0xff] %vm1429_vm3, %v1407_v44  ;;  %v1405_v55 = vsel %vm1341_vm12, %v1309_v21, %v1373_v33  ;;  %vm1342_vm14 = vcmp.ge.f32.partialorder %v1310_v43, 0.0  ;;  %v1374_v56 = vmul.f32 0.01, %v1310_v43  ;;  %v1849_v57 = vpop.f32.mrb[12].mxu0 }
 0x142   : > { %v622_v0 = vpop.f32.mrb[13].mxu1  ;;  %1438 = vst.msk [vmem:[%s2279_s14 + $0x40] sm:$0xff] %vm1429_vm3, %v1405_v55  ;;  %v1408_v1 = vsel %vm1344_vm13, %v1312_v32, %v1376_v45  ;;  %v1879_v2 = vadd.f32 %v1849_v57, %v1781_v54  ;;  %v1183_v3 = vpop.f32.mrb[13].mxu0 }
 0x143   : > { %v1782_v4 = vpop.f32.mrb[14].mxu1  ;;  %1441 = vst.msk [vmem:[%s2279_s14 + $0x58] sm:$0xff] %vm1429_vm3, %v1408_v1  ;;  %v1406_v5 = vsel %vm1342_vm14, %v1310_v43, %v1374_v56  ;;  %v1880_v6 = vadd.f32 %v1183_v3, %v622_v0  ;;  %v1850_v7 = vpop.f32.mrb[14].mxu0 }
 0x144   : > { %v625_v8 = vpop.f32.mrb[15].mxu1  ;;  %1439 = vst.msk [vmem:[%s2279_s14 + $0x48] sm:$0xff] %vm1429_vm3, %v1406_v5  ;;  %v1315_v9 = vadd.f32 %v1879_v2, %v2271_v42  ;;  %v1881_v10 = vadd.f32 %v1850_v7, %v1782_v4  ;;  %v1186_v11 = vpop.f32.mrb[15].mxu0 }
 0x145   : > { %v1313_v12 = vadd.f32 %v1880_v6, %v2271_v42  ;;  %v1882_v13 = vadd.f32 %v1186_v11, %v625_v8 }
 0x146   : > { %vm1347_vm15 = vcmp.ge.f32.partialorder %v1315_v9, 0.0  ;;  %v1379_v14 = vmul.f32 0.01, %v1315_v9  ;;  %v1316_v15 = vadd.f32 %v1881_v10, %v2271_v42 }
 0x147   : > { %vm1345_vm0 = vcmp.ge.f32.partialorder %v1313_v12, 0.0  ;;  %v1377_v16 = vmul.f32 0.01, %v1313_v12  ;;  %v1314_v17 = vadd.f32 %v1882_v13, %v2271_v42 }
 0x148   : > { %v1411_v18 = vsel %vm1347_vm15, %v1315_v9, %v1379_v14  ;;  %vm1348_vm1 = vcmp.ge.f32.partialorder %v1316_v15, 0.0  ;;  %v1380_v19 = vmul.f32 0.01, %v1316_v15 }
 0x149   : > { %v1785_v20 = vpop.f32.mrb[16].mxu1  ;;  %1444 = vst.msk [vmem:[%s2279_s14 + $0x70] sm:$0xff] %vm1429_vm3, %v1411_v18  ;;  %v1409_v23 = vsel %vm1345_vm0, %v1313_v12, %v1377_v16  ;;  %vm1346_vm2 = vcmp.ge.f32.partialorder %v1314_v17, 0.0  ;;  %v1378_v24 = vmul.f32 0.01, %v1314_v17  ;;  %v1853_v25 = vpop.f32.mrb[16].mxu0 }
 0x14a   : > { %v638_v26 = vpop.f32.mrb[17].mxu1  ;;  %1442 = vst.msk [vmem:[%s2279_s14 + $0x60] sm:$0xff] %vm1429_vm3, %v1409_v23  ;;  %v1412_v28 = vsel %vm1348_vm1, %v1316_v15, %v1380_v19  ;;  %v1883_v29 = vadd.f32 %v1853_v25, %v1785_v20  ;;  %v1199_v30 = vpop.f32.mrb[17].mxu0 }
 0x14b   : > { %v1786_v31 = vpop.f32.mrb[18].mxu1  ;;  %1445 = vst.msk [vmem:[%s2279_s14 + $0x78] sm:$0xff] %vm1429_vm3, %v1412_v28  ;;  %v1410_v34 = vsel %vm1346_vm2, %v1314_v17, %v1378_v24  ;;  %v1884_v35 = vadd.f32 %v1199_v30, %v638_v26  ;;  %v1854_v36 = vpop.f32.mrb[18].mxu0 }
 0x14c   : > { %v641_v37 = vpop.f32.mrb[19].mxu1  ;;  %1443 = vst.msk [vmem:[%s2279_s14 + $0x68] sm:$0xff] %vm1429_vm3, %v1410_v34  ;;  %v1319_v38 = vadd.f32 %v1883_v29, %v2271_v42  ;;  %v1885_v39 = vadd.f32 %v1854_v36, %v1786_v31  ;;  %v1202_v40 = vpop.f32.mrb[19].mxu0 }
 0x14d   : > { %v1317_v41 = vadd.f32 %v1884_v35, %v2271_v42  ;;  %v1886_v46 = vadd.f32 %v1202_v40, %v641_v37 }
 0x14e   : > { %vm1351_vm4 = vcmp.ge.f32.partialorder %v1319_v38, 0.0  ;;  %v1383_v47 = vmul.f32 0.01, %v1319_v38  ;;  %v1320_v48 = vadd.f32 %v1885_v39, %v2271_v42 }
 0x14f   : > { %vm1349_vm5 = vcmp.ge.f32.partialorder %v1317_v41, 0.0  ;;  %v1381_v49 = vmul.f32 0.01, %v1317_v41  ;;  %v1318_v50 = vadd.f32 %v1886_v46, %v2271_v42 }
 0x150   : > { %v1415_v51 = vsel %vm1351_vm4, %v1319_v38, %v1383_v47  ;;  %vm1352_vm6 = vcmp.ge.f32.partialorder %v1320_v48, 0.0  ;;  %v1384_v52 = vmul.f32 0.01, %v1320_v48 }
 0x151   : > { %v1789_v53 = vpop.f32.mrb[20].mxu1  ;;  %1448 = vst.msk [vmem:[%s2279_s14 + $0x90] sm:$0xff] %vm1429_vm3, %v1415_v51  ;;  %v1413_v58 = vsel %vm1349_vm5, %v1317_v41, %v1381_v49  ;;  %vm1350_vm7 = vcmp.ge.f32.partialorder %v1318_v50, 0.0  ;;  %v1382_v59 = vmul.f32 0.01, %v1318_v50  ;;  %v1857_v60 = vpop.f32.mrb[20].mxu0 }
 0x152   : > { %v654_v61 = vpop.f32.mrb[21].mxu1  ;;  %1446 = vst.msk [vmem:[%s2279_s14 + $0x80] sm:$0xff] %vm1429_vm3, %v1413_v58  ;;  %v1416_v62 = vsel %vm1352_vm6, %v1320_v48, %v1384_v52  ;;  %v1887_v63 = vadd.f32 %v1857_v60, %v1789_v53  ;;  %v1215_v21 = vpop.f32.mrb[21].mxu0 }
 0x153   : > { %v1790_v22 = vpop.f32.mrb[22].mxu1  ;;  %1449 = vst.msk [vmem:[%s2279_s14 + $0x98] sm:$0xff] %vm1429_vm3, %v1416_v62  ;;  %v1414_v27 = vsel %vm1350_vm7, %v1318_v50, %v1382_v59  ;;  %v1888_v32 = vadd.f32 %v1215_v21, %v654_v61  ;;  %v1858_v33 = vpop.f32.mrb[22].mxu0 }
 0x154   : > { %v657_v43 = vpop.f32.mrb[23].mxu1  ;;  %1447 = vst.msk [vmem:[%s2279_s14 + $0x88] sm:$0xff] %vm1429_vm3, %v1414_v27  ;;  %v1323_v44 = vadd.f32 %v1887_v63, %v2271_v42  ;;  %v1889_v45 = vadd.f32 %v1858_v33, %v1790_v22  ;;  %v1218_v54 = vpop.f32.mrb[23].mxu0 }
 0x155   : > { %v1321_v55 = vadd.f32 %v1888_v32, %v2271_v42  ;;  %v1890_v56 = vadd.f32 %v1218_v54, %v657_v43 }
 0x156   : > { %vm1355_vm8 = vcmp.ge.f32.partialorder %v1323_v44, 0.0  ;;  %v1387_v57 = vmul.f32 0.01, %v1323_v44  ;;  %v1324_v0 = vadd.f32 %v1889_v45, %v2271_v42 }
 0x157   : > { %vm1353_vm9 = vcmp.ge.f32.partialorder %v1321_v55, 0.0  ;;  %v1385_v1 = vmul.f32 0.01, %v1321_v55  ;;  %v1322_v2 = vadd.f32 %v1890_v56, %v2271_v42 }
 0x158   : > { %v1419_v3 = vsel %vm1355_vm8, %v1323_v44, %v1387_v57  ;;  %vm1356_vm10 = vcmp.ge.f32.partialorder %v1324_v0, 0.0  ;;  %v1388_v4 = vmul.f32 0.01, %v1324_v0 }
 0x159   : > { %v1793_v5 = vpop.f32.mrb[24].mxu1  ;;  %1452 = vst.msk [vmem:[%s2279_s14 + $0xb0] sm:$0xff] %vm1429_vm3, %v1419_v3  ;;  %v1417_v6 = vsel %vm1353_vm9, %v1321_v55, %v1385_v1  ;;  %vm1354_vm11 = vcmp.ge.f32.partialorder %v1322_v2, 0.0  ;;  %v1386_v7 = vmul.f32 0.01, %v1322_v2  ;;  %v1861_v8 = vpop.f32.mrb[24].mxu0 }
 0x15a   : > { %v670_v9 = vpop.f32.mrb[25].mxu1  ;;  %1450 = vst.msk [vmem:[%s2279_s14 + $0xa0] sm:$0xff] %vm1429_vm3, %v1417_v6  ;;  %v1420_v10 = vsel %vm1356_vm10, %v1324_v0, %v1388_v4  ;;  %v1891_v11 = vadd.f32 %v1861_v8, %v1793_v5  ;;  %v1231_v12 = vpop.f32.mrb[25].mxu0 }
 0x15b   : > { %v1794_v13 = vpop.f32.mrb[26].mxu1  ;;  %1453 = vst.msk [vmem:[%s2279_s14 + $0xb8] sm:$0xff] %vm1429_vm3, %v1420_v10  ;;  %v1418_v14 = vsel %vm1354_vm11, %v1322_v2, %v1386_v7  ;;  %v1892_v15 = vadd.f32 %v1231_v12, %v670_v9  ;;  %v1862_v16 = vpop.f32.mrb[26].mxu0 }
 0x15c   : > { %v673_v17 = vpop.f32.mrb[27].mxu1  ;;  %1451 = vst.msk [vmem:[%s2279_s14 + $0xa8] sm:$0xff] %vm1429_vm3, %v1418_v14  ;;  %v1327_v18 = vadd.f32 %v1891_v11, %v2271_v42  ;;  %v1893_v19 = vadd.f32 %v1862_v16, %v1794_v13  ;;  %v1234_v20 = vpop.f32.mrb[27].mxu0 }
 0x15d   : > { %v1325_v23 = vadd.f32 %v1892_v15, %v2271_v42  ;;  %v1894_v24 = vadd.f32 %v1234_v20, %v673_v17 }
 0x15e   : > { %vm1359_vm12 = vcmp.ge.f32.partialorder %v1327_v18, 0.0  ;;  %v1391_v25 = vmul.f32 0.01, %v1327_v18  ;;  %v1328_v26 = vadd.f32 %v1893_v19, %v2271_v42 }
 0x15f   : > { %vm1357_vm13 = vcmp.ge.f32.partialorder %v1325_v23, 0.0  ;;  %v1389_v28 = vmul.f32 0.01, %v1325_v23  ;;  %v1326_v29 = vadd.f32 %v1894_v24, %v2271_v42 }
 0x160   : > { %v1423_v30 = vsel %vm1359_vm12, %v1327_v18, %v1391_v25  ;;  %vm1360_vm14 = vcmp.ge.f32.partialorder %v1328_v26, 0.0  ;;  %v1392_v31 = vmul.f32 0.01, %v1328_v26 }
 0x161   : > { %v1797_v34 = vpop.f32.mrb[28].mxu1  ;;  %1456 = vst.msk [vmem:[%s2279_s14 + $0xd0] sm:$0xff] %vm1429_vm3, %v1423_v30  ;;  %v1421_v35 = vsel %vm1357_vm13, %v1325_v23, %v1389_v28  ;;  %vm1358_vm15 = vcmp.ge.f32.partialorder %v1326_v29, 0.0  ;;  %v1390_v36 = vmul.f32 0.01, %v1326_v29  ;;  %v1865_v37 = vpop.f32.mrb[28].mxu0 }
 0x162   : > { %v686_v38 = vpop.f32.mrb[29].mxu1  ;;  %1454 = vst.msk [vmem:[%s2279_s14 + $0xc0] sm:$0xff] %vm1429_vm3, %v1421_v35  ;;  %v1424_v39 = vsel %vm1360_vm14, %v1328_v26, %v1392_v31  ;;  %v1895_v40 = vadd.f32 %v1865_v37, %v1797_v34  ;;  %v1247_v41 = vpop.f32.mrb[29].mxu0 }
 0x163   : > { %v1798_v46 = vpop.f32.mrb[30].mxu1  ;;  %1457 = vst.msk [vmem:[%s2279_s14 + $0xd8] sm:$0xff] %vm1429_vm3, %v1424_v39  ;;  %v1422_v47 = vsel %vm1358_vm15, %v1326_v29, %v1390_v36  ;;  %v1896_v48 = vadd.f32 %v1247_v41, %v686_v38  ;;  %v1866_v49 = vpop.f32.mrb[30].mxu0 }
 0x164   : > { %v689_v50 = vpop.f32.mrb[31].mxu1  ;;  %1455 = vst.msk [vmem:[%s2279_s14 + $0xc8] sm:$0xff] %vm1429_vm3, %v1422_v47  ;;  %v1331_v51 = vadd.f32 %v1895_v40, %v2271_v42  ;;  %v1897_v52 = vadd.f32 %v1866_v49, %v1798_v46  ;;  %v1250_v53 = vpop.f32.mrb[31].mxu0 }
 0x165   : > { %v1329_v58 = vadd.f32 %v1896_v48, %v2271_v42  ;;  %v1898_v59 = vadd.f32 %v1250_v53, %v689_v50 }
 0x166   : > { %vm1363_vm0 = vcmp.ge.f32.partialorder %v1331_v51, 0.0  ;;  %v1395_v60 = vmul.f32 0.01, %v1331_v51  ;;  %v1332_v61 = vadd.f32 %v1897_v52, %v2271_v42 }
 0x167   : > { %vm1361_vm1 = vcmp.ge.f32.partialorder %v1329_v58, 0.0  ;;  %v1393_v62 = vmul.f32 0.01, %v1329_v58  ;;  %v1330_v63 = vadd.f32 %v1898_v59, %v2271_v42 }
 0x168   : > { %v1427_v21 = vsel %vm1363_vm0, %v1331_v51, %v1395_v60  ;;  %vm1364_vm2 = vcmp.ge.f32.partialorder %v1332_v61, 0.0  ;;  %v1396_v22 = vmul.f32 0.01, %v1332_v61 }
 0x169   : > { %1460 = vst.msk [vmem:[%s2279_s14 + $0xf0] sm:$0xff] %vm1429_vm3, %v1427_v21  ;;  %v1425_v27 = vsel %vm1361_vm1, %v1329_v58, %v1393_v62  ;;  %vm1362_vm4 = vcmp.ge.f32.partialorder %v1330_v63, 0.0  ;;  %v1394_v32 = vmul.f32 0.01, %v1330_v63 }
 0x16a   : > { %1458 = vst.msk [vmem:[%s2279_s14 + $0xe0] sm:$0xff] %vm1429_vm3, %v1425_v27  ;;  %v1428_v33 = vsel %vm1364_vm2, %v1332_v61, %v1396_v22 }
 0x16b   : > { %1461 = vst.msk [vmem:[%s2279_s14 + $0xf8] sm:$0xff] %vm1429_vm3, %v1428_v33  ;;  %v1426_v43 = vsel %vm1362_vm4, %v1330_v63, %v1394_v32 }
 0x16c   : > { %1459 = vst.msk [vmem:[%s2279_s14 + $0xe8] sm:$0xff] %vm1429_vm3, %v1426_v43 }
 0x16d PF: > { %s13_s12 = sadd.s32 1, %s1982_s12  }
 0x16e   : > { %p10_p4 = scmp.ge.s32.totalorder %s13_s12, 4  }
 0x170   :  { %12 = sbr.rel (!%p10_p4) target bundleno = 1 (0x1), region = 66 }

// kernel: discriminator_forward.6
= control target key start
LH: loop header
LB: loop body
LE: loop exit
PB: predicated region body
PF: predicated region fallthrough
CT: control target
= control target key end

     0   :  { %s865_s12 = smov 0   ;;  %s991_s0 = inlined_call_operand.vmem [shape: f32[2,9,9,32], index: 0, kind: input, shape index: {}]   ;;  %s992_s1 = inlined_call_operand.vmem [shape: f32[4,32,16], index: 1, kind: input, shape index: {}]   ;;  %s993_s2 = inlined_call_operand.vmem [shape: f32[1,16], index: 2, kind: input, shape index: {}]   ;;  %s994_s3 = inlined_call_operand.vmem [shape: f32[2,8,8,16], index: 3, kind: output, shape index: {}]  }
   0x1 LB: > { %s676_s13 = sadd.s32 4294967295, %s843_s12   ;;  %p680_p0 = scmp.ge.s32.totalorder %s843_s12, 1  ;;  %s843_s12 = sphi %s865_s12, %s13_s12  }
   0x2   : > { %p137_p1 = scmp.lt.s32.totalorder %s843_s12, 3 }
   0x4   : > { %p138_p2 = pnand %p680_p0, %p137_p1 }
   0x5   : > { %v684_v0 = vld [vmem:[%s992_s1 + $0x20] sm:$0xff] (!%p138_p2)  ;;  %v685_v1 = vld [vmem:[%s992_s1 + $0x28] sm:$0xff] (!%p138_p2)  ;;  %p161_p3 = scmp.lt.s32.totalorder (!%p138_p2), %s676_s13, 1  ;;  %v686_v5 = vld [vmem:[%s992_s1 + $0x30] sm:$0xff] (!%p138_p2)  ;;  %vm209_vm0 = vcmask (!%p138_p2), 261120   ;;  %vm612_vm2 = vcmask (!%p138_p2), 130048  }
   0x6   : > { %141 = sbr.rel (%p138_p2) target bundleno = 270 (0x10e), region = 32  ;;  %v704_v2 = vld [vmem:[%s992_s1 + $0x40] sm:$0xff] (!%p138_p2)  ;;  %v207_v3 = vpack.c.bf16 (!%p138_p2), %v685_v1, %v684_v0  ;;  %v705_v4 = vld [vmem:[%s992_s1 + $0x48] sm:$0xff] (!%p138_p2)  ;;  %v687_v6 = vld [vmem:[%s992_s1 + $0x38] sm:$0xff] (!%p138_p2) }
   0x7   : > { %v382_v7 = vpack.c.bf16 (!%p138_p2), %v705_v4, %v704_v2  ;;  %v208_v8 = vpack.c.bf16 (!%p138_p2), %v687_v6, %v686_v5  ;;  %v706_v9 = vld [vmem:[%s992_s1 + $0x50] sm:$0xff] (!%p138_p2)  ;;  %v707_v10 = vld [vmem:[%s992_s1 + $0x58] sm:$0xff] (!%p138_p2)  ;;  %v184_v11 = vld [vmem:[%s992_s1] sm:$0xff] (!%p138_p2) }
   0x8   : > { %756 = vmatprep.subr.bf16.mxu1 (!%p138_p2), %v207_v3  ;;  %v383_v12 = vpack.c.bf16 (!%p138_p2), %v707_v10, %v706_v9  ;;  %v185_v13 = vld [vmem:[%s992_s1 + $0x8] sm:$0xff] (!%p138_p2)  ;;  %v720_v14 = vld [vmem:[%s992_s1 + $0x60] sm:$0xff] (!%p138_p2)  ;;  %v186_v17 = vld [vmem:[%s992_s1 + $0x10] sm:$0xff] (!%p138_p2) }
   0x9   : > { %v721_v15 = vld [vmem:[%s992_s1 + $0x68] sm:$0xff] (!%p138_p2)  ;;  %780 = vmatprep.subr.bf16.mxu0 (!%p138_p2), %v382_v7  ;;  %757 = vmatpush3.bf16.msra.mxu1 (!%p138_p2), %v207_v3  ;;  %v188_v16 = vpack.c.bf16 (!%p138_p2), %v185_v13, %v184_v11  ;;  %v187_v19 = vld [vmem:[%s992_s1 + $0x18] sm:$0xff] (!%p138_p2)  ;;  %v722_v20 = vld [vmem:[%s992_s1 + $0x70] sm:$0xff] (!%p138_p2) }
   0xa   : > { %781 = vmatpush3.bf16.msra.mxu0 (!%p138_p2), %v382_v7  ;;  %758 = vmatprep.subr.bf16.mxu1 (!%p138_p2), %v208_v8  ;;  %v486_v18 = vpack.c.bf16 (!%p138_p2), %v721_v15, %v720_v14  ;;  %v723_v21 = vld [vmem:[%s992_s1 + $0x78] sm:$0xff] (!%p138_p2)  ;;  %v189_v38 = vpack.c.bf16 (!%p138_p2), %v187_v19, %v186_v17  ;;  %v728_v60 = vld [vmem:[%s993_s2] ss:$0 sm:$0xff] (!%p138_p2) }
   0xb   : > { %782 = vmatprep.subr.bf16.mxu0 (!%p138_p2), %v383_v12  ;;  %v487_v41 = vpack.c.bf16 (!%p138_p2), %v723_v21, %v722_v20 }
   0xd   : > { %s996_s13 = smov (!%p161_p3, %s676_s13), 1  ;;  %759 = vmatpush3.bf16.msra.mxu1 %v208_v8 }
   0xe   : > { %s828_s11 = smul.u32 144, %s996_s13  ;;  %783 = vmatpush3.bf16.msra.mxu0 %v383_v12  ;;  %768 = vmatprep.subr.bf16.mxu1 %v188_v16  ;;  %s731_s27 = sshll.u32 %s996_s13, 6 }
   0xf   : > { %792 = vmatprep.subr.bf16.mxu0 %v486_v18  ;;  %s970_s30 = scalar_lea.vmem %s994_s3, %s731_s27 }
  0x10   : > { %s918_s18 = scalar_lea.vmem %s991_s0, %s828_s11 }
  0x11   : > { %v190_v22 = vld [vmem:[%s918_s18 + $0x1] sm:$0xff]  ;;  %v191_v23 = vld [vmem:[%s918_s18 + $0x11] sm:$0xff] }
  0x12   : > { %v696_v24 = vld [vmem:[%s918_s18 + $0x10] sm:$0xff]  ;;  %v198_v25 = vpack.c.bf16 %v191_v23, %v190_v22  ;;  %v697_v26 = vld [vmem:[%s918_s18 + $0x20] sm:$0xff] }
  0x13   : > { %v192_v27 = vld [vmem:[%s918_s18 + $0x21] sm:$0xff]  ;;  %v193_v28 = vld [vmem:[%s918_s18 + $0x31] sm:$0xff]  ;;  %v373_v29 = vpack.c.bf16 %v697_v26, %v696_v24 }
  0x14   : > { %v199_v30 = vpack.c.bf16 %v193_v28, %v192_v27  ;;  %v698_v31 = vld [vmem:[%s918_s18 + $0x30] sm:$0xff]  ;;  %v699_v32 = vld [vmem:[%s918_s18 + $0x40] sm:$0xff]  ;;  %760 = vmatprep.mubr.msk.bf16.mxu1 %vm209_vm0, %v198_v25  ;;  %v477_v50 = vpack.c.bf16 %v192_v27, %v191_v23 }
  0x15   : > { %v194_v33 = vld [vmem:[%s918_s18 + $0x41] sm:$0xff]  ;;  %v374_v34 = vpack.c.bf16 %v699_v32, %v698_v31  ;;  %v195_v35 = vld [vmem:[%s918_s18 + $0x51] sm:$0xff]  ;;  %784 = vmatprep.mubr.msk.bf16.mxu0 %vm209_vm0, %v373_v29  ;;  %v181_v51 = vpack.c.bf16 %v698_v31, %v697_v26 }
  0x16   : > { %v700_v36 = vld [vmem:[%s918_s18 + $0x50] sm:$0xff]  ;;  %v701_v37 = vld [vmem:[%s918_s18 + $0x60] sm:$0xff]  ;;  %761 = vmatmul.mubr.msk.bf16.vlgmr.msra.gmra.mrb[0].mxu1 %vm209_vm0, %v199_v30  ;;  %v200_v39 = vpack.c.bf16 %v195_v35, %v194_v33  ;;  %v478_v52 = vpack.c.bf16 %v194_v33, %v193_v28 }
  0x17   : > { %v375_v40 = vpack.c.bf16 %v701_v37, %v700_v36  ;;  %785 = vmatmul.mubr.msk.bf16.vlgmr.msra.gmra.mrb[0].mxu0 %vm209_vm0, %v374_v34  ;;  %769 = vmatpush3.bf16.msra.mxu1 %v188_v16  ;;  %v196_v42 = vld [vmem:[%s918_s18 + $0x61] sm:$0xff]  ;;  %v197_v43 = vld [vmem:[%s918_s18 + $0x71] sm:$0xff]  ;;  %v182_v53 = vpack.c.bf16 %v700_v36, %v699_v32 }
  0x18   : > { %793 = vmatpush3.bf16.msra.mxu0 %v486_v18  ;;  %764 = vmatprep.mubr.msk.bf16.mxu1 %vm209_vm0, %v200_v39  ;;  %v702_v44 = vld [vmem:[%s918_s18 + $0x70] sm:$0xff]  ;;  %v703_v45 = vld [vmem:[%s918_s18 + $0x80] sm:$0xff]  ;;  %v201_v47 = vpack.c.bf16 %v197_v43, %v196_v42  ;;  %v479_v54 = vpack.c.bf16 %v196_v42, %v195_v35 }
  0x19   : > { %v172_v46 = vld [vmem:[%s918_s18] sm:$0xff]  ;;  %788 = vmatprep.mubr.msk.bf16.mxu0 %vm209_vm0, %v375_v40  ;;  %770 = vmatprep.subr.bf16.mxu1 %v189_v38  ;;  %v376_v48 = vpack.c.bf16 %v703_v45, %v702_v44  ;;  %v183_v56 = vpack.c.bf16 %v702_v44, %v701_v37 }
  0x1a   : > { %794 = vmatprep.subr.bf16.mxu0 %v487_v41  ;;  %v180_v49 = vpack.c.bf16 %v696_v24, %v172_v46  ;;  %v719_v55 = vld [vmem:[%s918_s18 + $0x81] sm:$0xff] }
  0x1b   : > { %771 = vmatpush3.bf16.msra.mxu1 %v189_v38  ;;  %v480_v57 = vpack.c.bf16 %v719_v55, %v197_v43 }
  0x1c   : > { %795 = vmatpush3.bf16.msra.mxu0 %v487_v41 }
  0x1e   : > { %765 = vmatmul.mubr.msk.bf16.gmra.mrb[4].mxu1 %vm209_vm0, %v201_v47 }
  0x1f   : > { %789 = vmatmul.mubr.msk.bf16.gmra.mrb[4].mxu0 %vm209_vm0, %v376_v48  ;;  %772 = vmatprep.mubr.msk.bf16.mxu1 %vm209_vm0, %v180_v49 }
  0x20   : > { %796 = vmatprep.mubr.msk.bf16.mxu0 %vm209_vm0, %v477_v50 }
  0x26   : > { %773 = vmatmul.mubr.msk.bf16.vlgmr.msra.gmra.mrb[0].mxu1 %vm209_vm0, %v181_v51 }
  0x27   : > { %797 = vmatmul.mubr.msk.bf16.vlgmr.msra.gmra.mrb[0].mxu0 %vm209_vm0, %v478_v52  ;;  %776 = vmatprep.mubr.msk.bf16.mxu1 %vm209_vm0, %v182_v53 }
  0x28   : > { %800 = vmatprep.mubr.msk.bf16.mxu0 %vm209_vm0, %v479_v54 }
  0x2e   : > { %777 = vmatmul.mubr.msk.bf16.gmra.mrb[4].mxu1 %vm209_vm0, %v183_v56 }
  0x2f   : > { %801 = vmatmul.mubr.msk.bf16.gmra.mrb[4].mxu0 %vm209_vm0, %v480_v57 }
  0xf9   : > { %v774_v58 = vpop.f32.mrb[0].mxu1 }
  0xfa   : > { %v798_v59 = vpop.f32.mrb[0].mxu0  ;;  %v333_v61 = vpop.f32.mrb[1].mxu1 }
  0xfb   : > { %v804_v62 = vadd.f32 %v798_v59, %v774_v58  ;;  %v534_v63 = vpop.f32.mrb[1].mxu0  ;;  %v775_v0 = vpop.f32.mrb[2].mxu1 }
  0xfc   : > { %v805_v1 = vadd.f32 %v534_v63, %v333_v61  ;;  %v799_v2 = vpop.f32.mrb[2].mxu0  ;;  %v336_v3 = vpop.f32.mrb[3].mxu1 }
  0xfd   : > { %v582_v4 = vadd.f32 %v804_v62, %v728_v60  ;;  %v806_v5 = vadd.f32 %v799_v2, %v775_v0  ;;  %v537_v6 = vpop.f32.mrb[3].mxu0 }
  0xfe   : > { %v580_v7 = vadd.f32 %v805_v1, %v728_v60  ;;  %v807_v8 = vadd.f32 %v537_v6, %v336_v3 }
  0xff   : > { %vm590_vm1 = vcmp.ge.f32.partialorder %v582_v4, 0.0  ;;  %v598_v9 = vmul.f32 0.01, %v582_v4  ;;  %v583_v10 = vadd.f32 %v806_v5, %v728_v60 }
 0x100   : > { %vm588_vm3 = vcmp.ge.f32.partialorder %v580_v7, 0.0  ;;  %v596_v11 = vmul.f32 0.01, %v580_v7  ;;  %v581_v12 = vadd.f32 %v807_v8, %v728_v60 }
 0x101   : > { %v606_v13 = vsel %vm590_vm1, %v582_v4, %v598_v9  ;;  %vm591_vm4 = vcmp.ge.f32.partialorder %v583_v10, 0.0  ;;  %v599_v14 = vmul.f32 0.01, %v583_v10  ;;  %v778_v15 = vpop.f32.mrb[4].mxu1 }
 0x102   : > { %615 = vst.msk [vmem:[%s970_s30 + $0x10] sm:$0xff] %vm612_vm2, %v606_v13  ;;  %v604_v16 = vsel %vm588_vm3, %v580_v7, %v596_v11  ;;  %vm589_vm5 = vcmp.ge.f32.partialorder %v581_v12, 0.0  ;;  %v597_v17 = vmul.f32 0.01, %v581_v12  ;;  %v802_v18 = vpop.f32.mrb[4].mxu0  ;;  %v349_v19 = vpop.f32.mrb[5].mxu1 }
 0x103   : > { %613 = vst.msk [vmem:[%s970_s30] sm:$0xff] %vm612_vm2, %v604_v16  ;;  %v607_v20 = vsel %vm591_vm4, %v583_v10, %v599_v14  ;;  %v808_v21 = vadd.f32 %v802_v18, %v778_v15  ;;  %v550_v22 = vpop.f32.mrb[5].mxu0  ;;  %v779_v23 = vpop.f32.mrb[6].mxu1 }
 0x104   : > { %616 = vst.msk [vmem:[%s970_s30 + $0x18] sm:$0xff] %vm612_vm2, %v607_v20  ;;  %v605_v24 = vsel %vm589_vm5, %v581_v12, %v597_v17  ;;  %v809_v25 = vadd.f32 %v550_v22, %v349_v19  ;;  %v803_v26 = vpop.f32.mrb[6].mxu0  ;;  %v352_v27 = vpop.f32.mrb[7].mxu1 }
 0x105   : > { %614 = vst.msk [vmem:[%s970_s30 + $0x8] sm:$0xff] %vm612_vm2, %v605_v24  ;;  %v586_v28 = vadd.f32 %v808_v21, %v728_v60  ;;  %v810_v29 = vadd.f32 %v803_v26, %v779_v23  ;;  %v553_v30 = vpop.f32.mrb[7].mxu0 }
 0x106   : > { %v584_v31 = vadd.f32 %v809_v25, %v728_v60  ;;  %v811_v32 = vadd.f32 %v553_v30, %v352_v27 }
 0x107   : > { %vm594_vm6 = vcmp.ge.f32.partialorder %v586_v28, 0.0  ;;  %v602_v33 = vmul.f32 0.01, %v586_v28  ;;  %v587_v34 = vadd.f32 %v810_v29, %v728_v60 }
 0x108   : > { %vm592_vm7 = vcmp.ge.f32.partialorder %v584_v31, 0.0  ;;  %v600_v35 = vmul.f32 0.01, %v584_v31  ;;  %v585_v36 = vadd.f32 %v811_v32, %v728_v60 }
 0x109   : > { %v610_v37 = vsel %vm594_vm6, %v586_v28, %v602_v33  ;;  %vm595_vm8 = vcmp.ge.f32.partialorder %v587_v34, 0.0  ;;  %v603_v38 = vmul.f32 0.01, %v587_v34 }
 0x10a   : > { %619 = vst.msk [vmem:[%s970_s30 + $0x30] sm:$0xff] %vm612_vm2, %v610_v37  ;;  %v608_v39 = vsel %vm592_vm7, %v584_v31, %v600_v35  ;;  %vm593_vm9 = vcmp.ge.f32.partialorder %v585_v36, 0.0  ;;  %v601_v40 = vmul.f32 0.01, %v585_v36 }
 0x10b   : > { %617 = vst.msk [vmem:[%s970_s30 + $0x20] sm:$0xff] %vm612_vm2, %v608_v39  ;;  %v611_v41 = vsel %vm595_vm8, %v587_v34, %v603_v38 }
 0x10c   : > { %620 = vst.msk [vmem:[%s970_s30 + $0x38] sm:$0xff] %vm612_vm2, %v611_v41  ;;  %v609_v42 = vsel %vm593_vm9, %v585_v36, %v601_v40 }
 0x10d   : > { %618 = vst.msk [vmem:[%s970_s30 + $0x28] sm:$0xff] %vm612_vm2, %v609_v42 }
 0x10e PF: > { %s13_s12 = sadd.s32 1, %s843_s12  }
 0x10f   : > { %p10_p4 = scmp.ge.s32.totalorder %s13_s12, 4  }
 0x111   :  { %12 = sbr.rel (!%p10_p4) target bundleno = 1 (0x1), region = 66 }

// kernel: discriminator_forward.7
= control target key start
LH: loop header
LB: loop body
LE: loop exit
PB: predicated region body
PF: predicated region fallthrough
CT: control target
= control target key end

     0   :  { %s703_s12 = smov 0   ;;  %s867_s0 = inlined_call_operand.vmem [shape: f32[2,5,5,64], index: 0, kind: input, shape index: {}]   ;;  %s868_s1 = inlined_call_operand.vmem [shape: f32[4,64,32], index: 1, kind: input, shape index: {}]   ;;  %s869_s2 = inlined_call_operand.vmem [shape: f32[1,32], index: 2, kind: input, shape index: {}]   ;;  %s870_s3 = inlined_call_operand.vmem [shape: f32[2,4,4,32], index: 3, kind: output, shape index: {}]  }
   0x1 LB: > { %s538_s13 = sadd.s32 4294967295, %s679_s12   ;;  %p542_p0 = scmp.ge.s32.totalorder %s679_s12, 1  ;;  %s679_s12 = sphi %s703_s12, %s13_s12  }
   0x2   : > { %p137_p1 = scmp.lt.s32.totalorder %s679_s12, 3 }
   0x4   : > { %p138_p2 = pnand %p542_p0, %p137_p1 }
   0x5   : > { %v546_v0 = vld [vmem:[%s868_s1 + $0x40] sm:$0xff] (!%p138_p2)  ;;  %v547_v1 = vld [vmem:[%s868_s1 + $0x48] sm:$0xff] (!%p138_p2)  ;;  %p720_p3 = scmp.lt.s32.totalorder (!%p138_p2), %s538_s13, 1  ;;  %v681_v3 = vmov (!%p138_p2), 0.0   ;;  %v548_v6 = vld [vmem:[%s868_s1 + $0x50] sm:$0xff] (!%p138_p2)  ;;  %vm682_vm0 = vmmov (!%p138_p2), 0  }
   0x6   : > { %141 = sbr.rel (%p138_p2) target bundleno = 265 (0x109), region = 32  ;;  %v185_v2 = vld [vmem:[%s868_s1] sm:$0xff] (!%p138_p2)  ;;  %606 = vmatprep.subr.bf16.mxu0 (!%p138_p2), %v681_v3  ;;  %618 = vmatprep.subr.bf16.mxu1 (!%p138_p2), %v681_v3  ;;  %v219_v4 = vpack.c.bf16 (!%p138_p2), %v547_v1, %v546_v0  ;;  %v186_v5 = vld [vmem:[%s868_s1 + $0x8] sm:$0xff] (!%p138_p2)  ;;  %v549_v7 = vld [vmem:[%s868_s1 + $0x58] sm:$0xff] (!%p138_p2)  ;;  %vm223_vm1 = vcmask (!%p138_p2), 523264   ;;  %vm478_vm3 = vcmask (!%p138_p2), 257024  }
   0x7   : > { %v193_v8 = vpack.c.bf16 (!%p138_p2), %v186_v5, %v185_v2  ;;  %v187_v9 = vld [vmem:[%s868_s1 + $0x10] sm:$0xff] (!%p138_p2)  ;;  %v188_v10 = vld [vmem:[%s868_s1 + $0x18] sm:$0xff] (!%p138_p2)  ;;  %614 = vmatprep.mubr.msk.bf16.mxu0 (!%p138_p2), %vm682_vm0, %v681_v3  ;;  %626 = vmatprep.mubr.msk.bf16.mxu1 (!%p138_p2), %vm682_vm0, %v681_v3  ;;  %v220_v11 = vpack.c.bf16 (!%p138_p2), %v549_v7, %v548_v6  ;;  %v550_v13 = vld [vmem:[%s868_s1 + $0x60] sm:$0xff] (!%p138_p2) }
   0x8   : > { %607 = vmatpush3.bf16.msra.mxu0 (!%p138_p2), %v219_v4  ;;  %v194_v12 = vpack.c.bf16 (!%p138_p2), %v188_v10, %v187_v9  ;;  %v551_v14 = vld [vmem:[%s868_s1 + $0x68] sm:$0xff] (!%p138_p2)  ;;  %v189_v15 = vld [vmem:[%s868_s1 + $0x20] sm:$0xff] (!%p138_p2)  ;;  %v552_v17 = vld [vmem:[%s868_s1 + $0x70] sm:$0xff] (!%p138_p2) }
   0x9   : > { %619 = vmatpush3.bf16.msra.mxu1 (!%p138_p2), %v193_v8  ;;  %608 = vmatprep.subr.bf16.mxu0 (!%p138_p2), %v681_v3  ;;  %v190_v16 = vld [vmem:[%s868_s1 + $0x28] sm:$0xff] (!%p138_p2)  ;;  %v553_v18 = vld [vmem:[%s868_s1 + $0x78] sm:$0xff] (!%p138_p2)  ;;  %v221_v19 = vpack.c.bf16 (!%p138_p2), %v551_v14, %v550_v13  ;;  %v191_v21 = vld [vmem:[%s868_s1 + $0x30] sm:$0xff] (!%p138_p2) }
   0xa   : > { %620 = vmatprep.subr.bf16.mxu1 (!%p138_p2), %v681_v3  ;;  %v195_v20 = vpack.c.bf16 (!%p138_p2), %v190_v16, %v189_v15  ;;  %v192_v22 = vld [vmem:[%s868_s1 + $0x38] sm:$0xff] (!%p138_p2)  ;;  %v222_v25 = vpack.c.bf16 (!%p138_p2), %v553_v18, %v552_v17  ;;  %v560_v29 = vld [vmem:[%s868_s1 + $0x80] sm:$0xff] (!%p138_p2)  ;;  %v561_v30 = vld [vmem:[%s868_s1 + $0x88] sm:$0xff] (!%p138_p2) }
   0xb   : > { %v196_v28 = vpack.c.bf16 (!%p138_p2), %v192_v22, %v191_v21  ;;  %v573_v31 = vld [vmem:[%s868_s1 + $0xc0] sm:$0xff] (!%p138_p2)  ;;  %v574_v32 = vld [vmem:[%s868_s1 + $0xc8] sm:$0xff] (!%p138_p2)  ;;  %v562_v34 = vld [vmem:[%s868_s1 + $0x90] sm:$0xff] (!%p138_p2)  ;;  %v335_v37 = vpack.c.bf16 (!%p138_p2), %v561_v30, %v560_v29 }
   0xc   : > { %609 = vmatpush3.bf16.msra.mxu0 (!%p138_p2), %v220_v11  ;;  %v563_v35 = vld [vmem:[%s868_s1 + $0x98] sm:$0xff] (!%p138_p2)  ;;  %v407_v38 = vpack.c.bf16 (!%p138_p2), %v574_v32, %v573_v31  ;;  %v575_v39 = vld [vmem:[%s868_s1 + $0xd0] sm:$0xff] (!%p138_p2)  ;;  %v564_v43 = vld [vmem:[%s868_s1 + $0xa0] sm:$0xff] (!%p138_p2) }
   0xd   : > { %s873_s13 = smov (!%p720_p3, %s538_s13), 1  ;;  %621 = vmatpush3.bf16.msra.mxu1 %v194_v12  ;;  %610 = vmatprep.subr.bf16.mxu0 %v681_v3  ;;  %v576_v40 = vld [vmem:[%s868_s1 + $0xd8] sm:$0xff]  ;;  %v336_v41 = vpack.c.bf16 %v563_v35, %v562_v34  ;;  %v565_v44 = vld [vmem:[%s868_s1 + $0xa8] sm:$0xff]  ;;  %v577_v45 = vld [vmem:[%s868_s1 + $0xe0] sm:$0xff] }
   0xe   : > { %s654_s8 = smul.u32 40, %s873_s13  ;;  %622 = vmatprep.subr.bf16.mxu1 %v681_v3  ;;  %v408_v42 = vpack.c.bf16 %v576_v40, %v575_v39  ;;  %v578_v46 = vld [vmem:[%s868_s1 + $0xe8] sm:$0xff]  ;;  %v337_v47 = vpack.c.bf16 %v565_v44, %v564_v43  ;;  %v566_v49 = vld [vmem:[%s868_s1 + $0xb0] sm:$0xff]  ;;  %v567_v50 = vld [vmem:[%s868_s1 + $0xb8] sm:$0xff] }
   0xf   : > { %v409_v48 = vpack.c.bf16 %v578_v46, %v577_v45  ;;  %v579_v51 = vld [vmem:[%s868_s1 + $0xf0] sm:$0xff]  ;;  %v580_v52 = vld [vmem:[%s868_s1 + $0xf8] sm:$0xff]  ;;  %v338_v55 = vpack.c.bf16 %v567_v50, %v566_v49  ;;  %v582_v11 = vld [vmem:[%s869_s2] ss:$0 sm:$0xff] }
  0x10   : > { %s773_s21 = scalar_lea.vmem %s867_s0, %s654_s8  ;;  %611 = vmatpush3.bf16.msra.mxu0 %v221_v19  ;;  %v410_v58 = vpack.c.bf16 %v580_v52, %v579_v51  ;;  %s585_s8 = sshll.u32 %s873_s13, 4 }
  0x11   : > { %v665_v23 = vld [vmem:[%s773_s21 + $0x1] ss:$8 sps:$4 sm:$0xff]   ;;  %v666_v24 = vld [vmem:[%s773_s21 + $0x11] ss:$8 sps:$4 sm:$0xff]   ;;  %623 = vmatpush3.bf16.msra.mxu1 %v195_v20  ;;  %612 = vmatprep.subr.bf16.mxu0 %v681_v3  ;;  %s170_s11 = scalar_lea.vmem %s870_s3, %s585_s8 }
  0x12   : > { %v667_v26 = vld [vmem:[%s773_s21] ss:$8 sps:$4 sm:$0xff]   ;;  %v668_v27 = vld [vmem:[%s773_s21 + $0x10] ss:$8 sps:$4 sm:$0xff]   ;;  %624 = vmatprep.subr.bf16.mxu1 %v681_v3  ;;  %v209_v33 = vpack.c.bf16 %v666_v24, %v665_v23 }
  0x13   : > { %v184_v36 = vpack.c.bf16 %v668_v27, %v667_v26  ;;  %v669_v53 = vld [vmem:[%s773_s21 + $0x8] ss:$8 sps:$4 sm:$0xff]   ;;  %v670_v54 = vld [vmem:[%s773_s21 + $0x18] ss:$8 sps:$4 sm:$0xff]  }
  0x14   : > { %613 = vmatpush3.bf16.msra.mxu0 %v222_v25  ;;  %v671_v56 = vld [vmem:[%s773_s21 + $0x9] ss:$8 sps:$4 sm:$0xff]   ;;  %v672_v57 = vld [vmem:[%s773_s21 + $0x19] ss:$8 sps:$4 sm:$0xff]   ;;  %v325_v59 = vpack.c.bf16 %v670_v54, %v669_v53 }
  0x15   : > { %625 = vmatpush3.bf16.msra.mxu1 %v196_v28  ;;  %630 = vmatprep.subr.bf16.mxu0 %v681_v3  ;;  %v397_v60 = vpack.c.bf16 %v672_v57, %v671_v56 }
  0x16   : > { %642 = vmatprep.subr.bf16.mxu1 %v681_v3 }
  0x17   : > { %615 = vmatmul.mubr.msk.bf16.vlgmr.msra.gmra.mrb[0].mxu0 %vm223_vm1, %v209_v33 }
  0x18   : > { %627 = vmatmul.mubr.msk.bf16.vlgmr.msra.gmra.mrb[0].mxu1 %vm223_vm1, %v184_v36  ;;  %631 = vmatpush3.bf16.msra.mxu0 %v335_v37 }
  0x19   : > { %643 = vmatpush3.bf16.msra.mxu1 %v407_v38  ;;  %632 = vmatprep.subr.bf16.mxu0 %v681_v3 }
  0x1a   : > { %644 = vmatprep.subr.bf16.mxu1 %v681_v3  ;;  %638 = vmatprep.mubr.msk.bf16.mxu0 %vm682_vm0, %v681_v3 }
  0x1b   : > { %650 = vmatprep.mubr.msk.bf16.mxu1 %vm682_vm0, %v681_v3 }
  0x1c   : > { %633 = vmatpush3.bf16.msra.mxu0 %v336_v41 }
  0x1d   : > { %645 = vmatpush3.bf16.msra.mxu1 %v408_v42  ;;  %634 = vmatprep.subr.bf16.mxu0 %v681_v3 }
  0x1e   : > { %646 = vmatprep.subr.bf16.mxu1 %v681_v3 }
  0x20   : > { %635 = vmatpush3.bf16.msra.mxu0 %v337_v47 }
  0x21   : > { %647 = vmatpush3.bf16.msra.mxu1 %v409_v48  ;;  %636 = vmatprep.subr.bf16.mxu0 %v681_v3 }
  0x22   : > { %648 = vmatprep.subr.bf16.mxu1 %v681_v3 }
  0x24   : > { %637 = vmatpush3.bf16.msra.mxu0 %v338_v55 }
  0x25   : > { %649 = vmatpush3.bf16.msra.mxu1 %v410_v58 }
  0x27   : > { %639 = vmatmul.mubr.msk.bf16.vlgmr.msra.gmra.mrb[4].mxu0 %vm223_vm1, %v325_v59 }
  0x28   : > { %651 = vmatmul.mubr.msk.bf16.vlgmr.msra.gmra.mrb[4].mxu1 %vm223_vm1, %v397_v60 }
  0xea   : > { %v261_v61 = vpop.f32.mrb[0].mxu0 }
  0xeb   : > { %v305_v62 = vpop.f32.mrb[0].mxu1  ;;  %v616_v63 = vpop.f32.mrb[1].mxu0 }
  0xec   : > { %v306_v0 = vadd.f32 %v305_v62, %v261_v61  ;;  %v628_v1 = vpop.f32.mrb[1].mxu1  ;;  %v264_v2 = vpop.f32.mrb[2].mxu0 }
  0xed   : > { %v308_v4 = vpop.f32.mrb[2].mxu1  ;;  %v617_v5 = vpop.f32.mrb[3].mxu0 }
  0xee   : > { %v309_v6 = vadd.f32 %v308_v4, %v264_v2  ;;  %v629_v7 = vpop.f32.mrb[3].mxu1 }
  0xfa   : > { %v376_v3 = vpop.f32.mrb[4].mxu0 }
  0xfb   : > { %v383_v8 = vadd.f32 %v376_v3, %v306_v0  ;;  %v448_v9 = vpop.f32.mrb[4].mxu1  ;;  %v640_v10 = vpop.f32.mrb[5].mxu0 }
  0xfc   : > { %v652_v12 = vpop.f32.mrb[5].mxu1  ;;  %v379_v13 = vpop.f32.mrb[6].mxu0 }
  0xfd   : > { %v455_v14 = vadd.f32 %v448_v9, %v383_v8  ;;  %v384_v15 = vadd.f32 %v379_v13, %v309_v6  ;;  %v451_v16 = vpop.f32.mrb[6].mxu1  ;;  %v641_v17 = vpop.f32.mrb[7].mxu0 }
  0xfe   : > { %v653_v18 = vpop.f32.mrb[7].mxu1 }
  0xff   : > { %v464_v19 = vadd.f32 %v582_v11, %v455_v14  ;;  %v456_v20 = vadd.f32 %v451_v16, %v384_v15 }
 0x101   : > { %vm466_vm2 = vcmp.ge.f32.partialorder %v464_v19, 0.0  ;;  %v468_v21 = vmul.f32 0.01, %v464_v19  ;;  %v465_v22 = vadd.f32 %v582_v11, %v456_v20 }
 0x103   : > { %v470_v23 = vsel %vm466_vm2, %v464_v19, %v468_v21  ;;  %vm467_vm4 = vcmp.ge.f32.partialorder %v465_v22, 0.0  ;;  %v469_v24 = vmul.f32 0.01, %v465_v22 }
 0x104   : > { %v474_v25 = vcombine.high %v470_v23, %v470_v23  ;;  %479 = vst.msk [vmem:[%s170_s11] sm:$0xf] %vm478_vm3, %v470_v23 }
 0x105   : > { %v471_v26 = vsel %vm467_vm4, %v465_v22, %v469_v24 }
 0x106   : > { %480 = vst.msk [vmem:[%s170_s11 + $0x4] sm:$0xf] %vm478_vm3, %v474_v25  ;;  %v475_v27 = vcombine.high %v471_v26, %v471_v26  ;;  %481 = vst.msk [vmem:[%s170_s11 + $0x8] sm:$0xf] %vm478_vm3, %v471_v26 }
 0x108   : > { %482 = vst.msk [vmem:[%s170_s11 + $0xc] sm:$0xf] %vm478_vm3, %v475_v27 }
 0x109 PF: > { %s13_s12 = sadd.s32 1, %s679_s12  }
 0x10a   : > { %p10_p4 = scmp.ge.s32.totalorder %s13_s12, 4  }
 0x10c   :  { %12 = sbr.rel (!%p10_p4) target bundleno = 1 (0x1), region = 66 }

// kernel: discriminator_forward.9
= control target key start
LH: loop header
LB: loop body
LE: loop exit
PB: predicated region body
PF: predicated region fallthrough
CT: control target
= control target key end

     0   :  { %s1894_s14 = smov 0   ;;  %s2454_s0 = inlined_call_operand.vmem [shape: f32[2,5,5,64], index: 0, kind: input, shape index: {}]   ;;  %s2455_s1 = inlined_call_operand.vmem [shape: f32[16,64,1], index: 1, kind: input, shape index: {}]   ;;  %s2456_s2 = inlined_call_operand.<no memory space> [shape: f32[1,1], index: 2, kind: input, shape index: {}]   ;;  %s2457_s3 = inlined_call_operand.vmem [shape: f32[2,2,2,1], index: 3, kind: output, shape index: {}]  }
   0x1   :  { %v8_v0 = vstv %s2456_s2 }
   0x2   :  { %9 = vst [vmem:[#allocation2] sm:$0x1] %v8_v0 }
   0x3 LB: > { %s1388_s15 = sadd.s32 4294967295, %s1866_s14   ;;  %p1392_p0 = scmp.ge.s32.totalorder %s1866_s14, 1  ;;  %s1866_s14 = sphi %s1894_s14, %s15_s14  }
   0x4   : > { %p139_p1 = scmp.lt.s32.totalorder %s1866_s14, 3 }
   0x6   : > { %p140_p2 = pnand %p1392_p0, %p139_p1 }
   0x7   : > { %v1396_v1 = vld [vmem:[%s2455_s1 + $0x40] sm:$0xff] (!%p140_p2)  ;;  %v1397_v2 = vld [vmem:[%s2455_s1 + $0x48] sm:$0xff] (!%p140_p2)  ;;  %p1911_p3 = scmp.lt.s32.totalorder (!%p140_p2), %s1388_s15, 1  ;;  %v182_v4 = vlaneseq (!%p140_p2)  ;;  %v1868_v5 = vmov (!%p140_p2), 0.0   ;;  %v1398_v8 = vld [vmem:[%s2455_s1 + $0x50] sm:$0xff] (!%p140_p2)  ;;  %vm1869_vm0 = vmmov (!%p140_p2), 0  }
   0x8   : > { %143 = sbr.rel (%p140_p2) target bundleno = 360 (0x168), region = 32  ;;  %v188_v3 = vld [vmem:[%s2455_s1] sm:$0xff] (!%p140_p2)  ;;  %1640 = vmatprep.subr.bf16.mxu0 (!%p140_p2), %v1868_v5  ;;  %1652 = vmatprep.subr.bf16.mxu1 (!%p140_p2), %v1868_v5  ;;  %v223_v6 = vpack.c.bf16 (!%p140_p2), %v1397_v2, %v1396_v1  ;;  %v189_v7 = vld [vmem:[%s2455_s1 + $0x8] sm:$0xff] (!%p140_p2)  ;;  %v1399_v9 = vld [vmem:[%s2455_s1 + $0x58] sm:$0xff] (!%p140_p2)  ;;  %v1870_v13 = vmov (!%p140_p2), 1983009808  }
   0x9   : > { %v196_v10 = vpack.c.bf16 (!%p140_p2), %v189_v7, %v188_v3  ;;  %v190_v11 = vld [vmem:[%s2455_s1 + $0x10] sm:$0xff] (!%p140_p2)  ;;  %v191_v12 = vld [vmem:[%s2455_s1 + $0x18] sm:$0xff] (!%p140_p2)  ;;  %1648 = vmatprep.mubr.msk.bf16.mxu0 (!%p140_p2), %vm1869_vm0, %v1868_v5  ;;  %1660 = vmatprep.mubr.msk.bf16.mxu1 (!%p140_p2), %vm1869_vm0, %v1868_v5  ;;  %v180_v14 = vunpack.c.l.s4 (!%p140_p2), %v1870_v13  ;;  %v183_v15 = vshrl.u32 (!%p140_p2), %v182_v4, 7  ;;  %v224_v16 = vpack.c.bf16 (!%p140_p2), %v1399_v9, %v1398_v8  ;;  %v1400_v18 = vld [vmem:[%s2455_s1 + $0x60] sm:$0xff] (!%p140_p2) }
   0xa   : > { %1641 = vmatpush3.bf16.msra.mxu0 (!%p140_p2), %v223_v6  ;;  %v197_v17 = vpack.c.bf16 (!%p140_p2), %v191_v12, %v190_v11  ;;  %v1401_v19 = vld [vmem:[%s2455_s1 + $0x68] sm:$0xff] (!%p140_p2)  ;;  %v192_v21 = vld [vmem:[%s2455_s1 + $0x20] sm:$0xff] (!%p140_p2)  ;;  %v1402_v23 = vld [vmem:[%s2455_s1 + $0x70] sm:$0xff] (!%p140_p2)  ;;  %vm227_vm1 = vcmask (!%p140_p2), 523264   ;;  %vm1330_vm2 = vcmask (!%p140_p2), 1024  }
   0xb   : > { %1653 = vmatpush3.bf16.msra.mxu1 (!%p140_p2), %v196_v10  ;;  %1642 = vmatprep.subr.bf16.mxu0 (!%p140_p2), %v1868_v5  ;;  %v181_v20 = vunpack.c.0.s8 (!%p140_p2), %v180_v14  ;;  %v193_v22 = vld [vmem:[%s2455_s1 + $0x28] sm:$0xff] (!%p140_p2)  ;;  %v225_v25 = vpack.c.bf16 (!%p140_p2), %v1401_v19, %v1400_v18  ;;  %v1403_v27 = vld [vmem:[%s2455_s1 + $0x78] sm:$0xff] (!%p140_p2)  ;;  %v194_v29 = vld [vmem:[%s2455_s1 + $0x30] sm:$0xff] (!%p140_p2) }
   0xc   : > { %1654 = vmatprep.subr.bf16.mxu1 (!%p140_p2), %v1868_v5  ;;  %v198_v26 = vpack.c.bf16 (!%p140_p2), %v193_v22, %v192_v21  ;;  %v195_v30 = vld [vmem:[%s2455_s1 + $0x38] sm:$0xff] (!%p140_p2)  ;;  %v226_v33 = vpack.c.bf16 (!%p140_p2), %v1403_v27, %v1402_v23  ;;  %v1406_v36 = vld [vmem:[%s2455_s1 + $0x80] sm:$0xff] (!%p140_p2)  ;;  %v1407_v37 = vld [vmem:[%s2455_s1 + $0x88] sm:$0xff] (!%p140_p2) }
   0xd   : > { %v1963_v24 = vsub.s32 (!%p140_p2), %v181_v20, %v183_v15  ;;  %v199_v35 = vpack.c.bf16 (!%p140_p2), %v195_v30, %v194_v29  ;;  %v1415_v38 = vld [vmem:[%s2455_s1 + $0xc0] sm:$0xff] (!%p140_p2)  ;;  %v1416_v39 = vld [vmem:[%s2455_s1 + $0xc8] sm:$0xff] (!%p140_p2)  ;;  %v337_v42 = vpack.c.bf16 (!%p140_p2), %v1407_v37, %v1406_v36  ;;  %v1408_v44 = vld [vmem:[%s2455_s1 + $0x90] sm:$0xff] (!%p140_p2) }
   0xe   : > { %1643 = vmatpush3.bf16.msra.mxu0 (!%p140_p2), %v224_v16  ;;  %v408_v43 = vpack.c.bf16 (!%p140_p2), %v1416_v39, %v1415_v38  ;;  %v1409_v45 = vld [vmem:[%s2455_s1 + $0x98] sm:$0xff] (!%p140_p2)  ;;  %v1417_v46 = vld [vmem:[%s2455_s1 + $0xd0] sm:$0xff] (!%p140_p2)  ;;  %v1410_v49 = vld [vmem:[%s2455_s1 + $0xa0] sm:$0xff] (!%p140_p2) }
   0xf   : > { %s2460_s15 = smov (!%p1911_p3, %s1388_s15), 1  ;;  %1655 = vmatpush3.bf16.msra.mxu1 %v197_v17  ;;  %1644 = vmatprep.subr.bf16.mxu0 %v1868_v5  ;;  %v1418_v47 = vld [vmem:[%s2455_s1 + $0xd8] sm:$0xff]  ;;  %v338_v48 = vpack.c.bf16 %v1409_v45, %v1408_v44  ;;  %v1411_v50 = vld [vmem:[%s2455_s1 + $0xa8] sm:$0xff]  ;;  %v1419_v52 = vld [vmem:[%s2455_s1 + $0xe0] sm:$0xff] }
  0x10   : > { %s1832_s9 = smul.u32 40, %s2460_s15  ;;  %1656 = vmatprep.subr.bf16.mxu1 %v1868_v5  ;;  %v409_v51 = vpack.c.bf16 %v1418_v47, %v1417_v46  ;;  %v1420_v53 = vld [vmem:[%s2455_s1 + $0xe8] sm:$0xff]  ;;  %v339_v55 = vpack.c.bf16 %v1411_v50, %v1410_v49  ;;  %v1412_v58 = vld [vmem:[%s2455_s1 + $0xb0] sm:$0xff]  ;;  %v1413_v59 = vld [vmem:[%s2455_s1 + $0xb8] sm:$0xff]  ;;  %s1559_s24 = sshll.u32 %s2460_s15, 2 }
  0x11   : > { %v410_v57 = vpack.c.bf16 %v1420_v53, %v1419_v52  ;;  %v1421_v60 = vld [vmem:[%s2455_s1 + $0xf0] sm:$0xff]  ;;  %v1422_v61 = vld [vmem:[%s2455_s1 + $0xf8] sm:$0xff]  ;;  %v340_v63 = vpack.c.bf16 %v1413_v59, %v1412_v58  ;;  %v1426_v2 = vld [vmem:[%s2455_s1 + $0x100] sm:$0xff]  ;;  %s172_s27 = scalar_lea.vmem %s2457_s3, %s1559_s24 }
  0x12   : > { %s1961_s19 = scalar_lea.vmem %s2454_s0, %s1832_s9  ;;  %1645 = vmatpush3.bf16.msra.mxu0 %v225_v25  ;;  %v411_v1 = vpack.c.bf16 %v1422_v61, %v1421_v60  ;;  %v1427_v3 = vld [vmem:[%s2455_s1 + $0x108] sm:$0xff]  ;;  %v1437_v4 = vld [vmem:[%s2455_s1 + $0x140] sm:$0xff]  ;;  %v1428_v11 = vld [vmem:[%s2455_s1 + $0x110] sm:$0xff] }
  0x13   : > { %v1844_v28 = vld [vmem:[%s1961_s19 + $0x1] ss:$8 sps:$4 sm:$0x33]   ;;  %1657 = vmatpush3.bf16.msra.mxu1 %v198_v26  ;;  %1646 = vmatprep.subr.bf16.mxu0 %v1868_v5  ;;  %v1847_v56 = vld [vmem:[%s1961_s19 + $0x3] ss:$8 sps:$4 sm:$0x33]   ;;  %v480_v9 = vpack.c.bf16 %v1427_v3, %v1426_v2 }
  0x14   : > { %v1845_v31 = vld [vmem:[%s1961_s19] ss:$8 sps:$4 sm:$0x33]   ;;  %v211_v32 = vrot.slane %v1844_v28, %v1963_v24  ;;  %1658 = vmatprep.subr.bf16.mxu1 %v1868_v5  ;;  %v1846_v54 = vld [vmem:[%s1961_s19 + $0x2] ss:$8 sps:$4 sm:$0x33]   ;;  %v396_v0 = vrot.slane %v1847_v56, %v1963_v24 }
  0x15   : > { %v185_v34 = vrot.slane %v1845_v31, %v1963_v24  ;;  %v325_v62 = vrot.slane %v1846_v54, %v1963_v24  ;;  %v1438_v6 = vld [vmem:[%s2455_s1 + $0x148] sm:$0xff]  ;;  %v1429_v12 = vld [vmem:[%s2455_s1 + $0x118] sm:$0xff]  ;;  %v1439_v13 = vld [vmem:[%s2455_s1 + $0x150] sm:$0xff] }
  0x16   : > { %v213_v40 = vpack.c.bf16 %v211_v32, %v211_v32  ;;  %1647 = vmatpush3.bf16.msra.mxu0 %v226_v33  ;;  %v398_v8 = vpack.c.bf16 %v396_v0, %v396_v0  ;;  %v551_v10 = vpack.c.bf16 %v1438_v6, %v1437_v4  ;;  %v1440_v14 = vld [vmem:[%s2455_s1 + $0x158] sm:$0xff]  ;;  %v481_v15 = vpack.c.bf16 %v1429_v12, %v1428_v11  ;;  %v1430_v16 = vld [vmem:[%s2455_s1 + $0x120] sm:$0xff]  ;;  %v1431_v18 = vld [vmem:[%s2455_s1 + $0x128] sm:$0xff] }
  0x17   : > { %v187_v41 = vpack.c.bf16 %v185_v34, %v185_v34  ;;  %1659 = vmatpush3.bf16.msra.mxu1 %v199_v35  ;;  %1664 = vmatprep.subr.bf16.mxu0 %v1868_v5  ;;  %v327_v7 = vpack.c.bf16 %v325_v62, %v325_v62  ;;  %v552_v17 = vpack.c.bf16 %v1440_v14, %v1439_v13  ;;  %v1441_v19 = vld [vmem:[%s2455_s1 + $0x160] sm:$0xff]  ;;  %v1442_v20 = vld [vmem:[%s2455_s1 + $0x168] sm:$0xff]  ;;  %v1432_v26 = vld [vmem:[%s2455_s1 + $0x130] sm:$0xff] }
  0x18   : > { %1676 = vmatprep.subr.bf16.mxu1 %v1868_v5  ;;  %v1848_v21 = vld [vmem:[%s1961_s19 + $0x8] ss:$8 sps:$4 sm:$0x33]   ;;  %v482_v22 = vpack.c.bf16 %v1431_v18, %v1430_v16  ;;  %v553_v25 = vpack.c.bf16 %v1442_v20, %v1441_v19  ;;  %v1433_v27 = vld [vmem:[%s2455_s1 + $0x138] sm:$0xff]  ;;  %v1448_v34 = vld [vmem:[%s2455_s1 + $0x180] sm:$0xff] }
  0x19   : > { %1649 = vmatmul.mubr.msk.bf16.vlgmr.msra.gmra.mrb[0].mxu0 %vm227_vm1, %v213_v40  ;;  %v1849_v23 = vld [vmem:[%s1961_s19 + $0x9] ss:$8 sps:$4 sm:$0x33]   ;;  %v1444_v29 = vld [vmem:[%s2455_s1 + $0x178] sm:$0xff]  ;;  %v468_v30 = vrot.slane %v1848_v21, %v1963_v24  ;;  %v483_v31 = vpack.c.bf16 %v1433_v27, %v1432_v26  ;;  %v1459_v36 = vld [vmem:[%s2455_s1 + $0x1c0] sm:$0xff] }
  0x1a   : > { %1661 = vmatmul.mubr.msk.bf16.vlgmr.msra.gmra.mrb[0].mxu1 %vm227_vm1, %v187_v41  ;;  %1665 = vmatpush3.bf16.msra.mxu0 %v337_v42  ;;  %v1443_v28 = vld [vmem:[%s2455_s1 + $0x170] sm:$0xff]  ;;  %v539_v32 = vrot.slane %v1849_v23, %v1963_v24  ;;  %v1449_v35 = vld [vmem:[%s2455_s1 + $0x188] sm:$0xff]  ;;  %v1462_v45 = vld [vmem:[%s2455_s1 + $0x1d8] sm:$0xff] }
  0x1b   : > { %1677 = vmatpush3.bf16.msra.mxu1 %v408_v43  ;;  %1666 = vmatprep.subr.bf16.mxu0 %v1868_v5  ;;  %v554_v33 = vpack.c.bf16 %v1444_v29, %v1443_v28  ;;  %v1460_v37 = vld [vmem:[%s2455_s1 + $0x1c8] sm:$0xff]  ;;  %v470_v38 = vpack.c.bf16 %v468_v30, %v468_v30  ;;  %v622_v40 = vpack.c.bf16 %v1449_v35, %v1448_v34  ;;  %v1450_v42 = vld [vmem:[%s2455_s1 + $0x190] sm:$0xff]  ;;  %v1451_v43 = vld [vmem:[%s2455_s1 + $0x198] sm:$0xff] }
  0x1c   : > { %1678 = vmatprep.subr.bf16.mxu1 %v1868_v5  ;;  %1672 = vmatprep.mubr.msk.bf16.mxu0 %vm1869_vm0, %v1868_v5  ;;  %v541_v39 = vpack.c.bf16 %v539_v32, %v539_v32  ;;  %v693_v41 = vpack.c.bf16 %v1460_v37, %v1459_v36  ;;  %v1461_v44 = vld [vmem:[%s2455_s1 + $0x1d0] sm:$0xff]  ;;  %v623_v46 = vpack.c.bf16 %v1451_v43, %v1450_v42  ;;  %v1453_v49 = vld [vmem:[%s2455_s1 + $0x1a8] sm:$0xff]  ;;  %v1463_v50 = vld [vmem:[%s2455_s1 + $0x1e0] sm:$0xff] }
  0x1d   : > { %1684 = vmatprep.mubr.msk.bf16.mxu1 %vm1869_vm0, %v1868_v5  ;;  %v694_v47 = vpack.c.bf16 %v1462_v45, %v1461_v44  ;;  %v1850_v52 = vld [vmem:[%s1961_s19 + $0xa] ss:$8 sps:$4 sm:$0x33]   ;;  %v1466_v59 = vld [vmem:[%s2455_s1 + $0x1f8] sm:$0xff]  ;;  %v1470_v0 = vld [vmem:[%s2455_s1 + $0x200] sm:$0xff] }
  0x1e   : > { %1667 = vmatpush3.bf16.msra.mxu0 %v338_v48  ;;  %v1452_v48 = vld [vmem:[%s2455_s1 + $0x1a0] sm:$0xff]  ;;  %v1851_v54 = vld [vmem:[%s1961_s19 + $0xb] ss:$8 sps:$4 sm:$0x33]   ;;  %v610_v60 = vrot.slane %v1850_v52, %v1963_v24  ;;  %v1484_v12 = vld [vmem:[%s2455_s1 + $0x258] sm:$0xff] }
  0x1f   : > { %1679 = vmatpush3.bf16.msra.mxu1 %v409_v51  ;;  %1668 = vmatprep.subr.bf16.mxu0 %v1868_v5  ;;  %v1464_v51 = vld [vmem:[%s2455_s1 + $0x1e8] sm:$0xff]  ;;  %v624_v53 = vpack.c.bf16 %v1453_v49, %v1452_v48  ;;  %v1454_v56 = vld [vmem:[%s2455_s1 + $0x1b0] sm:$0xff]  ;;  %v681_v62 = vrot.slane %v1851_v54, %v1963_v24  ;;  %v1481_v2 = vld [vmem:[%s2455_s1 + $0x240] sm:$0xff] }
  0x20   : > { %1680 = vmatprep.subr.bf16.mxu1 %v1868_v5  ;;  %v1465_v58 = vld [vmem:[%s2455_s1 + $0x1f0] sm:$0xff]  ;;  %v1482_v3 = vld [vmem:[%s2455_s1 + $0x248] sm:$0xff]  ;;  %v612_v4 = vpack.c.bf16 %v610_v60, %v610_v60  ;;  %v1488_v27 = vld [vmem:[%s2455_s1 + $0x278] sm:$0xff] }
  0x21   : > { %v683_v6 = vpack.c.bf16 %v681_v62, %v681_v62  ;;  %v1483_v11 = vld [vmem:[%s2455_s1 + $0x250] sm:$0xff]  ;;  %v1475_v16 = vld [vmem:[%s2455_s1 + $0x228] sm:$0xff]  ;;  %v1492_v32 = vld [vmem:[%s2455_s1 + $0x280] sm:$0xff] }
  0x22   : > { %1669 = vmatpush3.bf16.msra.mxu0 %v339_v55  ;;  %v695_v55 = vpack.c.bf16 %v1464_v51, %v1463_v50  ;;  %v837_v14 = vpack.c.bf16 %v1484_v12, %v1483_v11  ;;  %v1486_v18 = vld [vmem:[%s2455_s1 + $0x268] sm:$0xff]  ;;  %v1852_v19 = vld [vmem:[%s1961_s19 + $0x10] ss:$8 sps:$4 sm:$0x33]   ;;  %v1503_v34 = vld [vmem:[%s2455_s1 + $0x2c0] sm:$0xff] }
  0x23   : > { %1681 = vmatpush3.bf16.msra.mxu1 %v410_v57  ;;  %1670 = vmatprep.subr.bf16.mxu0 %v1868_v5  ;;  %v1455_v57 = vld [vmem:[%s2455_s1 + $0x1b8] sm:$0xff]  ;;  %v1476_v23 = vld [vmem:[%s2455_s1 + $0x230] sm:$0xff]  ;;  %v753_v28 = vrot.slane %v1852_v19, %v1963_v24  ;;  %v1504_v35 = vld [vmem:[%s2455_s1 + $0x2c8] sm:$0xff] }
  0x24   : > { %1682 = vmatprep.subr.bf16.mxu1 %v1868_v5  ;;  %v625_v61 = vpack.c.bf16 %v1455_v57, %v1454_v56  ;;  %v1853_v21 = vld [vmem:[%s1961_s19 + $0x11] ss:$8 sps:$4 sm:$0x33]   ;;  %v1507_v48 = vld [vmem:[%s2455_s1 + $0x2e0] sm:$0xff]  ;;  %v1508_v49 = vld [vmem:[%s2455_s1 + $0x2e8] sm:$0xff] }
  0x25   : > { %v1487_v26 = vld [vmem:[%s2455_s1 + $0x270] sm:$0xff]  ;;  %v824_v30 = vrot.slane %v1853_v21, %v1963_v24  ;;  %v755_v36 = vpack.c.bf16 %v753_v28, %v753_v28  ;;  %v1506_v43 = vld [vmem:[%s2455_s1 + $0x2d8] sm:$0xff]  ;;  %v1514_v62 = vld [vmem:[%s2455_s1 + $0x300] sm:$0xff] }
  0x26   : > { %1671 = vmatpush3.bf16.msra.mxu0 %v340_v63  ;;  %v696_v63 = vpack.c.bf16 %v1466_v59, %v1465_v58  ;;  %v1505_v42 = vld [vmem:[%s2455_s1 + $0x2d0] sm:$0xff]  ;;  %v1510_v57 = vld [vmem:[%s2455_s1 + $0x2f8] sm:$0xff] }
  0x27   : > { %1683 = vmatpush3.bf16.msra.mxu1 %v411_v1  ;;  %1688 = vmatprep.subr.bf16.mxu0 %v1868_v5  ;;  %v1471_v1 = vld [vmem:[%s2455_s1 + $0x208] sm:$0xff]  ;;  %v826_v37 = vpack.c.bf16 %v824_v30, %v824_v30  ;;  %v979_v45 = vpack.c.bf16 %v1506_v43, %v1505_v42  ;;  %v1854_v50 = vld [vmem:[%s1961_s19 + $0x12] ss:$8 sps:$4 sm:$0x33]   ;;  %v1536_v30 = vld [vmem:[%s2455_s1 + $0x380] sm:$0xff] }
  0x28   : > { %1700 = vmatprep.subr.bf16.mxu1 %v1868_v5  ;;  %v1855_v52 = vld [vmem:[%s1961_s19 + $0x13] ss:$8 sps:$4 sm:$0x33]   ;;  %v895_v58 = vrot.slane %v1854_v50, %v1963_v24  ;;  %v1857_v19 = vld [vmem:[%s1961_s19 + $0x19] ss:$8 sps:$4 sm:$0x33]  }
  0x29   : > { %1673 = vmatmul.mubr.msk.bf16.vlgmr.msra.gmra.mrb[4].mxu0 %vm227_vm1, %v327_v7  ;;  %v765_v7 = vpack.c.bf16 %v1471_v1, %v1470_v0  ;;  %v1498_v54 = vld [vmem:[%s2455_s1 + $0x2b0] sm:$0xff]  ;;  %v966_v60 = vrot.slane %v1855_v52, %v1963_v24  ;;  %v1525_v0 = vld [vmem:[%s2455_s1 + $0x340] sm:$0xff]  ;;  %v1526_v1 = vld [vmem:[%s2455_s1 + $0x348] sm:$0xff]  ;;  %v1109_v28 = vrot.slane %v1857_v19, %v1963_v24 }
  0x2a   : > { %1685 = vmatmul.mubr.msk.bf16.vlgmr.msra.gmra.mrb[4].mxu1 %vm227_vm1, %v398_v8  ;;  %1689 = vmatpush3.bf16.msra.mxu0 %v480_v9  ;;  %v836_v8 = vpack.c.bf16 %v1482_v3, %v1481_v2  ;;  %v1472_v9 = vld [vmem:[%s2455_s1 + $0x210] sm:$0xff]  ;;  %v897_v2 = vpack.c.bf16 %v895_v58, %v895_v58  ;;  %v1859_v50 = vld [vmem:[%s1961_s19 + $0x1b] ss:$8 sps:$4 sm:$0x33]  }
  0x2b   : > { %1701 = vmatpush3.bf16.msra.mxu1 %v551_v10  ;;  %1690 = vmatprep.subr.bf16.mxu0 %v1868_v5  ;;  %v1473_v10 = vld [vmem:[%s2455_s1 + $0x218] sm:$0xff]  ;;  %v1509_v56 = vld [vmem:[%s2455_s1 + $0x2f0] sm:$0xff]  ;;  %v968_v3 = vpack.c.bf16 %v966_v60, %v966_v60  ;;  %v1251_v58 = vrot.slane %v1859_v50, %v1963_v24 }
  0x2c   : > { %1702 = vmatprep.subr.bf16.mxu1 %v1868_v5  ;;  %1696 = vmatprep.mubr.msk.bf16.mxu0 %vm1869_vm0, %v1868_v5  ;;  %v766_v13 = vpack.c.bf16 %v1473_v10, %v1472_v9  ;;  %v1527_v9 = vld [vmem:[%s2455_s1 + $0x350] sm:$0xff]  ;;  %v1528_v10 = vld [vmem:[%s2455_s1 + $0x358] sm:$0xff] }
  0x2d   : > { %1708 = vmatprep.mubr.msk.bf16.mxu1 %vm1869_vm0, %v1868_v5  ;;  %v1122_v12 = vpack.c.bf16 %v1528_v10, %v1527_v9  ;;  %v1520_v21 = vld [vmem:[%s2455_s1 + $0x330] sm:$0xff] }
  0x2e   : > { %1691 = vmatpush3.bf16.msra.mxu0 %v481_v15  ;;  %v1474_v15 = vld [vmem:[%s2455_s1 + $0x220] sm:$0xff]  ;;  %v1542_v52 = vld [vmem:[%s2455_s1 + $0x3b0] sm:$0xff] }
  0x2f   : > { %1703 = vmatpush3.bf16.msra.mxu1 %v552_v17  ;;  %1692 = vmatprep.subr.bf16.mxu0 %v1868_v5  ;;  %v1485_v17 = vld [vmem:[%s2455_s1 + $0x260] sm:$0xff]  ;;  %v767_v20 = vpack.c.bf16 %v1475_v16, %v1474_v15  ;;  %v1530_v16 = vld [vmem:[%s2455_s1 + $0x368] sm:$0xff] }
  0x30   : > { %1704 = vmatprep.subr.bf16.mxu1 %v1868_v5  ;;  %v1529_v15 = vld [vmem:[%s2455_s1 + $0x360] sm:$0xff] }
  0x32   : > { %1693 = vmatpush3.bf16.msra.mxu0 %v482_v22  ;;  %v838_v22 = vpack.c.bf16 %v1486_v18, %v1485_v17  ;;  %v1856_v17 = vld [vmem:[%s1961_s19 + $0x18] ss:$8 sps:$4 sm:$0x33]  }
  0x33   : > { %1705 = vmatpush3.bf16.msra.mxu1 %v553_v25  ;;  %1694 = vmatprep.subr.bf16.mxu0 %v1868_v5  ;;  %v1477_v25 = vld [vmem:[%s2455_s1 + $0x238] sm:$0xff] }
  0x34   : > { %1706 = vmatprep.subr.bf16.mxu1 %v1868_v5  ;;  %v768_v29 = vpack.c.bf16 %v1477_v25, %v1476_v23  ;;  %v1531_v23 = vld [vmem:[%s2455_s1 + $0x370] sm:$0xff]  ;;  %v1532_v25 = vld [vmem:[%s2455_s1 + $0x378] sm:$0xff] }
  0x36   : > { %1695 = vmatpush3.bf16.msra.mxu0 %v483_v31  ;;  %v839_v31 = vpack.c.bf16 %v1488_v27, %v1487_v26  ;;  %v1038_v26 = vrot.slane %v1856_v17, %v1963_v24 }
  0x37   : > { %1707 = vmatpush3.bf16.msra.mxu1 %v554_v33  ;;  %1712 = vmatprep.subr.bf16.mxu0 %v1868_v5  ;;  %v1493_v33 = vld [vmem:[%s2455_s1 + $0x288] sm:$0xff] }
  0x38   : > { %1724 = vmatprep.subr.bf16.mxu1 %v1868_v5 }
  0x39   : > { %1697 = vmatmul.mubr.msk.bf16.vlgmr.msra.gmra.mrb[8].mxu0 %vm227_vm1, %v470_v38  ;;  %v907_v38 = vpack.c.bf16 %v1493_v33, %v1492_v32  ;;  %v1547_v32 = vld [vmem:[%s2455_s1 + $0x3c0] sm:$0xff]  ;;  %v1548_v33 = vld [vmem:[%s2455_s1 + $0x3c8] sm:$0xff] }
  0x3a   : > { %1709 = vmatmul.mubr.msk.bf16.vlgmr.msra.gmra.mrb[8].mxu1 %vm227_vm1, %v541_v39  ;;  %1713 = vmatpush3.bf16.msra.mxu0 %v622_v40  ;;  %v978_v39 = vpack.c.bf16 %v1504_v35, %v1503_v34  ;;  %v1494_v40 = vld [vmem:[%s2455_s1 + $0x290] sm:$0xff]  ;;  %v1040_v34 = vpack.c.bf16 %v1038_v26, %v1038_v26  ;;  %v1111_v35 = vpack.c.bf16 %v1109_v28, %v1109_v28 }
  0x3b   : > { %1725 = vmatpush3.bf16.msra.mxu1 %v693_v41  ;;  %1714 = vmatprep.subr.bf16.mxu0 %v1868_v5  ;;  %v1495_v41 = vld [vmem:[%s2455_s1 + $0x298] sm:$0xff] }
  0x3c   : > { %1726 = vmatprep.subr.bf16.mxu1 %v1868_v5  ;;  %1720 = vmatprep.mubr.msk.bf16.mxu0 %vm1869_vm0, %v1868_v5  ;;  %v908_v44 = vpack.c.bf16 %v1495_v41, %v1494_v40  ;;  %v1549_v40 = vld [vmem:[%s2455_s1 + $0x3d0] sm:$0xff]  ;;  %v1550_v41 = vld [vmem:[%s2455_s1 + $0x3d8] sm:$0xff] }
  0x3d   : > { %1732 = vmatprep.mubr.msk.bf16.mxu1 %vm1869_vm0, %v1868_v5  ;;  %v1264_v43 = vpack.c.bf16 %v1550_v41, %v1549_v40 }
  0x3e   : > { %1715 = vmatpush3.bf16.msra.mxu0 %v623_v46  ;;  %v1496_v46 = vld [vmem:[%s2455_s1 + $0x2a0] sm:$0xff] }
  0x3f   : > { %1727 = vmatpush3.bf16.msra.mxu1 %v694_v47  ;;  %1716 = vmatprep.subr.bf16.mxu0 %v1868_v5  ;;  %v1497_v47 = vld [vmem:[%s2455_s1 + $0x2a8] sm:$0xff] }
  0x40   : > { %1728 = vmatprep.subr.bf16.mxu1 %v1868_v5  ;;  %v909_v51 = vpack.c.bf16 %v1497_v47, %v1496_v46  ;;  %v1551_v46 = vld [vmem:[%s2455_s1 + $0x3e0] sm:$0xff]  ;;  %v1552_v47 = vld [vmem:[%s2455_s1 + $0x3e8] sm:$0xff] }
  0x42   : > { %1717 = vmatpush3.bf16.msra.mxu0 %v624_v53  ;;  %v980_v53 = vpack.c.bf16 %v1508_v49, %v1507_v48  ;;  %v1858_v48 = vld [vmem:[%s1961_s19 + $0x1a] ss:$8 sps:$4 sm:$0x33]  }
  0x43   : > { %1729 = vmatpush3.bf16.msra.mxu1 %v695_v55  ;;  %1718 = vmatprep.subr.bf16.mxu0 %v1868_v5  ;;  %v1499_v55 = vld [vmem:[%s2455_s1 + $0x2b8] sm:$0xff] }
  0x44   : > { %1730 = vmatprep.subr.bf16.mxu1 %v1868_v5  ;;  %v910_v59 = vpack.c.bf16 %v1499_v55, %v1498_v54  ;;  %v1553_v54 = vld [vmem:[%s2455_s1 + $0x3f0] sm:$0xff]  ;;  %v1554_v55 = vld [vmem:[%s2455_s1 + $0x3f8] sm:$0xff] }
  0x46   : > { %1719 = vmatpush3.bf16.msra.mxu0 %v625_v61  ;;  %v981_v61 = vpack.c.bf16 %v1510_v57, %v1509_v56  ;;  %v1180_v56 = vrot.slane %v1858_v48, %v1963_v24 }
  0x47   : > { %1731 = vmatpush3.bf16.msra.mxu1 %v696_v63  ;;  %1736 = vmatprep.subr.bf16.mxu0 %v1868_v5  ;;  %v1515_v63 = vld [vmem:[%s2455_s1 + $0x308] sm:$0xff] }
  0x48   : > { %1748 = vmatprep.subr.bf16.mxu1 %v1868_v5  ;;  %v1182_v60 = vpack.c.bf16 %v1180_v56, %v1180_v56 }
  0x49   : > { %1721 = vmatmul.mubr.msk.bf16.vlgmr.msra.gmra.mrb[12].mxu0 %vm227_vm1, %v612_v4  ;;  %v1050_v4 = vpack.c.bf16 %v1515_v63, %v1514_v62 }
  0x4a   : > { %1733 = vmatmul.mubr.msk.bf16.vlgmr.msra.gmra.mrb[12].mxu1 %vm227_vm1, %v683_v6  ;;  %1737 = vmatpush3.bf16.msra.mxu0 %v765_v7  ;;  %v1121_v6 = vpack.c.bf16 %v1526_v1, %v1525_v0  ;;  %v1516_v7 = vld [vmem:[%s2455_s1 + $0x310] sm:$0xff] }
  0x4b   : > { %1749 = vmatpush3.bf16.msra.mxu1 %v836_v8  ;;  %1738 = vmatprep.subr.bf16.mxu0 %v1868_v5  ;;  %v1517_v8 = vld [vmem:[%s2455_s1 + $0x318] sm:$0xff] }
  0x4c   : > { %1750 = vmatprep.subr.bf16.mxu1 %v1868_v5  ;;  %1744 = vmatprep.mubr.msk.bf16.mxu0 %vm1869_vm0, %v1868_v5  ;;  %v1051_v11 = vpack.c.bf16 %v1517_v8, %v1516_v7 }
  0x4d   : > { %1756 = vmatprep.mubr.msk.bf16.mxu1 %vm1869_vm0, %v1868_v5 }
  0x4e   : > { %1739 = vmatpush3.bf16.msra.mxu0 %v766_v13  ;;  %v1518_v13 = vld [vmem:[%s2455_s1 + $0x320] sm:$0xff] }
  0x4f   : > { %1751 = vmatpush3.bf16.msra.mxu1 %v837_v14  ;;  %1740 = vmatprep.subr.bf16.mxu0 %v1868_v5  ;;  %v1519_v14 = vld [vmem:[%s2455_s1 + $0x328] sm:$0xff] }
  0x50   : > { %1752 = vmatprep.subr.bf16.mxu1 %v1868_v5  ;;  %v1052_v18 = vpack.c.bf16 %v1519_v14, %v1518_v13 }
  0x52   : > { %1741 = vmatpush3.bf16.msra.mxu0 %v767_v20  ;;  %v1123_v20 = vpack.c.bf16 %v1530_v16, %v1529_v15 }
  0x53   : > { %1753 = vmatpush3.bf16.msra.mxu1 %v838_v22  ;;  %1742 = vmatprep.subr.bf16.mxu0 %v1868_v5  ;;  %v1521_v22 = vld [vmem:[%s2455_s1 + $0x338] sm:$0xff] }
  0x54   : > { %1754 = vmatprep.subr.bf16.mxu1 %v1868_v5  ;;  %v1053_v27 = vpack.c.bf16 %v1521_v22, %v1520_v21 }
  0x56   : > { %1743 = vmatpush3.bf16.msra.mxu0 %v768_v29  ;;  %v1124_v29 = vpack.c.bf16 %v1532_v25, %v1531_v23 }
  0x57   : > { %1755 = vmatpush3.bf16.msra.mxu1 %v839_v31  ;;  %1760 = vmatprep.subr.bf16.mxu0 %v1868_v5  ;;  %v1537_v31 = vld [vmem:[%s2455_s1 + $0x388] sm:$0xff] }
  0x58   : > { %1772 = vmatprep.subr.bf16.mxu1 %v1868_v5 }
  0x59   : > { %1745 = vmatmul.mubr.msk.bf16.vlgmr.msra.gmra.mrb[16].mxu0 %vm227_vm1, %v755_v36  ;;  %v1192_v36 = vpack.c.bf16 %v1537_v31, %v1536_v30 }
  0x5a   : > { %1757 = vmatmul.mubr.msk.bf16.vlgmr.msra.gmra.mrb[16].mxu1 %vm227_vm1, %v826_v37  ;;  %1761 = vmatpush3.bf16.msra.mxu0 %v907_v38  ;;  %v1263_v37 = vpack.c.bf16 %v1548_v33, %v1547_v32  ;;  %v1538_v38 = vld [vmem:[%s2455_s1 + $0x390] sm:$0xff] }
  0x5b   : > { %1773 = vmatpush3.bf16.msra.mxu1 %v978_v39  ;;  %1762 = vmatprep.subr.bf16.mxu0 %v1868_v5  ;;  %v1539_v39 = vld [vmem:[%s2455_s1 + $0x398] sm:$0xff] }
  0x5c   : > { %1774 = vmatprep.subr.bf16.mxu1 %v1868_v5  ;;  %1768 = vmatprep.mubr.msk.bf16.mxu0 %vm1869_vm0, %v1868_v5  ;;  %v1193_v42 = vpack.c.bf16 %v1539_v39, %v1538_v38 }
  0x5d   : > { %1780 = vmatprep.mubr.msk.bf16.mxu1 %vm1869_vm0, %v1868_v5 }
  0x5e   : > { %1763 = vmatpush3.bf16.msra.mxu0 %v908_v44  ;;  %v1540_v44 = vld [vmem:[%s2455_s1 + $0x3a0] sm:$0xff] }
  0x5f   : > { %1775 = vmatpush3.bf16.msra.mxu1 %v979_v45  ;;  %1764 = vmatprep.subr.bf16.mxu0 %v1868_v5  ;;  %v1541_v45 = vld [vmem:[%s2455_s1 + $0x3a8] sm:$0xff] }
  0x60   : > { %1776 = vmatprep.subr.bf16.mxu1 %v1868_v5  ;;  %v1194_v49 = vpack.c.bf16 %v1541_v45, %v1540_v44 }
  0x62   : > { %1765 = vmatpush3.bf16.msra.mxu0 %v909_v51  ;;  %v1265_v51 = vpack.c.bf16 %v1552_v47, %v1551_v46 }
  0x63   : > { %1777 = vmatpush3.bf16.msra.mxu1 %v980_v53  ;;  %1766 = vmatprep.subr.bf16.mxu0 %v1868_v5  ;;  %v1543_v53 = vld [vmem:[%s2455_s1 + $0x3b8] sm:$0xff] }
  0x64   : > { %1778 = vmatprep.subr.bf16.mxu1 %v1868_v5  ;;  %v1195_v57 = vpack.c.bf16 %v1543_v53, %v1542_v52 }
  0x66   : > { %1767 = vmatpush3.bf16.msra.mxu0 %v910_v59  ;;  %v1266_v59 = vpack.c.bf16 %v1554_v55, %v1553_v54 }
  0x67   : > { %1779 = vmatpush3.bf16.msra.mxu1 %v981_v61  ;;  %1784 = vmatprep.subr.bf16.mxu0 %v1868_v5  ;;  %v1253_v61 = vpack.c.bf16 %v1251_v58, %v1251_v58 }
  0x68   : > { %1796 = vmatprep.subr.bf16.mxu1 %v1868_v5 }
  0x69   : > { %1769 = vmatmul.mubr.msk.bf16.vlgmr.msra.gmra.mrb[20].mxu0 %vm227_vm1, %v897_v2 }
  0x6a   : > { %1781 = vmatmul.mubr.msk.bf16.vlgmr.msra.gmra.mrb[20].mxu1 %vm227_vm1, %v968_v3  ;;  %1785 = vmatpush3.bf16.msra.mxu0 %v1050_v4 }
  0x6b   : > { %1797 = vmatpush3.bf16.msra.mxu1 %v1121_v6  ;;  %1786 = vmatprep.subr.bf16.mxu0 %v1868_v5 }
  0x6c   : > { %1798 = vmatprep.subr.bf16.mxu1 %v1868_v5  ;;  %1792 = vmatprep.mubr.msk.bf16.mxu0 %vm1869_vm0, %v1868_v5 }
  0x6d   : > { %1804 = vmatprep.mubr.msk.bf16.mxu1 %vm1869_vm0, %v1868_v5 }
  0x6e   : > { %1787 = vmatpush3.bf16.msra.mxu0 %v1051_v11 }
  0x6f   : > { %1799 = vmatpush3.bf16.msra.mxu1 %v1122_v12  ;;  %1788 = vmatprep.subr.bf16.mxu0 %v1868_v5 }
  0x70   : > { %1800 = vmatprep.subr.bf16.mxu1 %v1868_v5 }
  0x72   : > { %1789 = vmatpush3.bf16.msra.mxu0 %v1052_v18 }
  0x73   : > { %1801 = vmatpush3.bf16.msra.mxu1 %v1123_v20  ;;  %1790 = vmatprep.subr.bf16.mxu0 %v1868_v5 }
  0x74   : > { %1802 = vmatprep.subr.bf16.mxu1 %v1868_v5 }
  0x76   : > { %1791 = vmatpush3.bf16.msra.mxu0 %v1053_v27 }
  0x77   : > { %1803 = vmatpush3.bf16.msra.mxu1 %v1124_v29  ;;  %1808 = vmatprep.subr.bf16.mxu0 %v1868_v5 }
  0x78   : > { %1820 = vmatprep.subr.bf16.mxu1 %v1868_v5 }
  0x79   : > { %1793 = vmatmul.mubr.msk.bf16.vlgmr.msra.gmra.mrb[24].mxu0 %vm227_vm1, %v1040_v34 }
  0x7a   : > { %1805 = vmatmul.mubr.msk.bf16.vlgmr.msra.gmra.mrb[24].mxu1 %vm227_vm1, %v1111_v35  ;;  %1809 = vmatpush3.bf16.msra.mxu0 %v1192_v36 }
  0x7b   : > { %1821 = vmatpush3.bf16.msra.mxu1 %v1263_v37  ;;  %1810 = vmatprep.subr.bf16.mxu0 %v1868_v5 }
  0x7c   : > { %1822 = vmatprep.subr.bf16.mxu1 %v1868_v5  ;;  %1816 = vmatprep.mubr.msk.bf16.mxu0 %vm1869_vm0, %v1868_v5 }
  0x7d   : > { %1828 = vmatprep.mubr.msk.bf16.mxu1 %vm1869_vm0, %v1868_v5 }
  0x7e   : > { %1811 = vmatpush3.bf16.msra.mxu0 %v1193_v42 }
  0x7f   : > { %1823 = vmatpush3.bf16.msra.mxu1 %v1264_v43  ;;  %1812 = vmatprep.subr.bf16.mxu0 %v1868_v5 }
  0x80   : > { %1824 = vmatprep.subr.bf16.mxu1 %v1868_v5 }
  0x82   : > { %1813 = vmatpush3.bf16.msra.mxu0 %v1194_v49 }
  0x83   : > { %1825 = vmatpush3.bf16.msra.mxu1 %v1265_v51  ;;  %1814 = vmatprep.subr.bf16.mxu0 %v1868_v5 }
  0x84   : > { %1826 = vmatprep.subr.bf16.mxu1 %v1868_v5 }
  0x86   : > { %1815 = vmatpush3.bf16.msra.mxu0 %v1195_v57 }
  0x87   : > { %1827 = vmatpush3.bf16.msra.mxu1 %v1266_v59 }
  0x89   : > { %1817 = vmatmul.mubr.msk.bf16.vlgmr.msra.gmra.mrb[28].mxu0 %vm227_vm1, %v1182_v60 }
  0x8a   : > { %1829 = vmatmul.mubr.msk.bf16.vlgmr.msra.gmra.mrb[28].mxu1 %vm227_vm1, %v1253_v61 }
  0xec   : > { %v265_v62 = vpop.f32.mrb[0].mxu0 }
  0xed   : > { %v308_v63 = vpop.f32.mrb[0].mxu1  ;;  %v1650_v0 = vpop.f32.mrb[1].mxu0 }
  0xee   : > { %v309_v1 = vadd.f32 %v308_v63, %v265_v62  ;;  %v1662_v2 = vpop.f32.mrb[1].mxu1  ;;  %v268_v3 = vpop.f32.mrb[2].mxu0 }
  0xef   : > { %v311_v4 = vpop.f32.mrb[2].mxu1  ;;  %v1651_v6 = vpop.f32.mrb[3].mxu0 }
  0xf0   : > { %v1663_v7 = vpop.f32.mrb[3].mxu1 }
  0xfc   : > { %v378_v8 = vpop.f32.mrb[4].mxu0 }
  0xfd   : > { %v384_v9 = vadd.f32 %v378_v8, %v309_v1  ;;  %v449_v5 = vpop.f32.mrb[4].mxu1  ;;  %v1674_v10 = vpop.f32.mrb[5].mxu0 }
  0xfe   : > { %v1686_v11 = vpop.f32.mrb[5].mxu1  ;;  %v381_v12 = vpop.f32.mrb[6].mxu0 }
  0xff   : > { %v455_v13 = vadd.f32 %v449_v5, %v384_v9  ;;  %v452_v14 = vpop.f32.mrb[6].mxu1  ;;  %v1675_v15 = vpop.f32.mrb[7].mxu0  ;;  %v1556_v9 = vld [vmem:[#allocation2] ss:$0 sm:$0xff] }
 0x100   : > { %v1687_v16 = vpop.f32.mrb[7].mxu1 }
 0x10c   : > { %v521_v17 = vpop.f32.mrb[8].mxu0 }
 0x10d   : > { %v527_v18 = vadd.f32 %v521_v17, %v455_v13  ;;  %v592_v19 = vpop.f32.mrb[8].mxu1  ;;  %v1698_v20 = vpop.f32.mrb[9].mxu0 }
 0x10e   : > { %v1710_v21 = vpop.f32.mrb[9].mxu1  ;;  %v524_v22 = vpop.f32.mrb[10].mxu0 }
 0x10f   : > { %v598_v23 = vadd.f32 %v592_v19, %v527_v18  ;;  %v595_v25 = vpop.f32.mrb[10].mxu1  ;;  %v1699_v26 = vpop.f32.mrb[11].mxu0 }
 0x110   : > { %v1711_v27 = vpop.f32.mrb[11].mxu1 }
 0x11c   : > { %v663_v28 = vpop.f32.mrb[12].mxu0 }
 0x11d   : > { %v669_v29 = vadd.f32 %v663_v28, %v598_v23  ;;  %v734_v30 = vpop.f32.mrb[12].mxu1  ;;  %v1722_v31 = vpop.f32.mrb[13].mxu0 }
 0x11e   : > { %v1734_v32 = vpop.f32.mrb[13].mxu1  ;;  %v666_v33 = vpop.f32.mrb[14].mxu0 }
 0x11f   : > { %v740_v34 = vadd.f32 %v734_v30, %v669_v29  ;;  %v737_v35 = vpop.f32.mrb[14].mxu1  ;;  %v1723_v36 = vpop.f32.mrb[15].mxu0 }
 0x120   : > { %v1735_v37 = vpop.f32.mrb[15].mxu1 }
 0x12c   : > { %v806_v38 = vpop.f32.mrb[16].mxu0 }
 0x12d   : > { %v812_v39 = vadd.f32 %v806_v38, %v740_v34  ;;  %v877_v40 = vpop.f32.mrb[16].mxu1  ;;  %v1746_v41 = vpop.f32.mrb[17].mxu0 }
 0x12e   : > { %v1758_v42 = vpop.f32.mrb[17].mxu1  ;;  %v809_v43 = vpop.f32.mrb[18].mxu0 }
 0x12f   : > { %v883_v44 = vadd.f32 %v877_v40, %v812_v39  ;;  %v880_v45 = vpop.f32.mrb[18].mxu1  ;;  %v1747_v46 = vpop.f32.mrb[19].mxu0 }
 0x130   : > { %v1759_v47 = vpop.f32.mrb[19].mxu1 }
 0x13c   : > { %v948_v48 = vpop.f32.mrb[20].mxu0 }
 0x13d   : > { %v954_v49 = vadd.f32 %v948_v48, %v883_v44  ;;  %v1019_v50 = vpop.f32.mrb[20].mxu1  ;;  %v1770_v51 = vpop.f32.mrb[21].mxu0 }
 0x13e   : > { %v1782_v52 = vpop.f32.mrb[21].mxu1  ;;  %v951_v53 = vpop.f32.mrb[22].mxu0 }
 0x13f   : > { %v1025_v54 = vadd.f32 %v1019_v50, %v954_v49  ;;  %v1022_v55 = vpop.f32.mrb[22].mxu1  ;;  %v1771_v56 = vpop.f32.mrb[23].mxu0 }
 0x140   : > { %v1783_v57 = vpop.f32.mrb[23].mxu1 }
 0x14c   : > { %v1091_v58 = vpop.f32.mrb[24].mxu0 }
 0x14d   : > { %v1097_v59 = vadd.f32 %v1091_v58, %v1025_v54  ;;  %v1162_v60 = vpop.f32.mrb[24].mxu1  ;;  %v1794_v61 = vpop.f32.mrb[25].mxu0 }
 0x14e   : > { %v1806_v62 = vpop.f32.mrb[25].mxu1  ;;  %v1094_v63 = vpop.f32.mrb[26].mxu0 }
 0x14f   : > { %v1168_v0 = vadd.f32 %v1162_v60, %v1097_v59  ;;  %v1165_v1 = vpop.f32.mrb[26].mxu1  ;;  %v1795_v2 = vpop.f32.mrb[27].mxu0 }
 0x150   : > { %v1807_v3 = vpop.f32.mrb[27].mxu1 }
 0x15c   : > { %v1233_v4 = vpop.f32.mrb[28].mxu0 }
 0x15d   : > { %v1239_v6 = vadd.f32 %v1233_v4, %v1168_v0  ;;  %v1304_v7 = vpop.f32.mrb[28].mxu1  ;;  %v1818_v8 = vpop.f32.mrb[29].mxu0 }
 0x15e   : > { %v1830_v5 = vpop.f32.mrb[29].mxu1  ;;  %v1236_v10 = vpop.f32.mrb[30].mxu0 }
 0x15f   : > { %v1310_v11 = vadd.f32 %v1304_v7, %v1239_v6  ;;  %v1307_v12 = vpop.f32.mrb[30].mxu1  ;;  %v1819_v13 = vpop.f32.mrb[31].mxu0 }
 0x160   : > { %v1831_v14 = vpop.f32.mrb[31].mxu1 }
 0x161   : > { %v1318_v15 = vadd.f32 %v1556_v9, %v1310_v11 }
 0x163   : > { %v1326_v16 = vrot.slane %v1318_v15, %v1963_v24 }
 0x165   : > { %v1327_v17 = vcombine.high %v1326_v16, %v1326_v16  ;;  %1331 = vst.msk [vmem:[%s172_s27] sm:$0x3] %vm1330_vm2, %v1326_v16 }
 0x167   : > { %1332 = vst.msk [vmem:[%s172_s27 + $0x2] sm:$0x3] %vm1330_vm2, %v1327_v17 }
 0x168 PF: > { %s15_s14 = sadd.s32 1, %s1866_s14  }
 0x169   : > { %p12_p4 = scmp.ge.s32.totalorder %s15_s14, 4  }
 0x16b   :  { %14 = sbr.rel (!%p12_p4) target bundleno = 3 (0x3), region = 80 }

// kernel: discriminator_forward.8
= control target key start
LH: loop header
LB: loop body
LE: loop exit
PB: predicated region body
PF: predicated region fallthrough
CT: control target
= control target key end

     0   :  { %s3877_s12 = smov 0   ;;  %s4764_s0 = inlined_call_operand.vmem [shape: f32[2,6,6,32], index: 0, kind: input, shape index: {}]   ;;  %s4765_s1 = inlined_call_operand.vmem [shape: f32[16,32,64], index: 1, kind: input, shape index: {}]   ;;  %s4766_s2 = inlined_call_operand.vmem [shape: f32[1,64], index: 2, kind: input, shape index: {}]   ;;  %s4767_s3 = inlined_call_operand.vmem [shape: f32[2,3,3,64], index: 3, kind: output, shape index: {}]  }
   0x1 LB: > { %s3486_s13 = sadd.s32 4294967295, %s3852_s12   ;;  %p3490_p0 = scmp.ge.s32.totalorder %s3852_s12, 1  ;;  %s3852_s12 = sphi %s3877_s12, %s13_s12  }
   0x2   : > { %p137_p1 = scmp.lt.s32.totalorder %s3852_s12, 3 }
   0x4   : > { %p138_p2 = pnand %p3490_p0, %p137_p1 }
   0x5   : > { %v3499_v0 = vld [vmem:[%s4765_s1 + $0x20] sm:$0xff] (!%p138_p2)  ;;  %v3500_v1 = vld [vmem:[%s4765_s1 + $0x28] sm:$0xff] (!%p138_p2)  ;;  %p3894_p3 = scmp.lt.s32.totalorder (!%p138_p2), %s3486_s13, 1  ;;  %v189_v3 = vlaneseq (!%p138_p2)  ;;  %v3854_v4 = vmov (!%p138_p2), 0.0   ;;  %v3501_v7 = vld [vmem:[%s4765_s1 + $0x30] sm:$0xff] (!%p138_p2)  ;;  %vm3855_vm0 = vmmov (!%p138_p2), 0  }
   0x6   : > { %141 = sbr.rel (%p138_p2) target bundleno = 357 (0x165), region = 32  ;;  %v313_v2 = vld [vmem:[%s4765_s1] sm:$0xff] (!%p138_p2)  ;;  %3705 = vmatprep.subr.bf16.mxu0 (!%p138_p2), %v3854_v4  ;;  %v465_v5 = vpack.c.bf16 (!%p138_p2), %v3500_v1, %v3499_v0  ;;  %3713 = vmatprep.subr.bf16.mxu1 (!%p138_p2), %v3854_v4  ;;  %v314_v6 = vld [vmem:[%s4765_s1 + $0x8] sm:$0xff] (!%p138_p2)  ;;  %v3502_v8 = vld [vmem:[%s4765_s1 + $0x38] sm:$0xff] (!%p138_p2)  ;;  %v3856_v12 = vmov (!%p138_p2), 1966171168  }
   0x7   : > { %v317_v9 = vpack.c.bf16 (!%p138_p2), %v314_v6, %v313_v2  ;;  %v315_v10 = vld [vmem:[%s4765_s1 + $0x10] sm:$0xff] (!%p138_p2)  ;;  %v316_v11 = vld [vmem:[%s4765_s1 + $0x18] sm:$0xff] (!%p138_p2)  ;;  %3709 = vmatprep.mubr.msk.bf16.mxu0 (!%p138_p2), %vm3855_vm0, %v3854_v4  ;;  %3717 = vmatprep.mubr.msk.bf16.mxu1 (!%p138_p2), %vm3855_vm0, %v3854_v4  ;;  %v187_v13 = vunpack.c.l.s4 (!%p138_p2), %v3856_v12  ;;  %v190_v14 = vshrl.u32 (!%p138_p2), %v189_v3, 7  ;;  %v3926_v15 = vld [vmem:[%s4765_s1 + $0x40] sm:$0xff] (!%p138_p2)  ;;  %v466_v16 = vpack.c.bf16 (!%p138_p2), %v3502_v8, %v3501_v7 }
   0x8   : > { %3706 = vmatpush3.bf16.msra.mxu0 (!%p138_p2), %v465_v5  ;;  %v3931_v17 = vld [vmem:[%s4765_s1 + $0x48] sm:$0xff] (!%p138_p2)  ;;  %v3936_v18 = vld [vmem:[%s4765_s1 + $0x60] sm:$0xff] (!%p138_p2)  ;;  %v318_v20 = vpack.c.bf16 (!%p138_p2), %v316_v11, %v315_v10  ;;  %v3948_v22 = vld [vmem:[%s4765_s1 + $0x50] sm:$0xff] (!%p138_p2)  ;;  %vm467_vm1 = vcmask (!%p138_p2), 261120   ;;  %vm3427_vm4 = vcmask (!%p138_p2), 518144  }
   0x9   : > { %v3941_v19 = vld [vmem:[%s4765_s1 + $0x68] sm:$0xff] (!%p138_p2)  ;;  %3714 = vmatpush3.bf16.msra.mxu1 (!%p138_p2), %v317_v9  ;;  %3707 = vmatprep.subr.bf16.mxu0 (!%p138_p2), %v3854_v4  ;;  %v188_v21 = vunpack.c.0.s8 (!%p138_p2), %v187_v13  ;;  %v3953_v23 = vld [vmem:[%s4765_s1 + $0x58] sm:$0xff] (!%p138_p2)  ;;  %v3958_v24 = vld [vmem:[%s4765_s1 + $0x70] sm:$0xff] (!%p138_p2)  ;;  %v702_v33 = vpack.c.bf16 (!%p138_p2), %v3931_v17, %v3926_v15 }
   0xa   : > { %3715 = vmatprep.subr.bf16.mxu1 (!%p138_p2), %v3854_v4  ;;  %v3964_v25 = vld [vmem:[%s4765_s1 + $0x78] sm:$0xff] (!%p138_p2)  ;;  %v3969_v26 = vld [vmem:[%s4765_s1 + $0x80] sm:$0xff] (!%p138_p2)  ;;  %v3974_v27 = vld [vmem:[%s4765_s1 + $0x88] sm:$0xff] (!%p138_p2)  ;;  %v896_v34 = vpack.c.bf16 (!%p138_p2), %v3941_v19, %v3936_v18  ;;  %v703_v35 = vpack.c.bf16 (!%p138_p2), %v3953_v23, %v3948_v22 }
   0xb   : > { %v3981_v28 = vsub.s32 (!%p138_p2), %v188_v21, %v190_v14  ;;  %v3986_v29 = vld [vmem:[%s4765_s1 + $0xa0] sm:$0xff] (!%p138_p2)  ;;  %v3991_v30 = vld [vmem:[%s4765_s1 + $0xa8] sm:$0xff] (!%p138_p2)  ;;  %v3996_v31 = vld [vmem:[%s4765_s1 + $0x90] sm:$0xff] (!%p138_p2)  ;;  %v897_v36 = vpack.c.bf16 (!%p138_p2), %v3964_v25, %v3958_v24  ;;  %v1091_v41 = vpack.c.bf16 (!%p138_p2), %v3974_v27, %v3969_v26 }
   0xc   : > { %3708 = vmatpush3.bf16.msra.mxu0 (!%p138_p2), %v466_v16  ;;  %v4010_v37 = vld [vmem:[%s4765_s1 + $0x98] sm:$0xff] (!%p138_p2)  ;;  %v1285_v45 = vpack.c.bf16 (!%p138_p2), %v3991_v30, %v3986_v29 }
   0xd   : > { %s4770_s13 = smov (!%p3894_p3, %s3486_s13), 1  ;;  %3716 = vmatpush3.bf16.msra.mxu1 %v318_v20  ;;  %3721 = vmatprep.subr.bf16.mxu0 %v3854_v4  ;;  %v1092_v46 = vpack.c.bf16 %v4010_v37, %v3996_v31 }
   0xe   : > { %s3833_s14 = smul.u32 48, %s4770_s13  ;;  %3729 = vmatprep.subr.bf16.mxu1 %v3854_v4 }
   0xf   : > { %s3834_s26 = smul.u32 12, %s4770_s13 }
  0x10   : > { %s3979_s29 = scalar_lea.vmem %s4764_s0, %s3833_s14 }
  0x11   : > { %v3496_v32 = vld.sshfl [vmem:[%s3979_s29 + $0x1] sm:$0x13 pattern:$0x75316420]  ;;  %s170_s30 = scalar_lea.vmem %s4767_s3, %s3834_s26 }
  0x12   : > { %v3497_v38 = vld.sshfl [vmem:[%s3979_s29 + $0x9] sm:$0x13 pattern:$0x75316420]  ;;  %v332_v39 = vcombine.high %v3496_v32, %v3496_v32  ;;  %v339_v40 = vrot.slane %v3496_v32, %v3981_v28 }
  0x13   : > { %v3498_v42 = vld.sshfl [vmem:[%s3979_s29 + $0x11] sm:$0x13 pattern:$0x75316420]  ;;  %v355_v43 = vcombine.high %v3497_v38, %v3497_v38  ;;  %v4019_v44 = vrot.slane %v3497_v38, %v3981_v28 }
  0x14   : > { %v346_v47 = vrot.slane %v332_v39, %v3981_v28  ;;  %v347_v48 = vcombine.high %v339_v40, %v339_v40  ;;  %v378_v49 = vcombine.high %v3498_v42, %v3498_v42  ;;  %v4028_v50 = vrot.slane %v3498_v42, %v3981_v28  ;;  %v3493_v51 = vld.sshfl [vmem:[%s3979_s29] sm:$0x13 pattern:$0x75316420] }
  0x15   : > { %v4032_v52 = vrot.slane %v355_v43, %v3981_v28  ;;  %v4036_v53 = vcombine.high %v4019_v44, %v4019_v44  ;;  %v3494_v54 = vld.sshfl [vmem:[%s3979_s29 + $0x8] sm:$0x13 pattern:$0x75316420]  ;;  %v185_v55 = vcombine.high %v3493_v51, %v3493_v51  ;;  %v192_v56 = vrot.slane %v3493_v51, %v3981_v28 }
  0x16   : > { %v4041_v57 = vrot.slane %v378_v49, %v3981_v28  ;;  %v4045_v58 = vcombine.high %v4028_v50, %v4028_v50  ;;  %v394_v59 = vcombine.low %v339_v40, %v346_v47  ;;  %v395_v60 = vcombine.low %v347_v48, %v4019_v44  ;;  %v3495_v61 = vld.sshfl [vmem:[%s3979_s29 + $0x10] sm:$0x13 pattern:$0x75316420] }
  0x17   : > { %v396_v62 = vcombine.low %v4032_v52, %v4036_v53  ;;  %v199_v63 = vrot.slane %v185_v55, %v3981_v28  ;;  %v200_v0 = vcombine.high %v192_v56, %v192_v56  ;;  %v208_v1 = vcombine.high %v3494_v54, %v3494_v54  ;;  %v3505_v11 = vld.sshfl [vmem:[%s3979_s29 + $0x2] sm:$0x13 pattern:$0x75316420] }
  0x18   : > { %v397_v2 = vcombine.low %v4028_v50, %v4041_v57  ;;  %v404_v3 = vrot.slane %v394_v59, %v3981_v28  ;;  %v411_v5 = vrot.slane %v395_v60, %v3981_v28  ;;  %v449_v6 = vrot.slane %v4045_v58, %v3981_v28  ;;  %v3506_v43 = vld.sshfl [vmem:[%s3979_s29 + $0xa] sm:$0x13 pattern:$0x75316420] }
  0x19   : > { %v418_v7 = vrot.slane %v396_v62, %v3981_v28  ;;  %v4060_v8 = vrot.slane %v3494_v54, %v3981_v28  ;;  %v4063_v9 = vrot.slane %v208_v1, %v3981_v28  ;;  %v231_v10 = vcombine.high %v3495_v61, %v3495_v61  ;;  %v3507_v59 = vld.sshfl [vmem:[%s3979_s29 + $0x12] sm:$0x13 pattern:$0x75316420] }
  0x1a   : > { %v4067_v12 = vrot.slane %v397_v2, %v3981_v28  ;;  %v426_v13 = vcombine.low %v404_v3, %v411_v5  ;;  %v456_v14 = vrot.slane %v449_v6, %v3981_v28  ;;  %v4071_v16 = vrot.slane %v3495_v61, %v3981_v28 }
  0x1b   : > { %v4075_v20 = vcombine.high %v4060_v8, %v4060_v8  ;;  %v4078_v21 = vrot.slane %v231_v10, %v3981_v28  ;;  %v247_v32 = vcombine.low %v192_v56, %v199_v63  ;;  %v248_v38 = vcombine.low %v200_v0, %v4060_v8 }
  0x1c   : > { %v427_v39 = vcombine.low %v418_v7, %v4067_v12  ;;  %v434_v40 = vrot.slane %v426_v13, %v3981_v28  ;;  %v4085_v42 = vcombine.high %v4071_v16, %v4071_v16  ;;  %v569_v47 = vcombine.high %v3505_v11, %v3505_v11  ;;  %v3513_v7 = vld.sshfl [vmem:[%s3979_s29 + $0x3] sm:$0x13 pattern:$0x75316420] }
  0x1d   : > { %v249_v48 = vcombine.low %v4063_v9, %v4075_v20  ;;  %v250_v49 = vcombine.low %v4071_v16, %v4078_v21  ;;  %v257_v51 = vrot.slane %v247_v32, %v3981_v28  ;;  %v264_v54 = vrot.slane %v248_v38, %v3981_v28 }
  0x1e   : > { %v441_v55 = vrot.slane %v427_v39, %v3981_v28  ;;  %v302_v56 = vrot.slane %v4085_v42, %v3981_v28  ;;  %v576_v60 = vrot.slane %v3505_v11, %v3981_v28  ;;  %v583_v61 = vrot.slane %v569_v47, %v3981_v28 }
  0x1f   : > { %v271_v62 = vrot.slane %v249_v48, %v3981_v28  ;;  %v4102_v63 = vrot.slane %v250_v49, %v3981_v28  ;;  %v279_v0 = vcombine.low %v257_v51, %v264_v54  ;;  %v592_v1 = vcombine.high %v3506_v43, %v3506_v43 }
  0x20   : > { %v442_v2 = vcombine.low %v434_v40, %v441_v55  ;;  %v309_v3 = vrot.slane %v302_v56, %v3981_v28  ;;  %v584_v5 = vcombine.high %v576_v60, %v576_v60  ;;  %v4106_v6 = vrot.slane %v3506_v43, %v3981_v28  ;;  %v3514_v56 = vld.sshfl [vmem:[%s3979_s29 + $0xb] sm:$0x13 pattern:$0x75316420] }
  0x21   : > { %v280_v10 = vcombine.low %v271_v62, %v4102_v63  ;;  %v287_v11 = vrot.slane %v279_v0, %v3981_v28  ;;  %v4112_v13 = vrot.slane %v592_v1, %v3981_v28  ;;  %v615_v32 = vcombine.high %v3507_v59, %v3507_v59  ;;  %v3515_v0 = vld.sshfl [vmem:[%s3979_s29 + $0x13] sm:$0x13 pattern:$0x75316420] }
  0x22   : > { %v459_v38 = vpack.c.bf16 %v456_v14, %v442_v2  ;;  %v4116_v39 = vcombine.high %v4106_v6, %v4106_v6  ;;  %v4119_v40 = vrot.slane %v3507_v59, %v3981_v28  ;;  %v631_v43 = vcombine.low %v576_v60, %v583_v61 }
  0x23   : > { %v294_v47 = vrot.slane %v280_v10, %v3981_v28  ;;  %v4123_v48 = vrot.slane %v615_v32, %v3981_v28  ;;  %v632_v49 = vcombine.low %v584_v5, %v4106_v6  ;;  %v763_v51 = vcombine.high %v3513_v7, %v3513_v7 }
  0x24   : > { %3710 = vmatmul.mubr.msk.bf16.vlgmr.msra.gmra.mrb[0].mxu0 %vm467_vm1, %v459_v38  ;;  %v4129_v14 = vcombine.high %v4119_v40, %v4119_v40  ;;  %v633_v54 = vcombine.low %v4112_v13, %v4116_v39  ;;  %v641_v55 = vrot.slane %v631_v43, %v3981_v28  ;;  %v770_v59 = vrot.slane %v3513_v7, %v3981_v28 }
  0x25   : > { %v295_v60 = vcombine.low %v287_v11, %v294_v47  ;;  %3722 = vmatpush3.bf16.msra.mxu0 %v702_v33  ;;  %3725 = vmatprep.mubr.msk.bf16.mxu0 %vm3855_vm0, %v3854_v4  ;;  %v634_v61 = vcombine.low %v4119_v40, %v4123_v48  ;;  %v648_v62 = vrot.slane %v632_v49, %v3981_v28 }
  0x26   : > { %3723 = vmatprep.subr.bf16.mxu0 %v3854_v4  ;;  %v655_v1 = vrot.slane %v633_v54, %v3981_v28  ;;  %v686_v2 = vrot.slane %v4129_v14, %v3981_v28  ;;  %v777_v15 = vrot.slane %v763_v51, %v3981_v28  ;;  %v778_v17 = vcombine.high %v770_v59, %v770_v59  ;;  %v3526_v51 = vld.sshfl [vmem:[%s3979_s29 + $0x18] sm:$0x13 pattern:$0x75316420] }
  0x27   : > { %v312_v33 = vpack.c.bf16 %v309_v3, %v295_v60  ;;  %v4151_v5 = vrot.slane %v634_v61, %v3981_v28  ;;  %v663_v7 = vcombine.low %v641_v55, %v648_v62  ;;  %v786_v10 = vcombine.high %v3514_v56, %v3514_v56 }
  0x28   : > { %v693_v11 = vrot.slane %v686_v2, %v3981_v28  ;;  %v4155_v32 = vrot.slane %v3514_v56, %v3981_v28  ;;  %v809_v38 = vcombine.high %v3515_v0, %v3515_v0  ;;  %v4158_v43 = vrot.slane %v3515_v0, %v3981_v28 }
  0x29   : > { %3718 = vmatmul.mubr.msk.bf16.vlgmr.msra.gmra.mrb[0].mxu1 %vm467_vm1, %v312_v33  ;;  %3724 = vmatpush3.bf16.msra.mxu0 %v703_v35  ;;  %v664_v3 = vcombine.low %v655_v1, %v4151_v5  ;;  %v671_v47 = vrot.slane %v663_v7, %v3981_v28  ;;  %v4167_v49 = vrot.slane %v786_v10, %v3981_v28  ;;  %v3537_v33 = vld.sshfl [vmem:[%s3979_s29 + $0x19] sm:$0x13 pattern:$0x75316420] }
  0x2a   : > { %3730 = vmatpush3.bf16.msra.mxu1 %v896_v34  ;;  %3733 = vmatprep.mubr.msk.bf16.mxu1 %vm3855_vm0, %v3854_v4  ;;  %v4177_v54 = vcombine.high %v4155_v32, %v4155_v32  ;;  %v4180_v22 = vrot.slane %v809_v38, %v3981_v28  ;;  %v4184_v23 = vcombine.high %v4158_v43, %v4158_v43 }
  0x2b   : > { %3731 = vmatprep.subr.bf16.mxu1 %v3854_v4  ;;  %3737 = vmatprep.subr.bf16.mxu0 %v3854_v4  ;;  %v678_v18 = vrot.slane %v664_v3, %v3981_v28  ;;  %v825_v19 = vcombine.low %v770_v59, %v777_v15  ;;  %v826_v34 = vcombine.low %v778_v17, %v4155_v32 }
  0x2c   : > { %v827_v35 = vcombine.low %v4167_v49, %v4177_v54  ;;  %v828_v55 = vcombine.low %v4158_v43, %v4180_v22  ;;  %v880_v56 = vrot.slane %v4184_v23, %v3981_v28  ;;  %v1004_v60 = vcombine.high %v3526_v51, %v3526_v51 }
  0x2d   : > { %v679_v61 = vcombine.low %v671_v47, %v678_v18  ;;  %v835_v62 = vrot.slane %v825_v19, %v3981_v28  ;;  %v842_v0 = vrot.slane %v826_v34, %v3981_v28  ;;  %v4199_v1 = vrot.slane %v3526_v51, %v3981_v28 }
  0x2e   : > { %3732 = vmatpush3.bf16.msra.mxu1 %v897_v36  ;;  %v849_v59 = vrot.slane %v827_v35, %v3981_v28  ;;  %v4206_v2 = vrot.slane %v828_v55, %v3981_v28  ;;  %v887_v15 = vrot.slane %v880_v56, %v3981_v28  ;;  %v4210_v17 = vrot.slane %v1004_v60, %v3981_v28  ;;  %v3541_v35 = vld [vmem:[%s4765_s1 + $0xb8] sm:$0xff] }
  0x2f   : > { %v696_v7 = vpack.c.bf16 %v693_v11, %v679_v61  ;;  %v857_v10 = vcombine.low %v835_v62, %v842_v0  ;;  %3745 = vmatprep.subr.bf16.mxu1 %v3854_v4  ;;  %v4216_v38 = vcombine.high %v4199_v1, %v4199_v1  ;;  %v1020_v24 = vcombine.low %v4060_v8, %v4063_v9  ;;  %v3549_v61 = vld [vmem:[%s4765_s1 + $0xc0] sm:$0xff] }
  0x30   : > { %v858_v25 = vcombine.low %v849_v59, %v4206_v2  ;;  %v1021_v36 = vcombine.low %v4075_v20, %v4071_v16  ;;  %v1022_v3 = vcombine.low %v4078_v21, %v4085_v42  ;;  %v1023_v11 = vcombine.low %v4199_v1, %v4210_v17 }
  0x31   : > { %3726 = vmatmul.mubr.msk.bf16.vlgmr.msra.gmra.mrb[4].mxu0 %vm467_vm1, %v696_v7  ;;  %v865_v47 = vrot.slane %v857_v10, %v3981_v28  ;;  %v1030_v51 = vrot.slane %v1020_v24, %v3981_v28  ;;  %v1075_v8 = vrot.slane %v4216_v38, %v3981_v28  ;;  %v1198_v9 = vcombine.high %v3537_v33, %v3537_v33  ;;  %v3551_v24 = vld [vmem:[%s4765_s1 + $0xd0] sm:$0xff] }
  0x32   : > { %v872_v18 = vrot.slane %v858_v25, %v3981_v28  ;;  %3738 = vmatpush3.bf16.msra.mxu0 %v1091_v41  ;;  %3741 = vmatprep.mubr.msk.bf16.mxu0 %vm3855_vm0, %v3854_v4  ;;  %v1037_v16 = vrot.slane %v1021_v36, %v3981_v28  ;;  %v1044_v20 = vrot.slane %v1022_v3, %v3981_v28  ;;  %v3540_v41 = vld [vmem:[%s4765_s1 + $0xb0] sm:$0xff]  ;;  %v3552_v25 = vld [vmem:[%s4765_s1 + $0xd8] sm:$0xff] }
  0x33   : > { %3739 = vmatprep.subr.bf16.mxu0 %v3854_v4  ;;  %v4242_v21 = vrot.slane %v1023_v11, %v3981_v28  ;;  %v1082_v19 = vrot.slane %v1075_v8, %v3981_v28  ;;  %v4246_v34 = vrot.slane %v3537_v33, %v3981_v28  ;;  %v4249_v26 = vrot.slane %v1198_v9, %v3981_v28  ;;  %v3548_v36 = vld.sshfl [vmem:[%s3979_s29 + $0x1a] sm:$0x13 pattern:$0x75316420] }
  0x34   : > { %v873_v27 = vcombine.low %v865_v47, %v872_v18  ;;  %v1052_v55 = vcombine.low %v1030_v51, %v1037_v16  ;;  %v1214_v56 = vcombine.low %v4019_v44, %v4032_v52  ;;  %v1215_v60 = vcombine.low %v4036_v53, %v4028_v50  ;;  %v3550_v44 = vld [vmem:[%s4765_s1 + $0xc8] sm:$0xff]  ;;  %v4279_v50 = vld [vmem:[%s4765_s1 + $0xe0] sm:$0xff]  ;;  %v3559_v16 = vld.sshfl [vmem:[%s3979_s29 + $0x1b] sm:$0x13 pattern:$0x75316420] }
  0x35   : > { %v1053_v62 = vcombine.low %v1044_v20, %v4242_v21  ;;  %v4267_v0 = vcombine.high %v4246_v34, %v4246_v34  ;;  %v1216_v59 = vcombine.low %v4041_v57, %v4045_v58  ;;  %v1217_v33 = vcombine.low %v4246_v34, %v4249_v26  ;;  %v4284_v52 = vld [vmem:[%s4765_s1 + $0xe8] sm:$0xff] }
  0x36   : > { %v890_v53 = vpack.c.bf16 %v887_v15, %v873_v27  ;;  %3740 = vmatpush3.bf16.msra.mxu0 %v1092_v46  ;;  %v1060_v57 = vrot.slane %v1052_v55, %v3981_v28  ;;  %v1224_v7 = vrot.slane %v1214_v56, %v3981_v28  ;;  %v1231_v10 = vrot.slane %v1215_v60, %v3981_v28  ;;  %v3563_v55 = vld [vmem:[%s4765_s1 + $0xf8] sm:$0xff] }
  0x37   : > { %3753 = vmatprep.subr.bf16.mxu0 %v3854_v4  ;;  %v1067_v31 = vrot.slane %v1053_v62, %v3981_v28  ;;  %v1238_v37 = vrot.slane %v1216_v59, %v3981_v28  ;;  %v4302_v46 = vrot.slane %v1217_v33, %v3981_v28  ;;  %v1269_v15 = vrot.slane %v4267_v0, %v3981_v28 }
  0x38   : > { %3734 = vmatmul.mubr.msk.bf16.vlgmr.msra.gmra.mrb[4].mxu1 %vm467_vm1, %v890_v53  ;;  %v1286_v3 = vpack.c.bf16 %v3541_v35, %v3540_v41  ;;  %v1246_v11 = vcombine.low %v1224_v7, %v1231_v10  ;;  %v1479_v47 = vpack.c.bf16 %v3550_v44, %v3549_v61  ;;  %v1673_v51 = vpack.c.bf16 %v4284_v52, %v4279_v50 }
  0x39   : > { %3746 = vmatpush3.bf16.msra.mxu1 %v1285_v45  ;;  %3749 = vmatprep.mubr.msk.bf16.mxu1 %vm3855_vm0, %v3854_v4  ;;  %v1068_v8 = vcombine.low %v1060_v57, %v1067_v31  ;;  %v1247_v9 = vcombine.low %v1238_v37, %v4302_v46  ;;  %v1480_v18 = vpack.c.bf16 %v3552_v25, %v3551_v24  ;;  %v3562_v45 = vld [vmem:[%s4765_s1 + $0xf0] sm:$0xff] }
  0x3a   : > { %3747 = vmatprep.subr.bf16.mxu1 %v3854_v4  ;;  %v1254_v20 = vrot.slane %v1246_v11, %v3981_v28  ;;  %v1276_v27 = vrot.slane %v1269_v15, %v3981_v28  ;;  %v1392_v41 = vcombine.high %v3548_v36, %v3548_v36  ;;  %v4321_v35 = vrot.slane %v3548_v36, %v3981_v28  ;;  %v3571_v15 = vld [vmem:[%s4765_s1 + $0x100] sm:$0xff]  ;;  %v4394_v36 = vld [vmem:[%s4765_s1 + $0x128] sm:$0xff]  ;;  %v4404_v11 = vld [vmem:[%s4765_s1 + $0x118] sm:$0xff] }
  0x3b   : > { %v1085_v29 = vpack.c.bf16 %v1082_v19, %v1068_v8  ;;  %v1261_v30 = vrot.slane %v1247_v9, %v3981_v28  ;;  %v1408_v56 = vcombine.low %v4106_v6, %v4112_v13  ;;  %v1409_v60 = vcombine.low %v4116_v39, %v4119_v40  ;;  %v3570_v9 = vld.sshfl [vmem:[%s3979_s29 + $0x20] sm:$0x13 pattern:$0x75316420] }
  0x3c   : > { %v4335_v61 = vrot.slane %v1392_v41, %v3981_v28  ;;  %v4339_v19 = vcombine.high %v4321_v35, %v4321_v35  ;;  %v1410_v62 = vcombine.low %v4123_v48, %v4129_v14  ;;  %v1586_v59 = vcombine.high %v3559_v16, %v3559_v16  ;;  %v3581_v41 = vld.sshfl [vmem:[%s3979_s29 + $0x21] sm:$0x13 pattern:$0x75316420] }
  0x3d   : > { %3748 = vmatpush3.bf16.msra.mxu1 %v1286_v3  ;;  %3742 = vmatmul.mubr.msk.bf16.vlgmr.msra.gmra.mrb[8].mxu0 %vm467_vm1, %v1085_v29  ;;  %v1262_v33 = vcombine.low %v1254_v20, %v1261_v30  ;;  %v1418_v6 = vrot.slane %v1408_v56, %v3981_v28  ;;  %v1425_v13 = vrot.slane %v1409_v60, %v3981_v28  ;;  %v4399_v3 = vld [vmem:[%s4765_s1 + $0x110] sm:$0xff] }
  0x3e   : > { %3754 = vmatpush3.bf16.msra.mxu0 %v1479_v47  ;;  %3761 = vmatprep.subr.bf16.mxu1 %v3854_v4  ;;  %v1674_v39 = vpack.c.bf16 %v3563_v55, %v3562_v45  ;;  %v1411_v40 = vcombine.low %v4321_v35, %v4335_v61  ;;  %v1432_v44 = vrot.slane %v1410_v62, %v3981_v28 }
  0x3f   : > { %v1279_v50 = vpack.c.bf16 %v1276_v27, %v1262_v33  ;;  %3755 = vmatprep.subr.bf16.mxu0 %v3854_v4  ;;  %3757 = vmatprep.mubr.msk.bf16.mxu0 %vm3855_vm0, %v3854_v4  ;;  %v1440_v48 = vcombine.low %v1418_v6, %v1425_v13  ;;  %v4354_v52 = vrot.slane %v3559_v16, %v3981_v28 }
  0x40   : > { %v4357_v53 = vrot.slane %v1411_v40, %v3981_v28  ;;  %v1463_v57 = vrot.slane %v4339_v19, %v3981_v28  ;;  %v4362_v7 = vrot.slane %v1586_v59, %v3981_v28  ;;  %v1602_v10 = vcombine.low %v4155_v32, %v4167_v49  ;;  %v3572_v32 = vld [vmem:[%s4765_s1 + $0x108] sm:$0xff]  ;;  %v4385_v49 = vld [vmem:[%s4765_s1 + $0x120] sm:$0xff] }
  0x41   : > { %3750 = vmatmul.mubr.msk.bf16.vlgmr.msra.gmra.mrb[8].mxu1 %vm467_vm1, %v1279_v50  ;;  %v1448_v24 = vrot.slane %v1440_v48, %v3981_v28  ;;  %v4370_v25 = vcombine.high %v4354_v52, %v4354_v52  ;;  %v1603_v31 = vcombine.low %v4177_v54, %v4158_v43  ;;  %v1604_v37 = vcombine.low %v4180_v22, %v4184_v23 }
  0x42   : > { %3762 = vmatpush3.bf16.msra.mxu1 %v1673_v51  ;;  %3756 = vmatpush3.bf16.msra.mxu0 %v1480_v18  ;;  %v1441_v43 = vcombine.low %v1432_v44, %v4357_v53  ;;  %v1605_v54 = vcombine.low %v4354_v52, %v4362_v7  ;;  %v1612_v22 = vrot.slane %v1602_v10, %v3981_v28 }
  0x43   : > { %3763 = vmatprep.subr.bf16.mxu1 %v3854_v4  ;;  %3765 = vmatprep.mubr.msk.bf16.mxu1 %vm3855_vm0, %v3854_v4  ;;  %v1619_v47 = vrot.slane %v1603_v31, %v3981_v28  ;;  %v1626_v51 = vrot.slane %v1604_v37, %v3981_v28  ;;  %v1657_v8 = vrot.slane %v4370_v25, %v3981_v28 }
  0x44   : > { %3769 = vmatprep.subr.bf16.mxu0 %v3854_v4  ;;  %v1455_v18 = vrot.slane %v1441_v43, %v3981_v28  ;;  %v1470_v16 = vrot.slane %v1463_v57, %v3981_v28  ;;  %v4418_v20 = vrot.slane %v1605_v54, %v3981_v28  ;;  %v1868_v27 = vpack.c.bf16 %v3572_v32, %v3571_v15  ;;  %v3584_v57 = vld [vmem:[%s4765_s1 + $0x130] sm:$0xff] }
  0x45   : > { %v1634_v29 = vcombine.low %v1612_v22, %v1619_v47  ;;  %v1664_v30 = vrot.slane %v1657_v8, %v3981_v28  ;;  %v2062_v45 = vpack.c.bf16 %v4394_v36, %v4385_v49  ;;  %v1869_v55 = vpack.c.bf16 %v4404_v11, %v4399_v3  ;;  %v4477_v22 = vld [vmem:[%s4765_s1 + $0x140] sm:$0xff]  ;;  %v4494_v11 = vld [vmem:[%s4765_s1 + $0x168] sm:$0xff] }
  0x46   : > { %3764 = vmatpush3.bf16.msra.mxu1 %v1674_v39  ;;  %v1456_v56 = vcombine.low %v1448_v24, %v1455_v18  ;;  %v1635_v60 = vcombine.low %v1626_v51, %v4418_v20  ;;  %v1781_v62 = vcombine.high %v3570_v9, %v3570_v9  ;;  %v4428_v59 = vrot.slane %v3570_v9, %v3981_v28  ;;  %v4504_v18 = vld [vmem:[%s4765_s1 + $0x150] sm:$0xff] }
  0x47   : > { %v1642_v33 = vrot.slane %v1634_v29, %v3981_v28  ;;  %3777 = vmatprep.subr.bf16.mxu1 %v3854_v4  ;;  %v1798_v6 = vcombine.low %v4085_v42, %v4199_v1  ;;  %v1799_v13 = vcombine.low %v4210_v17, %v4216_v38  ;;  %v1975_v40 = vcombine.high %v3581_v41, %v3581_v41  ;;  %v3585_v42 = vld [vmem:[%s4765_s1 + $0x138] sm:$0xff] }
  0x48   : > { %v1473_v44 = vpack.c.bf16 %v1470_v16, %v1456_v56  ;;  %v1649_v39 = vrot.slane %v1635_v60, %v3981_v28  ;;  %v4438_v50 = vrot.slane %v1781_v62, %v3981_v28  ;;  %v4442_v48 = vcombine.high %v4428_v59, %v4428_v59  ;;  %v4509_v16 = vld [vmem:[%s4765_s1 + $0x158] sm:$0xff]  ;;  %v3592_v56 = vld.sshfl [vmem:[%s3979_s29 + $0x22] sm:$0x13 pattern:$0x75316420] }
  0x49   : > { %v1814_v1 = vrot.slane %v1798_v6, %v3981_v28  ;;  %v1821_v17 = vrot.slane %v1799_v13, %v3981_v28  ;;  %v4453_v10 = vrot.slane %v3581_v41, %v3981_v28  ;;  %v4456_v24 = vrot.slane %v1975_v40, %v3981_v28  ;;  %v3603_v6 = vld.sshfl [vmem:[%s3979_s29 + $0x23] sm:$0x13 pattern:$0x75316420] }
  0x4a   : > { %3758 = vmatmul.mubr.msk.bf16.vlgmr.msra.gmra.mrb[12].mxu0 %vm467_vm1, %v1473_v44  ;;  %v1650_v31 = vcombine.low %v1642_v33, %v1649_v39  ;;  %v1800_v37 = vcombine.low %v4428_v59, %v4438_v50  ;;  %v1852_v15 = vrot.slane %v4442_v48, %v3981_v28  ;;  %v1992_v32 = vcombine.low %v4045_v58, %v4246_v34  ;;  %v3594_v58 = vld [vmem:[%s4765_s1 + $0x148] sm:$0xff] }
  0x4b   : > { %3770 = vmatpush3.bf16.msra.mxu0 %v1868_v27  ;;  %3773 = vmatprep.mubr.msk.bf16.mxu0 %vm3855_vm0, %v3854_v4  ;;  %v1829_v49 = vcombine.low %v4102_v63, %v1814_v1  ;;  %v4470_v43 = vcombine.high %v4453_v10, %v4453_v10  ;;  %v1993_v54 = vcombine.low %v4249_v26, %v4267_v0  ;;  %v4489_v26 = vld [vmem:[%s4765_s1 + $0x160] sm:$0xff] }
  0x4c   : > { %v1667_v34 = vpack.c.bf16 %v1664_v30, %v1650_v31  ;;  %3771 = vmatprep.subr.bf16.mxu0 %v3854_v4  ;;  %v2063_v63 = vpack.c.bf16 %v3585_v42, %v3584_v57  ;;  %v1828_v36 = vrot.slane %v1800_v37, %v3981_v28  ;;  %v1994_v3 = vcombine.low %v4453_v10, %v4456_v24 }
  0x4d   : > { %v1859_v47 = vrot.slane %v1852_v15, %v3981_v28  ;;  %v2008_v51 = vrot.slane %v1992_v32, %v3981_v28  ;;  %v2015_v8 = vrot.slane %v1993_v54, %v3981_v28  ;;  %v2046_v9 = vrot.slane %v4470_v43, %v3981_v28 }
  0x4e   : > { %3766 = vmatmul.mubr.msk.bf16.vlgmr.msra.gmra.mrb[12].mxu1 %vm467_vm1, %v1667_v34  ;;  %v1830_v27 = vcombine.low %v1821_v17, %v1828_v36  ;;  %v1837_v41 = vrot.slane %v1829_v49, %v3981_v28  ;;  %v2022_v29 = vrot.slane %v1994_v3, %v3981_v28  ;;  %v2256_v30 = vpack.c.bf16 %v3594_v58, %v4477_v22  ;;  %v3607_v49 = vld [vmem:[%s4765_s1 + $0x178] sm:$0xff] }
  0x4f   : > { %3778 = vmatpush3.bf16.msra.mxu1 %v2062_v45  ;;  %3772 = vmatpush3.bf16.msra.mxu0 %v1869_v55  ;;  %v2023_v60 = vcombine.low %v4067_v12, %v2008_v51  ;;  %v2053_v62 = vrot.slane %v2046_v9, %v3981_v28  ;;  %v2450_v33 = vpack.c.bf16 %v4494_v11, %v4489_v26  ;;  %v3627_v9 = vld [vmem:[%s4765_s1 + $0x1a8] sm:$0xff] }
  0x50   : > { %3779 = vmatprep.subr.bf16.mxu1 %v3854_v4  ;;  %3781 = vmatprep.mubr.msk.bf16.mxu1 %vm3855_vm0, %v3854_v4  ;;  %v1844_v13 = vrot.slane %v1830_v27, %v3981_v28  ;;  %v2024_v40 = vcombine.low %v2015_v8, %v2022_v29  ;;  %v2257_v45 = vpack.c.bf16 %v4509_v16, %v4504_v18  ;;  %v4608_v29 = vld [vmem:[%s4765_s1 + $0x198] sm:$0xff] }
  0x51   : > { %3785 = vmatprep.subr.bf16.mxu0 %v3854_v4  ;;  %v2031_v12 = vrot.slane %v2023_v60, %v3981_v28  ;;  %v2169_v55 = vcombine.high %v3592_v56, %v3592_v56  ;;  %v4530_v44 = vrot.slane %v3592_v56, %v3981_v28  ;;  %v2186_v39 = vcombine.low %v4129_v14, %v4321_v35 }
  0x52   : > { %v1845_v57 = vcombine.low %v1837_v41, %v1844_v13  ;;  %v2038_v42 = vrot.slane %v2024_v40, %v3981_v28  ;;  %v2187_v1 = vcombine.low %v4335_v61, %v4339_v19  ;;  %v2363_v17 = vcombine.high %v3603_v6, %v3603_v6  ;;  %v3606_v61 = vld [vmem:[%s4765_s1 + $0x170] sm:$0xff] }
  0x53   : > { %3780 = vmatpush3.bf16.msra.mxu1 %v2063_v63  ;;  %v4538_v31 = vrot.slane %v2169_v55, %v3981_v28  ;;  %v4542_v37 = vcombine.high %v4530_v44, %v4530_v44  ;;  %v2202_v15 = vrot.slane %v2186_v39, %v3981_v28  ;;  %v4546_v32 = vrot.slane %v3603_v6, %v3981_v28  ;;  %v4603_v41 = vld [vmem:[%s4765_s1 + $0x190] sm:$0xff]  ;;  %v3625_v55 = vld.sshfl [vmem:[%s3979_s29 + $0x29] sm:$0x13 pattern:$0x75316420] }
  0x54   : > { %v1862_v14 = vpack.c.bf16 %v1859_v47, %v1845_v57  ;;  %v2039_v35 = vcombine.low %v2031_v12, %v2038_v42  ;;  %3793 = vmatprep.subr.bf16.mxu1 %v3854_v4  ;;  %v2209_v54 = vrot.slane %v2187_v1, %v3981_v28  ;;  %v4557_v22 = vrot.slane %v2363_v17, %v3981_v28 }
  0x55   : > { %v2188_v58 = vcombine.low %v4530_v44, %v4538_v31  ;;  %v2217_v34 = vcombine.low %v4151_v5, %v2202_v15  ;;  %v2240_v63 = vrot.slane %v4542_v37, %v3981_v28  ;;  %v4566_v36 = vcombine.high %v4546_v32, %v4546_v32  ;;  %v4578_v5 = vld [vmem:[%s4765_s1 + $0x180] sm:$0xff] }
  0x56   : > { %3774 = vmatmul.mubr.msk.bf16.vlgmr.msra.gmra.mrb[16].mxu0 %vm467_vm1, %v1862_v14  ;;  %v2056_v3 = vpack.c.bf16 %v2053_v62, %v2039_v35  ;;  %v2380_v26 = vcombine.low %v4184_v23, %v4354_v52  ;;  %v2381_v11 = vcombine.low %v4362_v7, %v4370_v25  ;;  %v2382_v47 = vcombine.low %v4546_v32, %v4557_v22  ;;  %v3616_v52 = vld [vmem:[%s4765_s1 + $0x188] sm:$0xff]  ;;  %v4590_v7 = vld [vmem:[%s4765_s1 + $0x1a0] sm:$0xff] }
  0x57   : > { %3786 = vmatpush3.bf16.msra.mxu0 %v2256_v30  ;;  %v2451_v51 = vpack.c.bf16 %v3607_v49, %v3606_v61  ;;  %3789 = vmatprep.mubr.msk.bf16.mxu0 %vm3855_vm0, %v3854_v4  ;;  %v2216_v8 = vrot.slane %v2188_v58, %v3981_v28  ;;  %v2225_v23 = vrot.slane %v2217_v34, %v3981_v28  ;;  %v3614_v30 = vld.sshfl [vmem:[%s3979_s29 + $0x28] sm:$0x13 pattern:$0x75316420] }
  0x58   : > { %3782 = vmatmul.mubr.msk.bf16.vlgmr.msra.gmra.mrb[16].mxu1 %vm467_vm1, %v2056_v3  ;;  %3787 = vmatprep.subr.bf16.mxu0 %v3854_v4  ;;  %v2396_v18 = vrot.slane %v2380_v26, %v3981_v28  ;;  %v2403_v16 = vrot.slane %v2381_v11, %v3981_v28  ;;  %v2410_v27 = vrot.slane %v2382_v47, %v3981_v28 }
  0x59   : > { %3794 = vmatpush3.bf16.msra.mxu1 %v2450_v33  ;;  %3797 = vmatprep.mubr.msk.bf16.mxu1 %vm3855_vm0, %v3854_v4  ;;  %v2218_v56 = vcombine.low %v2209_v54, %v2216_v8  ;;  %v2247_v60 = vrot.slane %v2240_v63, %v3981_v28  ;;  %v2434_v62 = vrot.slane %v4566_v36, %v3981_v28 }
  0x5a   : > { %3795 = vmatprep.subr.bf16.mxu1 %v3854_v4  ;;  %v2411_v6 = vcombine.low %v4206_v2, %v2396_v18  ;;  %v2412_v13 = vcombine.low %v2403_v16, %v2410_v27  ;;  %v2645_v40 = vpack.c.bf16 %v3616_v52, %v4578_v5  ;;  %v2839_v12 = vpack.c.bf16 %v3627_v9, %v4590_v7  ;;  %v3637_v18 = vld [vmem:[%s4765_s1 + $0x1c0] sm:$0xff]  ;;  %v3649_v27 = vld [vmem:[%s4765_s1 + $0x1e8] sm:$0xff] }
  0x5b   : > { %3788 = vmatpush3.bf16.msra.mxu0 %v2257_v45  ;;  %v2232_v33 = vrot.slane %v2218_v56, %v3981_v28  ;;  %v2441_v39 = vrot.slane %v2434_v62, %v3981_v28  ;;  %v2646_v57 = vpack.c.bf16 %v4608_v29, %v4603_v41  ;;  %v2558_v42 = vcombine.high %v3614_v30, %v3614_v30  ;;  %v3648_v16 = vld [vmem:[%s4765_s1 + $0x1e0] sm:$0xff]  ;;  %v3636_v41 = vld.sshfl [vmem:[%s3979_s29 + $0x2a] sm:$0x13 pattern:$0x75316420] }
  0x5c   : > { %3801 = vmatprep.subr.bf16.mxu0 %v3854_v4  ;;  %v2419_v1 = vrot.slane %v2411_v6, %v3981_v28  ;;  %v2426_v2 = vrot.slane %v2412_v13, %v3981_v28  ;;  %v2565_v17 = vrot.slane %v3614_v30, %v3981_v28  ;;  %v2575_v15 = vcombine.low %v4216_v38, %v4428_v59  ;;  %v3628_v38 = vld [vmem:[%s4765_s1 + $0x1b0] sm:$0xff]  ;;  %v3629_v59 = vld [vmem:[%s4765_s1 + $0x1b8] sm:$0xff] }
  0x5d   : > { %3796 = vmatpush3.bf16.msra.mxu1 %v2451_v51  ;;  %v2233_v45 = vcombine.low %v2225_v23, %v2232_v33  ;;  %v2572_v14 = vrot.slane %v2558_v42, %v3981_v28  ;;  %v2576_v35 = vcombine.low %v4438_v50, %v4442_v48  ;;  %v2752_v61 = vcombine.high %v3625_v55, %v3625_v55  ;;  %v3647_v33 = vld.sshfl [vmem:[%s3979_s29 + $0x2b] sm:$0x13 pattern:$0x75316420] }
  0x5e   : > { %v2427_v49 = vcombine.low %v2419_v1, %v2426_v2  ;;  %3809 = vmatprep.subr.bf16.mxu1 %v3854_v4  ;;  %v2573_v54 = vcombine.high %v2565_v17, %v2565_v17  ;;  %v2591_v58 = vrot.slane %v2575_v15, %v3981_v28  ;;  %v2759_v34 = vrot.slane %v3625_v55, %v3981_v28 }
  0x5f   : > { %v2250_v63 = vpack.c.bf16 %v2247_v60, %v2233_v45  ;;  %v2577_v3 = vcombine.low %v2565_v17, %v2572_v14  ;;  %v2598_v50 = vrot.slane %v2576_v35, %v3981_v28  ;;  %v2766_v48 = vrot.slane %v2752_v61, %v3981_v28 }
  0x60   : > { %v2444_v26 = vpack.c.bf16 %v2441_v39, %v2427_v49  ;;  %v2606_v11 = vcombine.low %v4242_v21, %v2591_v58  ;;  %v2629_v47 = vrot.slane %v2573_v54, %v3981_v28  ;;  %v2767_v5 = vcombine.high %v2759_v34, %v2759_v34 }
  0x61   : > { %3790 = vmatmul.mubr.msk.bf16.vlgmr.msra.gmra.mrb[20].mxu0 %vm467_vm1, %v2250_v63  ;;  %v2605_v51 = vrot.slane %v2577_v3, %v3981_v28  ;;  %v2769_v8 = vcombine.low %v4267_v0, %v4453_v10  ;;  %v2770_v23 = vcombine.low %v4456_v24, %v4470_v43  ;;  %v2771_v52 = vcombine.low %v2759_v34, %v2766_v48  ;;  %v3638_v0 = vld [vmem:[%s4765_s1 + $0x1c8] sm:$0xff] }
  0x62   : > { %3798 = vmatmul.mubr.msk.bf16.vlgmr.msra.gmra.mrb[20].mxu1 %vm467_vm1, %v2444_v26  ;;  %3802 = vmatpush3.bf16.msra.mxu0 %v2645_v40  ;;  %v2840_v7 = vpack.c.bf16 %v3629_v59, %v3628_v38  ;;  %v2614_v21 = vrot.slane %v2606_v11, %v3981_v28  ;;  %v2823_v9 = vrot.slane %v2767_v5, %v3981_v28 }
  0x63   : > { %3810 = vmatpush3.bf16.msra.mxu1 %v2839_v12  ;;  %3803 = vmatprep.subr.bf16.mxu0 %v3854_v4  ;;  %v2607_v10 = vcombine.low %v2598_v50, %v2605_v51  ;;  %v2785_v24 = vrot.slane %v2769_v8, %v3981_v28  ;;  %v2792_v43 = vrot.slane %v2770_v23, %v3981_v28 }
  0x64   : > { %3811 = vmatprep.subr.bf16.mxu1 %v3854_v4  ;;  %3805 = vmatprep.mubr.msk.bf16.mxu0 %vm3855_vm0, %v3854_v4  ;;  %v2636_v29 = vrot.slane %v2629_v47, %v3981_v28  ;;  %v2799_v30 = vrot.slane %v2771_v52, %v3981_v28  ;;  %v2830_v62 = vrot.slane %v2823_v9, %v3981_v28 }
  0x65   : > { %3813 = vmatprep.mubr.msk.bf16.mxu1 %vm3855_vm0, %v3854_v4  ;;  %v2621_v56 = vrot.slane %v2607_v10, %v3981_v28  ;;  %v2800_v60 = vcombine.low %v4302_v46, %v2785_v24  ;;  %v3033_v6 = vpack.c.bf16 %v3638_v0, %v3637_v18  ;;  %v3227_v40 = vpack.c.bf16 %v3649_v27, %v3648_v16  ;;  %v3639_v46 = vld [vmem:[%s4765_s1 + $0x1d0] sm:$0xff] }
  0x66   : > { %3804 = vmatpush3.bf16.msra.mxu0 %v2646_v57  ;;  %v2801_v13 = vcombine.low %v2792_v43, %v2799_v30  ;;  %v2946_v12 = vcombine.high %v3636_v41, %v3636_v41  ;;  %v2953_v55 = vrot.slane %v3636_v41, %v3981_v28  ;;  %v3640_v57 = vld [vmem:[%s4765_s1 + $0x1d8] sm:$0xff]  ;;  %v2963_v1 = vcombine.low %v4339_v19, %v4530_v44  ;;  %v3650_v44 = vld [vmem:[%s4765_s1 + $0x1f0] sm:$0xff] }
  0x67   : > { %3812 = vmatpush3.bf16.msra.mxu1 %v2840_v7  ;;  %3817 = vmatprep.subr.bf16.mxu0 %v3854_v4  ;;  %v2622_v39 = vcombine.low %v2614_v21, %v2621_v56  ;;  %v2808_v42 = vrot.slane %v2800_v60, %v3981_v28  ;;  %v2964_v45 = vcombine.low %v4538_v31, %v4542_v37  ;;  %v3651_v31 = vld [vmem:[%s4765_s1 + $0x1f8] sm:$0xff] }
  0x68   : > { %v2815_v2 = vrot.slane %v2801_v13, %v3981_v28  ;;  %3825 = vmatprep.subr.bf16.mxu1 %v3854_v4  ;;  %v2960_v17 = vrot.slane %v2946_v12, %v3981_v28  ;;  %v2961_v15 = vcombine.high %v2953_v55, %v2953_v55  ;;  %v2979_v35 = vrot.slane %v2963_v1, %v3981_v28 }
  0x69   : > { %v2639_v14 = vpack.c.bf16 %v2636_v29, %v2622_v39  ;;  %v3140_v61 = vcombine.high %v3647_v33, %v3647_v33  ;;  %v3147_v49 = vrot.slane %v3647_v33, %v3981_v28  ;;  %v3034_v58 = vpack.c.bf16 %v3640_v57, %v3639_v46 }
  0x6a   : > { %v2816_v54 = vcombine.low %v2808_v42, %v2815_v2  ;;  %v2965_v34 = vcombine.low %v2953_v55, %v2960_v17  ;;  %v2986_v19 = vrot.slane %v2964_v45, %v3981_v28  ;;  %v2994_v37 = vcombine.low %v4357_v53, %v2979_v35 }
  0x6b   : > { %3806 = vmatmul.mubr.msk.bf16.vlgmr.msra.gmra.mrb[24].mxu0 %vm467_vm1, %v2639_v14  ;;  %v3154_v63 = vrot.slane %v3140_v61, %v3981_v28  ;;  %v3155_v38 = vcombine.high %v3147_v49, %v3147_v49  ;;  %v3157_v59 = vcombine.low %v4370_v25, %v4546_v32  ;;  %v3017_v48 = vrot.slane %v2961_v15, %v3981_v28 }
  0x6c   : > { %v2833_v3 = vpack.c.bf16 %v2830_v62, %v2816_v54  ;;  %3818 = vmatpush3.bf16.msra.mxu0 %v3033_v6  ;;  %3821 = vmatprep.mubr.msk.bf16.mxu0 %vm3855_vm0, %v3854_v4  ;;  %v2993_v50 = vrot.slane %v2965_v34, %v3981_v28  ;;  %v3158_v53 = vcombine.low %v4557_v22, %v4566_v36 }
  0x6d   : > { %3819 = vmatprep.subr.bf16.mxu0 %v3854_v4  ;;  %v3159_v26 = vcombine.low %v3147_v49, %v3154_v63  ;;  %v3173_v11 = vrot.slane %v3157_v59, %v3981_v28  ;;  %v3228_v25 = vpack.c.bf16 %v3651_v31, %v3650_v44  ;;  %v3002_v47 = vrot.slane %v2994_v37, %v3981_v28 }
  0x6e   : > { %3814 = vmatmul.mubr.msk.bf16.vlgmr.msra.gmra.mrb[24].mxu1 %vm467_vm1, %v2833_v3  ;;  %v2995_v32 = vcombine.low %v2986_v19, %v2993_v50  ;;  %v3211_v5 = vrot.slane %v3155_v38, %v3981_v28  ;;  %v3180_v51 = vrot.slane %v3158_v53, %v3981_v28  ;;  %v3024_v23 = vrot.slane %v3017_v48, %v3981_v28 }
  0x6f   : > { %3826 = vmatpush3.bf16.msra.mxu1 %v3227_v40  ;;  %3829 = vmatprep.mubr.msk.bf16.mxu1 %vm3855_vm0, %v3854_v4  ;;  %v3187_v8 = vrot.slane %v3159_v26, %v3981_v28  ;;  %v3188_v22 = vcombine.low %v4418_v20, %v3173_v11 }
  0x70   : > { %3820 = vmatpush3.bf16.msra.mxu0 %v3034_v58  ;;  %3827 = vmatprep.subr.bf16.mxu1 %v3854_v4  ;;  %v3009_v36 = vrot.slane %v2995_v32, %v3981_v28  ;;  %v3218_v18 = vrot.slane %v3211_v5, %v3981_v28 }
  0x71   : > { %v3189_v52 = vcombine.low %v3180_v51, %v3187_v8  ;;  %v3196_v7 = vrot.slane %v3188_v22, %v3981_v28 }
  0x72   : > { %v3010_v21 = vcombine.low %v3002_v47, %v3009_v36 }
  0x73   : > { %3828 = vmatpush3.bf16.msra.mxu1 %v3228_v25  ;;  %v3203_v9 = vrot.slane %v3189_v52, %v3981_v28 }
  0x74   : > { %v3027_v0 = vpack.c.bf16 %v3024_v23, %v3010_v21 }
  0x75   : > { %v3204_v10 = vcombine.low %v3196_v7, %v3203_v9 }
  0x76   : > { %3822 = vmatmul.mubr.msk.bf16.vlgmr.msra.gmra.mrb[28].mxu0 %vm467_vm1, %v3027_v0 }
  0x77   : > { %v3221_v20 = vpack.c.bf16 %v3218_v18, %v3204_v10 }
  0x79   : > { %3830 = vmatmul.mubr.msk.bf16.vlgmr.msra.gmra.mrb[28].mxu1 %vm467_vm1, %v3221_v20 }
  0xf7   : > { %v505_v4 = vpop.f32.mrb[0].mxu0 }
  0xf8   : > { %v3711_v24 = vpop.f32.mrb[1].mxu0 }
  0xf9   : > { %v508_v43 = vpop.f32.mrb[2].mxu0 }
  0xfa   : > { %v3712_v16 = vpop.f32.mrb[3].mxu0 }
  0xfc   : > { %v549_v27 = vpop.f32.mrb[0].mxu1 }
  0xfd   : > { %v550_v41 = vadd.f32 %v549_v27, %v505_v4  ;;  %v3719_v29 = vpop.f32.mrb[1].mxu1 }
  0xfe   : > { %v552_v30 = vpop.f32.mrb[2].mxu1 }
  0xff   : > { %v553_v56 = vadd.f32 %v552_v30, %v508_v43  ;;  %v3720_v60 = vpop.f32.mrb[3].mxu1 }
 0x104   : > { %v741_v62 = vpop.f32.mrb[4].mxu0 }
 0x105   : > { %v748_v6 = vadd.f32 %v741_v62, %v550_v41  ;;  %v3727_v13 = vpop.f32.mrb[5].mxu0 }
 0x106   : > { %v744_v40 = vpop.f32.mrb[6].mxu0 }
 0x107   : > { %v749_v12 = vadd.f32 %v744_v40, %v553_v56  ;;  %v3728_v55 = vpop.f32.mrb[7].mxu0 }
 0x10b   : > { %v935_v33 = vpop.f32.mrb[4].mxu1 }
 0x10c   : > { %v942_v39 = vadd.f32 %v935_v33, %v748_v6  ;;  %v3735_v42 = vpop.f32.mrb[5].mxu1 }
 0x10d   : > { %v938_v46 = vpop.f32.mrb[6].mxu1 }
 0x10e   : > { %v943_v57 = vadd.f32 %v938_v46, %v749_v12  ;;  %v3736_v1 = vpop.f32.mrb[7].mxu1 }
 0x110   : > { %v1130_v2 = vpop.f32.mrb[8].mxu0 }
 0x111   : > { %v1137_v17 = vadd.f32 %v1130_v2, %v942_v39  ;;  %v3743_v15 = vpop.f32.mrb[9].mxu0 }
 0x112   : > { %v1133_v45 = vpop.f32.mrb[10].mxu0  ;;  %v3653_v15 = vld [vmem:[%s4766_s2] ss:$0 sm:$0xff] }
 0x113   : > { %v1138_v14 = vadd.f32 %v1133_v45, %v943_v57  ;;  %v3744_v35 = vpop.f32.mrb[11].mxu0 }
 0x114   : > { %v1324_v61 = vpop.f32.mrb[8].mxu1 }
 0x115   : > { %v1331_v49 = vadd.f32 %v1324_v61, %v1137_v17  ;;  %v3751_v54 = vpop.f32.mrb[9].mxu1 }
 0x116   : > { %v1327_v58 = vpop.f32.mrb[10].mxu1 }
 0x117   : > { %v1332_v34 = vadd.f32 %v1327_v58, %v1138_v14  ;;  %v3752_v19 = vpop.f32.mrb[11].mxu1 }
 0x11d   : > { %v1518_v44 = vpop.f32.mrb[12].mxu0 }
 0x11e   : > { %v1525_v31 = vadd.f32 %v1518_v44, %v1331_v49  ;;  %v3759_v37 = vpop.f32.mrb[13].mxu0 }
 0x11f   : > { %v1521_v63 = vpop.f32.mrb[14].mxu0 }
 0x120   : > { %v1526_v38 = vadd.f32 %v1521_v63, %v1332_v34  ;;  %v3760_v59 = vpop.f32.mrb[15].mxu0 }
 0x121   : > { %v1712_v3 = vpop.f32.mrb[12].mxu1 }
 0x122   : > { %v1719_v50 = vadd.f32 %v1712_v3, %v1525_v31  ;;  %v3767_v48 = vpop.f32.mrb[13].mxu1 }
 0x123   : > { %v1715_v53 = vpop.f32.mrb[14].mxu1 }
 0x124   : > { %v1720_v26 = vadd.f32 %v1715_v53, %v1526_v38  ;;  %v3768_v11 = vpop.f32.mrb[15].mxu1 }
 0x129   : > { %v1907_v25 = vpop.f32.mrb[16].mxu0 }
 0x12a   : > { %v1914_v32 = vadd.f32 %v1907_v25, %v1719_v50  ;;  %v3775_v47 = vpop.f32.mrb[17].mxu0 }
 0x12b   : > { %v2101_v5 = vpop.f32.mrb[16].mxu1  ;;  %v1910_v51 = vpop.f32.mrb[18].mxu0 }
 0x12c   : > { %v2108_v8 = vadd.f32 %v2101_v5, %v1914_v32  ;;  %v3783_v22 = vpop.f32.mrb[17].mxu1  ;;  %v1915_v36 = vadd.f32 %v1910_v51, %v1720_v26  ;;  %v3776_v23 = vpop.f32.mrb[19].mxu0 }
 0x12d   : > { %v2104_v52 = vpop.f32.mrb[18].mxu1 }
 0x12e   : > { %v2109_v7 = vadd.f32 %v2104_v52, %v1915_v36  ;;  %v3784_v21 = vpop.f32.mrb[19].mxu1 }
 0x134   : > { %v2295_v9 = vpop.f32.mrb[20].mxu0 }
 0x135   : > { %v2302_v18 = vadd.f32 %v2295_v9, %v2108_v8  ;;  %v2489_v0 = vpop.f32.mrb[20].mxu1  ;;  %v3791_v10 = vpop.f32.mrb[21].mxu0 }
 0x136   : > { %v3799_v20 = vpop.f32.mrb[21].mxu1  ;;  %v2298_v4 = vpop.f32.mrb[22].mxu0 }
 0x137   : > { %v2496_v24 = vadd.f32 %v2489_v0, %v2302_v18  ;;  %v2303_v43 = vadd.f32 %v2298_v4, %v2109_v7  ;;  %v2492_v16 = vpop.f32.mrb[22].mxu1  ;;  %v3792_v27 = vpop.f32.mrb[23].mxu0 }
 0x138   : > { %v3800_v41 = vpop.f32.mrb[23].mxu1 }
 0x139   : > { %v2497_v29 = vadd.f32 %v2492_v16, %v2303_v43 }
 0x13e   : > { %v2684_v30 = vpop.f32.mrb[24].mxu0 }
 0x13f   : > { %v2691_v56 = vadd.f32 %v2684_v30, %v2496_v24  ;;  %v3807_v60 = vpop.f32.mrb[25].mxu0 }
 0x140   : > { %v2687_v62 = vpop.f32.mrb[26].mxu0 }
 0x141   : > { %v2878_v6 = vpop.f32.mrb[24].mxu1  ;;  %v2692_v13 = vadd.f32 %v2687_v62, %v2497_v29  ;;  %v3808_v40 = vpop.f32.mrb[27].mxu0 }
 0x142   : > { %v2885_v12 = vadd.f32 %v2878_v6, %v2691_v56  ;;  %v3815_v55 = vpop.f32.mrb[25].mxu1 }
 0x143   : > { %v2881_v33 = vpop.f32.mrb[26].mxu1 }
 0x144   : > { %v2886_v39 = vadd.f32 %v2881_v33, %v2692_v13  ;;  %v3816_v42 = vpop.f32.mrb[27].mxu1 }
 0x149   : > { %v3072_v46 = vpop.f32.mrb[28].mxu0 }
 0x14a   : > { %v3079_v57 = vadd.f32 %v3072_v46, %v2885_v12  ;;  %v3823_v1 = vpop.f32.mrb[29].mxu0 }
 0x14b   : > { %v3075_v2 = vpop.f32.mrb[30].mxu0 }
 0x14c   : > { %v3266_v17 = vpop.f32.mrb[28].mxu1  ;;  %v3080_v45 = vadd.f32 %v3075_v2, %v2886_v39  ;;  %v3824_v14 = vpop.f32.mrb[31].mxu0 }
 0x14d   : > { %v3273_v35 = vadd.f32 %v3266_v17, %v3079_v57  ;;  %v3831_v61 = vpop.f32.mrb[29].mxu1 }
 0x14e   : > { %v3269_v49 = vpop.f32.mrb[30].mxu1 }
 0x14f   : > { %v3282_v54 = vadd.f32 %v3653_v15, %v3273_v35  ;;  %v3274_v58 = vadd.f32 %v3269_v49, %v3080_v45  ;;  %v3832_v34 = vpop.f32.mrb[31].mxu1 }
 0x151   : > { %vm3284_vm2 = vcmp.ge.f32.partialorder %v3282_v54, 0.0  ;;  %v3286_v19 = vmul.f32 0.01, %v3282_v54  ;;  %v3283_v44 = vadd.f32 %v3653_v15, %v3274_v58 }
 0x153   : > { %v3288_v31 = vsel %vm3284_vm2, %v3282_v54, %v3286_v19  ;;  %vm3285_vm3 = vcmp.ge.f32.partialorder %v3283_v44, 0.0  ;;  %v3287_v37 = vmul.f32 0.01, %v3283_v44 }
 0x154   : > { %v3292_v63 = vcombine.high %v3288_v31, %v3288_v31  ;;  %v3299_v38 = vrot.slane %v3288_v31, %v3981_v28 }
 0x155   : > { %v3289_v59 = vsel %vm3285_vm3, %v3283_v44, %v3287_v37 }
 0x156   : > { %v3306_v3 = vrot.slane %v3292_v63, %v3981_v28  ;;  %v3307_v50 = vcombine.high %v3299_v38, %v3299_v38  ;;  %v3315_v48 = vrot.slane %v3299_v38, %v3981_v28  ;;  %v3347_v53 = vrot.slane %v3289_v59, %v3981_v28 }
 0x158   : > { %v3308_v26 = vcombine.high %v3306_v3, %v3306_v3  ;;  %v3329_v11 = vrot.slane %v3307_v50, %v3981_v28  ;;  %v3337_v25 = vcombine.high %v3315_v48, %v3315_v48  ;;  %v3354_v32 = vrot.slane %v3347_v53, %v3981_v28 }
 0x159   : > { %v3322_v47 = vrot.slane %v3306_v3, %v3981_v28 }
 0x15a   : > { %v3336_v5 = vrot.slane %v3308_v26, %v3981_v28  ;;  %v3339_v51 = vcombine.high %v3329_v11, %v3329_v11  ;;  %v3355_v8 = vcombine.low %v3315_v48, %v3329_v11  ;;  %v3369_v36 = vrot.slane %v3337_v25, %v3981_v28 }
 0x15b   : > { %v3415_v7 = vrot.slane %v3354_v32, %v3981_v28 }
 0x15c   : > { %v3362_v22 = vrot.slane %v3355_v8, %v3981_v28  ;;  %v3378_v23 = vcombine.low %v3339_v51, %v3322_v47  ;;  %v3654_v52 = vcombine.high %v3322_v47, %v3336_v5  ;;  %v3392_v18 = vrot.slane %v3336_v5, %v3981_v28 }
 0x15e   : > { %v3370_v21 = vcombine.low %v3362_v22, %v3369_v36  ;;  %v3385_v9 = vrot.slane %v3378_v23, %v3981_v28  ;;  %v3408_v0 = vrot.slane %v3654_v52, %v3981_v28 }
 0x160   : > { %v3377_v10 = vrot.slane %v3370_v21, %v3981_v28  ;;  %v3393_v20 = vcombine.low %v3385_v9, %v3392_v18  ;;  %v3416_v4 = vcombine.low %v3408_v0, %v3415_v7 }
 0x162   : > { %v3400_v24 = vrot.slane %v3393_v20, %v3981_v28  ;;  %3428 = vst.msk [vmem:[%s170_s30] sm:$0x7] %vm3427_vm4, %v3377_v10  ;;  %v3423_v43 = vrot.slane %v3416_v4, %v3981_v28 }
 0x164   : > { %3429 = vst.msk [vmem:[%s170_s30 + $0x4] sm:$0x7] %vm3427_vm4, %v3400_v24  ;;  %3430 = vst.msk [vmem:[%s170_s30 + $0x8] sm:$0x7] %vm3427_vm4, %v3423_v43 }
 0x165 PF: > { %s13_s12 = sadd.s32 1, %s3852_s12  }
 0x166   : > { %p10_p4 = scmp.ge.s32.totalorder %s13_s12, 4  }
 0x168   :  { %12 = sbr.rel (!%p10_p4) target bundleno = 1 (0x1), region = 80 }

</bundles_post_ra>
